<compile_context>
chip_gen: v7x
topology: tpu7x:2x2x1
jax: 0.10.0
libtpu: 0.0.40
codegen_flags: <defaults>
</compile_context>

<pallas_src>
import functools

import numpy as np
import jax
import jax.numpy as jnp
from jax import lax
from jax.experimental import pallas as pl

# ----------------------------- model config ---------------------------------
D_MODEL = 32
NHEAD = 4
DIM_FF = 64
N_ENC = 2
N_DEC = 2
DE_VOCAB = 40
EN_VOCAB = 48

_NEG_INF = -1e9
_LANE = 128
_VPAD = 128  # classifier output padded to one full lane group


def _round_up(x, m):
    return (x + m - 1) // m * m


# --------------------------- static slab layout ------------------------------
class _SlabLayout:
    """Static (Python-level) placement of every weight inside two slabs."""

    def __init__(self):
        self.mat = {}   # name -> (row_off, rows, cols)  in the bf16 matrix slab
        self.vec = {}   # name -> (row, cols)             in the f32 vector slab
        self._mrows = 0
        self._vrows = 0

    def add_mat(self, name, rows, cols):
        off = _round_up(self._mrows, 16)      # keep bf16 (16,128) tile alignment
        self.mat[name] = (off, rows, cols)
        self._mrows = off + rows

    def add_vec(self, name, cols):
        self.vec[name] = (self._vrows, cols)
        self._vrows += 1

    @property
    def mat_rows(self):
        return _round_up(self._mrows, 16)

    @property
    def vec_rows(self):
        return _round_up(self._vrows, 8)


def _build_layout():
    L = _SlabLayout()
    d, dff = D_MODEL, DIM_FF
    for i in range(N_ENC):
        p = f"enc{i}_"
        for n in ("self_wq", "self_wk", "self_wv", "self_wo"):
            L.add_mat(p + n, d, d)
        L.add_mat(p + "w1", d, dff)
        L.add_mat(p + "w2", dff, d)
        for n in ("self_bq", "self_bk", "self_bv", "self_bo"):
            L.add_vec(p + n, d)
        L.add_vec(p + "b1", dff)
        L.add_vec(p + "b2", d)
        for n in ("ln1g", "ln1b", "ln2g", "ln2b"):
            L.add_vec(p + n, d)
    for i in range(N_DEC):
        p = f"dec{i}_"
        for n in ("self_wq", "self_wk", "self_wv", "self_wo",
                  "cross_wq", "cross_wk", "cross_wv", "cross_wo"):
            L.add_mat(p + n, d, d)
        L.add_mat(p + "w1", d, dff)
        L.add_mat(p + "w2", dff, d)
        for n in ("self_bq", "self_bk", "self_bv", "self_bo",
                  "cross_bq", "cross_bk", "cross_bv", "cross_bo"):
            L.add_vec(p + n, d)
        L.add_vec(p + "b1", dff)
        L.add_vec(p + "b2", d)
        for n in ("ln1g", "ln1b", "ln2g", "ln2b", "ln3g", "ln3b"):
            L.add_vec(p + n, d)
    L.add_mat("clf_w", d, _VPAD)
    L.add_vec("clf_b", _VPAD)
    return L


_LAYOUT = _build_layout()


# ------------------------------ fused kernel ---------------------------------
def _nmt_kernel(src_ids_ref, tgt_ids_ref, pe_src_ref, pe_tgt_ref,
                enc_mask_ref, dec_mask_ref, cross_mask_ref,
                de_emb_ref, en_emb_ref, mslab_ref, vslab_ref, out_ref,
                *, layout, batch, s_tgt, nhead):
    f32 = jnp.float32
    d = D_MODEL
    dh = d // nhead

    # -- weight access at point of use (static, tile-aligned slab slices) -----
    def get_mat(name):
        off, r, c = layout.mat[name]
        return mslab_ref[off:off + r, :c]            # bf16 (r, c)

    def get_vec(name):
        row, c = layout.vec[name]
        return vslab_ref[row:row + 1, :c]            # f32 (1, c)

    def mm(x, w):
        return jnp.dot(x.astype(w.dtype), w, preferred_element_type=f32)

    # Per-head lane masks, built once from iota and reused by all attention sites.
    lane = lax.broadcasted_iota(jnp.int32, (1, d), 1)
    head_masks = [((lane >= h * dh) & (lane < (h + 1) * dh)).astype(f32)
                  for h in range(nhead)]
    scale = 1.0 / float(dh) ** 0.5
    q_masks = [hm * scale for hm in head_masks]      # fold softmax scale into q

    def layernorm(x, g, b):
        mean = jnp.mean(x, axis=-1, keepdims=True)
        xc = x - mean
        var = jnp.mean(xc * xc, axis=-1, keepdims=True)
        return xc * lax.rsqrt(var + 1e-5) * g + b

    def attention(xq, xm, prefix, mask):
        q = mm(xq, get_mat(prefix + "wq")) + get_vec(prefix + "bq")   # (Nq, D)
        k = mm(xm, get_mat(prefix + "wk")) + get_vec(prefix + "bk")   # (Nk, D)
        v = mm(xm, get_mat(prefix + "wv")) + get_vec(prefix + "bv")   # (Nk, D)
        nq = xq.shape[0]
        # Stack heads along sublanes (vreg-aligned): one score matmul, one joint
        # softmax and one context matmul cover all heads and the whole batch.
        q_stack = jnp.concatenate([q * qm for qm in q_masks], axis=0)  # (H*Nq, D)
        s = lax.dot_general(q_stack, k, (((1,), (1,)), ((), ())),
                            preferred_element_type=f32)                # (H*Nq, Nk)
        s = s + jnp.concatenate([mask] * nhead, axis=0)
        m = jnp.max(s, axis=-1, keepdims=True)
        e = jnp.exp(s - m)
        p = e * pl.reciprocal(jnp.sum(e, axis=-1, keepdims=True), approx=True)
        ctx_all = jnp.dot(p, v, preferred_element_type=f32)            # (H*Nq, D)
        ctx = jnp.zeros_like(q)
        for h in range(nhead):
            ctx = ctx + ctx_all[h * nq:(h + 1) * nq, :] * head_masks[h]
        return mm(ctx, get_mat(prefix + "wo")) + get_vec(prefix + "bo")

    def ffn(x, prefix):
        h1 = mm(x, get_mat(prefix + "w1")) + get_vec(prefix + "b1")
        h1 = jnp.maximum(h1, 0.0)
        return mm(h1, get_mat(prefix + "w2")) + get_vec(prefix + "b2")

    def embed(ids_ref, emb_ref, pe_ref):
        ids = ids_ref[...]                                            # (N, 1) int32
        vocab = emb_ref.shape[0]
        onehot = (lax.broadcasted_iota(jnp.int32, (ids.shape[0], vocab), 1)
                  == ids).astype(f32)
        return jnp.dot(onehot, emb_ref[...], preferred_element_type=f32) + pe_ref[...]

    # ------------------------------- encoder ---------------------------------
    x = embed(src_ids_ref, de_emb_ref, pe_src_ref)                    # (B*S_src, D)
    enc_mask = enc_mask_ref[...]
    for i in range(N_ENC):
        p = f"enc{i}_"
        a = attention(x, x, p + "self_", enc_mask)
        x = layernorm(x + a, get_vec(p + "ln1g"), get_vec(p + "ln1b"))
        x = layernorm(x + ffn(x, p), get_vec(p + "ln2g"), get_vec(p + "ln2b"))
    memory = x

    # ------------------------------- decoder ---------------------------------
    y = embed(tgt_ids_ref, en_emb_ref, pe_tgt_ref)                    # (B*S_tgt, D)
    dec_mask = dec_mask_ref[...]
    cross_mask = cross_mask_ref[...]
    for i in range(N_DEC):
        p = f"dec{i}_"
        a = attention(y, y, p + "self_", dec_mask)
        y = layernorm(y + a, get_vec(p + "ln1g"), get_vec(p + "ln1b"))
        # TODO(synk): no memory key-padding mask in cross-attention (decoder layer
        #   source not provided); only the batch block-diagonal mask is applied.
        a = attention(y, memory, p + "cross_", cross_mask)
        y = layernorm(y + a, get_vec(p + "ln2g"), get_vec(p + "ln2b"))
        y = layernorm(y + ffn(y, p), get_vec(p + "ln3g"), get_vec(p + "ln3b"))

    # ---------- classifier, stored directly in (S_tgt, B*_VPAD) layout --------
    logits = mm(y, get_mat("clf_w")) + get_vec("clf_b")               # (B*S_tgt, 128)
    for b in range(batch):
        out_ref[:, b * _VPAD:(b + 1) * _VPAD] = (
            logits[b * s_tgt:(b + 1) * s_tgt, :].astype(out_ref.dtype))


# ------------------------------ model glue -----------------------------------
def generate_square_subsequent_mask(sz):
    tri = jnp.tril(jnp.ones((sz, sz), jnp.float32))
    return jnp.where(tri == 1.0, 0.0, -jnp.inf)


def sinusoid_pe(seq_len, d_model):
    pos = jnp.arange(seq_len, dtype=jnp.float32)[:, None]
    i = jnp.arange(0, d_model, 2, dtype=jnp.float32)[None, :]
    ang = pos / jnp.power(10000.0, i / d_model)
    pe = jnp.zeros((seq_len, d_model), jnp.float32)
    pe = pe.at[:, 0::2].set(jnp.sin(ang))
    pe = pe.at[:, 1::2].set(jnp.cos(ang))
    return pe  # (S, D)


def _combined_mask(b, sq, sk, attn_mask, key_padding):
    """(B*sq, B*sk) additive f32 mask: batch block-diagonal (+user mask +key padding).

    Fully constant-folded by XLA when only the (constant) causal mask is given.
    Clamped to -1e9 so fully-masked rows yield uniform attention instead of NaN.
    """
    rb = jnp.arange(b * sq, dtype=jnp.int32)[:, None] // sq
    cb = jnp.arange(b * sk, dtype=jnp.int32)[None, :] // sk
    m = jnp.where(rb == cb, 0.0, _NEG_INF)
    if attn_mask is not None:
        m = m + jnp.tile(jnp.maximum(attn_mask.astype(jnp.float32), _NEG_INF), (b, b))
    if key_padding is not None:  # (B, sk) bool, True == pad
        kp = jnp.where(key_padding.reshape(b * sk).astype(bool), _NEG_INF, 0.0)
        m = m + kp[None, :]
    return jnp.maximum(m, _NEG_INF)


def nmt_forward(packed, src_ids, tgt_ids,
                src_key_padding_masks=None, tgt_key_padding_masks=None,
                src_attn_mask=None, tgt_attn_mask=None):
    b, s_src = src_ids.shape
    _, s_tgt = tgt_ids.shape
    ns, nt = b * s_src, b * s_tgt

    # Constant-foldable positional encodings tiled to the flattened (B*S) rows.
    pe_src = jnp.tile(sinusoid_pe(s_src, D_MODEL), (b, 1))
    pe_tgt = jnp.tile(sinusoid_pe(s_tgt, D_MODEL), (b, 1))

    enc_mask = _combined_mask(b, s_src, s_src, src_attn_mask, src_key_padding_masks)
    dec_mask = _combined_mask(b, s_tgt, s_tgt, tgt_attn_mask, tgt_key_padding_masks)
    cross_mask = _combined_mask(b, s_tgt, s_src, None, None)  # block-diag only

    src_ids_f = src_ids.reshape(ns, 1).astype(jnp.int32)
    tgt_ids_f = tgt_ids.reshape(nt, 1).astype(jnp.int32)

    kernel = functools.partial(_nmt_kernel, layout=_LAYOUT, batch=b,
                               s_tgt=s_tgt, nhead=NHEAD)

    n_attn = N_ENC + 2 * N_DEC
    n_ffn = N_ENC + N_DEC
    flops = 2 * (n_attn * (4 * nt * D_MODEL * D_MODEL + 2 * NHEAD * nt * nt * D_MODEL)
                 + n_ffn * 2 * nt * D_MODEL * DIM_FF
                 + nt * D_MODEL * _VPAD)
    cost = pl.CostEstimate(
        flops=int(flops),
        transcendentals=int(n_attn * NHEAD * nt * nt),
        bytes_accessed=int(_LAYOUT.mat_rows * _LANE * 2
                           + _LAYOUT.vec_rows * _LANE * 4 + 65536))

    out = pl.pallas_call(
        kernel,
        out_shape=jax.ShapeDtypeStruct((s_tgt, b * _VPAD), jnp.float32),
        cost_estimate=cost,
    )(src_ids_f, tgt_ids_f, pe_src, pe_tgt, enc_mask, dec_mask, cross_mask,
      packed["de_emb"], packed["en_emb"], packed["mslab"], packed["vslab"])

    # (S_tgt, B, en_vocab) like PyTorch; the reshape is free, only one tiny slice op.
    return out.reshape(s_tgt, b, _VPAD)[:, :, :EN_VOCAB]


# --------------------------- parameter init / packing ------------------------
def _dense(key, din, dout):
    return jax.random.normal(key, (din, dout), jnp.float32) * 0.02


def _init_attn(key, d):
    k = jax.random.split(key, 4)
    return dict(wq=_dense(k[0], d, d), bq=jnp.zeros((d,), jnp.float32),
                wk=_dense(k[1], d, d), bk=jnp.zeros((d,), jnp.float32),
                wv=_dense(k[2], d, d), bv=jnp.zeros((d,), jnp.float32),
                wo=_dense(k[3], d, d), bo=jnp.zeros((d,), jnp.float32))


def _init_enc_layer(key, d, dff):
    k1, k2, k3 = jax.random.split(key, 3)
    return dict(self_attn=_init_attn(k1, d),
                w1=_dense(k2, d, dff), b1=jnp.zeros((dff,), jnp.float32),
                w2=_dense(k3, dff, d), b2=jnp.zeros((d,), jnp.float32),
                ln1g=jnp.ones((d,), jnp.float32), ln1b=jnp.zeros((d,), jnp.float32),
                ln2g=jnp.ones((d,), jnp.float32), ln2b=jnp.zeros((d,), jnp.float32))


def _init_dec_layer(key, d, dff):
    k1, k2, k3, k4 = jax.random.split(key, 4)
    return dict(self_attn=_init_attn(k1, d), cross_attn=_init_attn(k2, d),
                w1=_dense(k3, d, dff), b1=jnp.zeros((dff,), jnp.float32),
                w2=_dense(k4, dff, d), b2=jnp.zeros((d,), jnp.float32),
                ln1g=jnp.ones((d,), jnp.float32), ln1b=jnp.zeros((d,), jnp.float32),
                ln2g=jnp.ones((d,), jnp.float32), ln2b=jnp.zeros((d,), jnp.float32),
                ln3g=jnp.ones((d,), jnp.float32), ln3b=jnp.zeros((d,), jnp.float32))


def init_params(key):
    keys = jax.random.split(key, 3 + N_ENC + N_DEC)
    return dict(
        de_embedding=jax.random.normal(keys[0], (DE_VOCAB, D_MODEL), jnp.float32) * 0.02,
        en_embedding=jax.random.normal(keys[1], (EN_VOCAB, D_MODEL), jnp.float32) * 0.02,
        clf_w=_dense(keys[2], D_MODEL, EN_VOCAB),
        clf_b=jnp.zeros((EN_VOCAB,), jnp.float32),
        encoder=[_init_enc_layer(keys[3 + i], D_MODEL, DIM_FF) for i in range(N_ENC)],
        decoder=[_init_dec_layer(keys[3 + N_ENC + i], D_MODEL, DIM_FF) for i in range(N_DEC)],
    )


def pack_params(params):
    """One-time host-side packing of all weights into two lane-dense slabs."""
    L = _LAYOUT
    mslab = np.zeros((L.mat_rows, _LANE), np.float32)
    vslab = np.zeros((L.vec_rows, _LANE), np.float32)

    def put_mat(name, w):
        w = np.asarray(w, np.float32)
        off, _, _ = L.mat[name]
        mslab[off:off + w.shape[0], :w.shape[1]] = w

    def put_vec(name, v):
        v = np.asarray(v, np.float32).reshape(-1)
        row, _ = L.vec[name]
        vslab[row, :v.shape[0]] = v

    def put_attn(prefix, ap):
        for n in ("wq", "wk", "wv", "wo"):
            put_mat(prefix + n, ap[n])
        for n in ("bq", "bk", "bv", "bo"):
            put_vec(prefix + n, ap[n])

    for i, lp in enumerate(params["encoder"]):
        p = f"enc{i}_"
        put_attn(p + "self_", lp["self_attn"])
        put_mat(p + "w1", lp["w1"]); put_vec(p + "b1", lp["b1"])
        put_mat(p + "w2", lp["w2"]); put_vec(p + "b2", lp["b2"])
        for n in ("ln1g", "ln1b", "ln2g", "ln2b"):
            put_vec(p + n, lp[n])
    for i, lp in enumerate(params["decoder"]):
        p = f"dec{i}_"
        put_attn(p + "self_", lp["self_attn"])
        put_attn(p + "cross_", lp["cross_attn"])
        put_mat(p + "w1", lp["w1"]); put_vec(p + "b1", lp["b1"])
        put_mat(p + "w2", lp["w2"]); put_vec(p + "b2", lp["b2"])
        for n in ("ln1g", "ln1b", "ln2g", "ln2b", "ln3g", "ln3b"):
            put_vec(p + n, lp[n])
    put_mat("clf_w", params["clf_w"])   # padded to 128 lanes at pack time
    put_vec("clf_b", params["clf_b"])

    return dict(de_emb=jnp.asarray(params["de_embedding"], jnp.float32),
                en_emb=jnp.asarray(params["en_embedding"], jnp.float32),
                mslab=jnp.asarray(mslab, dtype=jnp.bfloat16),
                vslab=jnp.asarray(vslab, dtype=jnp.float32))


# --------------------------------- main ---------------------------------------
if __name__ == "__main__":
    root = jax.random.PRNGKey(0)
    kp, ks, kt = jax.random.split(root, 3)
    packed = pack_params(init_params(kp))

    B, S_SRC, S_TGT = 2, 8, 8
    src_ids = jax.random.randint(ks, (B, S_SRC), 0, DE_VOCAB, dtype=jnp.int32)
    tgt_ids = jax.random.randint(kt, (B, S_TGT), 0, EN_VOCAB, dtype=jnp.int32)
    tgt_attn_mask = generate_square_subsequent_mask(S_TGT)

    forward = jax.jit(nmt_forward)
    logits = forward(packed, src_ids, tgt_ids, tgt_attn_mask=tgt_attn_mask)
    logits = jax.block_until_ready(logits)

    assert logits.shape == (S_TGT, B, EN_VOCAB), logits.shape
    assert bool(jnp.all(jnp.isfinite(logits)))
    print("KERNEL_OK")
</pallas_src>

<mosaic_0001>
module attributes {stable_mosaic.version = 11 : i64} {
  func.func @_nmt_kernel(%arg0: memref<16x1xi32, #tpu.memory_space<vmem>>, %arg1: memref<16x1xi32, #tpu.memory_space<vmem>>, %arg2: memref<16x32xf32, #tpu.memory_space<vmem>>, %arg3: memref<16x32xf32, #tpu.memory_space<vmem>>, %arg4: memref<16x16xf32, #tpu.memory_space<vmem>>, %arg5: memref<16x16xf32, #tpu.memory_space<vmem>>, %arg6: memref<16x16xf32, #tpu.memory_space<vmem>>, %arg7: memref<40x32xf32, #tpu.memory_space<vmem>>, %arg8: memref<48x32xf32, #tpu.memory_space<vmem>>, %arg9: memref<1184x128xbf16, #tpu.memory_space<vmem>>, %arg10: memref<56x128xf32, #tpu.memory_space<vmem>>, %arg11: memref<8x256xf32, #tpu.memory_space<vmem>>) attributes {dimension_semantics = [], scalar_prefetch = 0 : i64, scratch_operands = 0 : i64, tpu.core_type = #tpu.core_type<tc>} {
    %0 = tpu.iota {dimensions = array<i32: 1>} : vector<1x32xi32>
    %c0_i32 = arith.constant 0 : i32
    %1 = vector.broadcast %c0_i32 : i32 to vector<1x32xi32>
    %2 = arith.cmpi sge, %0, %1 : vector<1x32xi32>
    %c8_i32 = arith.constant 8 : i32
    %3 = vector.broadcast %c8_i32 : i32 to vector<1x32xi32>
    %4 = arith.cmpi slt, %0, %3 : vector<1x32xi32>
    %5 = arith.andi %2, %4 : vector<1x32xi1>
    %6 = arith.extui %5 : vector<1x32xi1> to vector<1x32xi32>
    %7 = arith.sitofp %6 : vector<1x32xi32> to vector<1x32xf32>
    %c8_i32_0 = arith.constant 8 : i32
    %8 = vector.broadcast %c8_i32_0 : i32 to vector<1x32xi32>
    %9 = arith.cmpi sge, %0, %8 : vector<1x32xi32>
    %c16_i32 = arith.constant 16 : i32
    %10 = vector.broadcast %c16_i32 : i32 to vector<1x32xi32>
    %11 = arith.cmpi slt, %0, %10 : vector<1x32xi32>
    %12 = arith.andi %9, %11 : vector<1x32xi1>
    %13 = arith.extui %12 : vector<1x32xi1> to vector<1x32xi32>
    %14 = arith.sitofp %13 : vector<1x32xi32> to vector<1x32xf32>
    %c16_i32_1 = arith.constant 16 : i32
    %15 = vector.broadcast %c16_i32_1 : i32 to vector<1x32xi32>
    %16 = arith.cmpi sge, %0, %15 : vector<1x32xi32>
    %c24_i32 = arith.constant 24 : i32
    %17 = vector.broadcast %c24_i32 : i32 to vector<1x32xi32>
    %18 = arith.cmpi slt, %0, %17 : vector<1x32xi32>
    %19 = arith.andi %16, %18 : vector<1x32xi1>
    %20 = arith.extui %19 : vector<1x32xi1> to vector<1x32xi32>
    %21 = arith.sitofp %20 : vector<1x32xi32> to vector<1x32xf32>
    %c24_i32_2 = arith.constant 24 : i32
    %22 = vector.broadcast %c24_i32_2 : i32 to vector<1x32xi32>
    %23 = arith.cmpi sge, %0, %22 : vector<1x32xi32>
    %c32_i32 = arith.constant 32 : i32
    %24 = vector.broadcast %c32_i32 : i32 to vector<1x32xi32>
    %25 = arith.cmpi slt, %0, %24 : vector<1x32xi32>
    %26 = arith.andi %23, %25 : vector<1x32xi1>
    %27 = arith.extui %26 : vector<1x32xi1> to vector<1x32xi32>
    %28 = arith.sitofp %27 : vector<1x32xi32> to vector<1x32xf32>
    %cst = arith.constant 0.353553385 : f32
    %29 = vector.broadcast %cst : f32 to vector<1x32xf32>
    %30 = arith.mulf %7, %29 : vector<1x32xf32>
    %cst_3 = arith.constant 0.353553385 : f32
    %31 = vector.broadcast %cst_3 : f32 to vector<1x32xf32>
    %32 = arith.mulf %14, %31 : vector<1x32xf32>
    %cst_4 = arith.constant 0.353553385 : f32
    %33 = vector.broadcast %cst_4 : f32 to vector<1x32xf32>
    %34 = arith.mulf %21, %33 : vector<1x32xf32>
    %cst_5 = arith.constant 0.353553385 : f32
    %35 = vector.broadcast %cst_5 : f32 to vector<1x32xf32>
    %36 = arith.mulf %28, %35 : vector<1x32xf32>
    %c0 = arith.constant 0 : index
    %c0_6 = arith.constant 0 : index
    %37 = vector.load %arg0[%c0, %c0_6] : memref<16x1xi32, #tpu.memory_space<vmem>>, vector<16x1xi32>
    %38 = tpu.iota {dimensions = array<i32: 1>} : vector<16x40xi32>
    %39 = vector.broadcast %37 : vector<16x1xi32> to vector<16x40xi32>
    %40 = arith.cmpi eq, %38, %39 : vector<16x40xi32>
    %41 = arith.extui %40 : vector<16x40xi1> to vector<16x40xi32>
    %42 = arith.sitofp %41 : vector<16x40xi32> to vector<16x40xf32>
    %c0_7 = arith.constant 0 : index
    %c0_8 = arith.constant 0 : index
    %43 = vector.load %arg7[%c0_7, %c0_8] : memref<40x32xf32, #tpu.memory_space<vmem>>, vector<40x32xf32>
    %cst_9 = arith.constant dense<0.000000e+00> : vector<16x32xf32>
    %44 = tpu.matmul %42, %43, %cst_9 {dimension_numbers = #tpu.dot_dimension_numbers<[1], [0], [0], [1], [0, 0, 1, 1], [], []>} : vector<16x40xf32>, vector<40x32xf32>, vector<16x32xf32> -> vector<16x32xf32>
    %c0_10 = arith.constant 0 : index
    %c0_11 = arith.constant 0 : index
    %45 = vector.load %arg2[%c0_10, %c0_11] : memref<16x32xf32, #tpu.memory_space<vmem>>, vector<16x32xf32>
    %46 = arith.addf %44, %45 : vector<16x32xf32>
    %c0_12 = arith.constant 0 : index
    %c0_13 = arith.constant 0 : index
    %47 = vector.load %arg4[%c0_12, %c0_13] : memref<16x16xf32, #tpu.memory_space<vmem>>, vector<16x16xf32>
    %48 = vector.shape_cast %47 : vector<16x16xf32> to vector<16x16xf32>
    %c0_14 = arith.constant 0 : index
    %c0_15 = arith.constant 0 : index
    %49 = vector.load %arg9[%c0_14, %c0_15] : memref<1184x128xbf16, #tpu.memory_space<vmem>>, vector<32x32xbf16>
    %50 = arith.truncf %46 : vector<16x32xf32> to vector<16x32xbf16>
    %cst_16 = arith.constant dense<0.000000e+00> : vector<16x32xf32>
    %51 = tpu.matmul %50, %49, %cst_16 {dimension_numbers = #tpu.dot_dimension_numbers<[1], [0], [0], [1], [0, 0, 1, 1], [], []>} : vector<16x32xbf16>, vector<32x32xbf16>, vector<16x32xf32> -> vector<16x32xf32>
    %c0_17 = arith.constant 0 : index
    %c0_18 = arith.constant 0 : index
    %52 = vector.load %arg10[%c0_17, %c0_18] : memref<56x128xf32, #tpu.memory_space<vmem>>, vector<1x32xf32>
    %53 = vector.broadcast %52 : vector<1x32xf32> to vector<16x32xf32>
    %54 = arith.addf %51, %53 : vector<16x32xf32>
    %c32 = arith.constant 32 : index
    %c0_19 = arith.constant 0 : index
    %55 = vector.load %arg9[%c32, %c0_19] : memref<1184x128xbf16, #tpu.memory_space<vmem>>, vector<32x32xbf16>
    %56 = arith.truncf %46 : vector<16x32xf32> to vector<16x32xbf16>
    %cst_20 = arith.constant dense<0.000000e+00> : vector<16x32xf32>
    %57 = tpu.matmul %56, %55, %cst_20 {dimension_numbers = #tpu.dot_dimension_numbers<[1], [0], [0], [1], [0, 0, 1, 1], [], []>} : vector<16x32xbf16>, vector<32x32xbf16>, vector<16x32xf32> -> vector<16x32xf32>
    %c1 = arith.constant 1 : index
    %c0_21 = arith.constant 0 : index
    %58 = vector.load %arg10[%c1, %c0_21] : memref<56x128xf32, #tpu.memory_space<vmem>>, vector<1x32xf32>
    %59 = vector.broadcast %58 : vector<1x32xf32> to vector<16x32xf32>
    %60 = arith.addf %57, %59 : vector<16x32xf32>
    %c64 = arith.constant 64 : index
    %c0_22 = arith.constant 0 : index
    %61 = vector.load %arg9[%c64, %c0_22] : memref<1184x128xbf16, #tpu.memory_space<vmem>>, vector<32x32xbf16>
    %62 = arith.truncf %46 : vector<16x32xf32> to vector<16x32xbf16>
    %cst_23 = arith.constant dense<0.000000e+00> : vector<16x32xf32>
    %63 = tpu.matmul %62, %61, %cst_23 {dimension_numbers = #tpu.dot_dimension_numbers<[1], [0], [0], [1], [0, 0, 1, 1], [], []>} : vector<16x32xbf16>, vector<32x32xbf16>, vector<16x32xf32> -> vector<16x32xf32>
    %c2 = arith.constant 2 : index
    %c0_24 = arith.constant 0 : index
    %64 = vector.load %arg10[%c2, %c0_24] : memref<56x128xf32, #tpu.memory_space<vmem>>, vector<1x32xf32>
    %65 = vector.broadcast %64 : vector<1x32xf32> to vector<16x32xf32>
    %66 = arith.addf %63, %65 : vector<16x32xf32>
    %67 = vector.broadcast %30 : vector<1x32xf32> to vector<16x32xf32>
    %68 = arith.mulf %54, %67 : vector<16x32xf32>
    %69 = vector.broadcast %32 : vector<1x32xf32> to vector<16x32xf32>
    %70 = arith.mulf %54, %69 : vector<16x32xf32>
    %71 = vector.broadcast %34 : vector<1x32xf32> to vector<16x32xf32>
    %72 = arith.mulf %54, %71 : vector<16x32xf32>
    %73 = vector.broadcast %36 : vector<1x32xf32> to vector<16x32xf32>
    %74 = arith.mulf %54, %73 : vector<16x32xf32>
    %75 = tpu.concatenate %68, %70, %72, %74 in 0 : vector<16x32xf32>, vector<16x32xf32>, vector<16x32xf32>, vector<16x32xf32> -> vector<64x32xf32>
    %cst_25 = arith.constant dense<0.000000e+00> : vector<64x16xf32>
    %76 = tpu.matmul %75, %60, %cst_25 {dimension_numbers = #tpu.dot_dimension_numbers<[1], [1], [0], [0], [0, 0, 1, 0], [], []>} : vector<64x32xf32>, vector<16x32xf32>, vector<64x16xf32> -> vector<64x16xf32>
    %77 = tpu.concatenate %48, %48, %48, %48 in 0 : vector<16x16xf32>, vector<16x16xf32>, vector<16x16xf32>, vector<16x16xf32> -> vector<64x16xf32>
    %78 = arith.addf %76, %77 : vector<64x16xf32>
    %cst_26 = arith.constant dense<0xFF800000> : vector<64xf32>
    %79 = vector.multi_reduction <maximumf>, %78, %cst_26 [1] : vector<64x16xf32> to vector<64xf32>
    %80 = vector.shape_cast %79 : vector<64xf32> to vector<64x1xf32>
    %81 = vector.broadcast %80 : vector<64x1xf32> to vector<64x16xf32>
    %82 = arith.subf %78, %81 : vector<64x16xf32>
    %83 = math.exp %82 : vector<64x16xf32>
    %cst_27 = arith.constant dense<0.000000e+00> : vector<64xf32>
    %84 = vector.multi_reduction <add>, %83, %cst_27 [1] : vector<64x16xf32> to vector<64xf32>
    %85 = vector.shape_cast %84 : vector<64xf32> to vector<64x1xf32>
    %86 = tpu.reciprocal %85 {approx = true} : vector<64x1xf32> -> vector<64x1xf32>
    %87 = vector.broadcast %86 : vector<64x1xf32> to vector<64x16xf32>
    %88 = arith.mulf %83, %87 : vector<64x16xf32>
    %cst_28 = arith.constant dense<0.000000e+00> : vector<64x32xf32>
    %89 = tpu.matmul %88, %66, %cst_28 {dimension_numbers = #tpu.dot_dimension_numbers<[1], [0], [0], [1], [0, 0, 1, 1], [], []>} : vector<64x16xf32>, vector<16x32xf32>, vector<64x32xf32> -> vector<64x32xf32>
    %cst_29 = arith.constant 0.000000e+00 : f32
    %90 = vector.broadcast %cst_29 : f32 to vector<16x32xf32>
    %91 = vector.extract_strided_slice %89 {offsets = [0, 0], sizes = [16, 32], strides = [1, 1]} : vector<64x32xf32> to vector<16x32xf32>
    %92 = vector.broadcast %7 : vector<1x32xf32> to vector<16x32xf32>
    %93 = arith.mulf %91, %92 : vector<16x32xf32>
    %94 = arith.addf %90, %93 : vector<16x32xf32>
    %95 = vector.extract_strided_slice %89 {offsets = [16, 0], sizes = [16, 32], strides = [1, 1]} : vector<64x32xf32> to vector<16x32xf32>
    %96 = vector.broadcast %14 : vector<1x32xf32> to vector<16x32xf32>
    %97 = arith.mulf %95, %96 : vector<16x32xf32>
    %98 = arith.addf %94, %97 : vector<16x32xf32>
    %99 = vector.extract_strided_slice %89 {offsets = [32, 0], sizes = [16, 32], strides = [1, 1]} : vector<64x32xf32> to vector<16x32xf32>
    %100 = vector.broadcast %21 : vector<1x32xf32> to vector<16x32xf32>
    %101 = arith.mulf %99, %100 : vector<16x32xf32>
    %102 = arith.addf %98, %101 : vector<16x32xf32>
    %103 = vector.extract_strided_slice %89 {offsets = [48, 0], sizes = [16, 32], strides = [1, 1]} : vector<64x32xf32> to vector<16x32xf32>
    %104 = vector.broadcast %28 : vector<1x32xf32> to vector<16x32xf32>
    %105 = arith.mulf %103, %104 : vector<16x32xf32>
    %106 = arith.addf %102, %105 : vector<16x32xf32>
    %c96 = arith.constant 96 : index
    %c0_30 = arith.constant 0 : index
    %107 = vector.load %arg9[%c96, %c0_30] : memref<1184x128xbf16, #tpu.memory_space<vmem>>, vector<32x32xbf16>
    %108 = arith.truncf %106 : vector<16x32xf32> to vector<16x32xbf16>
    %cst_31 = arith.constant dense<0.000000e+00> : vector<16x32xf32>
    %109 = tpu.matmul %108, %107, %cst_31 {dimension_numbers = #tpu.dot_dimension_numbers<[1], [0], [0], [1], [0, 0, 1, 1], [], []>} : vector<16x32xbf16>, vector<32x32xbf16>, vector<16x32xf32> -> vector<16x32xf32>
    %c3 = arith.constant 3 : index
    %c0_32 = arith.constant 0 : index
    %110 = vector.load %arg10[%c3, %c0_32] : memref<56x128xf32, #tpu.memory_space<vmem>>, vector<1x32xf32>
    %111 = vector.broadcast %110 : vector<1x32xf32> to vector<16x32xf32>
    %112 = arith.addf %109, %111 : vector<16x32xf32>
    %113 = arith.addf %46, %112 : vector<16x32xf32>
    %c6 = arith.constant 6 : index
    %c0_33 = arith.constant 0 : index
    %114 = vector.load %arg10[%c6, %c0_33] : memref<56x128xf32, #tpu.memory_space<vmem>>, vector<1x32xf32>
    %c7 = arith.constant 7 : index
    %c0_34 = arith.constant 0 : index
    %115 = vector.load %arg10[%c7, %c0_34] : memref<56x128xf32, #tpu.memory_space<vmem>>, vector<1x32xf32>
    %cst_35 = arith.constant dense<0.000000e+00> : vector<16xf32>
    %116 = vector.multi_reduction <add>, %113, %cst_35 [1] : vector<16x32xf32> to vector<16xf32>
    %117 = vector.shape_cast %116 : vector<16xf32> to vector<16x1xf32>
    %cst_36 = arith.constant 3.200000e+01 : f32
    %118 = vector.broadcast %cst_36 : f32 to vector<16x1xf32>
    %119 = arith.divf %117, %118 : vector<16x1xf32>
    %120 = vector.broadcast %119 : vector<16x1xf32> to vector<16x32xf32>
    %121 = arith.subf %113, %120 : vector<16x32xf32>
    %122 = arith.mulf %121, %121 : vector<16x32xf32>
    %cst_37 = arith.constant dense<0.000000e+00> : vector<16xf32>
    %123 = vector.multi_reduction <add>, %122, %cst_37 [1] : vector<16x32xf32> to vector<16xf32>
    %124 = vector.shape_cast %123 : vector<16xf32> to vector<16x1xf32>
    %cst_38 = arith.constant 3.200000e+01 : f32
    %125 = vector.broadcast %cst_38 : f32 to vector<16x1xf32>
    %126 = arith.divf %124, %125 : vector<16x1xf32>
    %cst_39 = arith.constant 9.99999974E-6 : f32
    %127 = vector.broadcast %cst_39 : f32 to vector<16x1xf32>
    %128 = arith.addf %126, %127 : vector<16x1xf32>
    %129 = math.rsqrt %128 : vector<16x1xf32>
    %130 = vector.broadcast %129 : vector<16x1xf32> to vector<16x32xf32>
    %131 = arith.mulf %121, %130 : vector<16x32xf32>
    %132 = vector.broadcast %114 : vector<1x32xf32> to vector<16x32xf32>
    %133 = arith.mulf %131, %132 : vector<16x32xf32>
    %134 = vector.broadcast %115 : vector<1x32xf32> to vector<16x32xf32>
    %135 = arith.addf %133, %134 : vector<16x32xf32>
    %c128 = arith.constant 128 : index
    %c0_40 = arith.constant 0 : index
    %136 = vector.load %arg9[%c128, %c0_40] : memref<1184x128xbf16, #tpu.memory_space<vmem>>, vector<32x64xbf16>
    %137 = arith.truncf %135 : vector<16x32xf32> to vector<16x32xbf16>
    %cst_41 = arith.constant dense<0.000000e+00> : vector<16x64xf32>
    %138 = tpu.matmul %137, %136, %cst_41 {dimension_numbers = #tpu.dot_dimension_numbers<[1], [0], [0], [1], [0, 0, 1, 1], [], []>} : vector<16x32xbf16>, vector<32x64xbf16>, vector<16x64xf32> -> vector<16x64xf32>
    %c4 = arith.constant 4 : index
    %c0_42 = arith.constant 0 : index
    %139 = vector.load %arg10[%c4, %c0_42] : memref<56x128xf32, #tpu.memory_space<vmem>>, vector<1x64xf32>
    %140 = vector.broadcast %139 : vector<1x64xf32> to vector<16x64xf32>
    %141 = arith.addf %138, %140 : vector<16x64xf32>
    %cst_43 = arith.constant 0.000000e+00 : f32
    %142 = vector.broadcast %cst_43 : f32 to vector<16x64xf32>
    %143 = arith.maximumf %141, %142 : vector<16x64xf32>
    %c160 = arith.constant 160 : index
    %c0_44 = arith.constant 0 : index
    %144 = vector.load %arg9[%c160, %c0_44] : memref<1184x128xbf16, #tpu.memory_space<vmem>>, vector<64x32xbf16>
    %145 = arith.truncf %143 : vector<16x64xf32> to vector<16x64xbf16>
    %cst_45 = arith.constant dense<0.000000e+00> : vector<16x32xf32>
    %146 = tpu.matmul %145, %144, %cst_45 {dimension_numbers = #tpu.dot_dimension_numbers<[1], [0], [0], [1], [0, 0, 1, 1], [], []>} : vector<16x64xbf16>, vector<64x32xbf16>, vector<16x32xf32> -> vector<16x32xf32>
    %c5 = arith.constant 5 : index
    %c0_46 = arith.constant 0 : index
    %147 = vector.load %arg10[%c5, %c0_46] : memref<56x128xf32, #tpu.memory_space<vmem>>, vector<1x32xf32>
    %148 = vector.broadcast %147 : vector<1x32xf32> to vector<16x32xf32>
    %149 = arith.addf %146, %148 : vector<16x32xf32>
    %150 = arith.addf %135, %149 : vector<16x32xf32>
    %c8 = arith.constant 8 : index
    %c0_47 = arith.constant 0 : index
    %151 = vector.load %arg10[%c8, %c0_47] : memref<56x128xf32, #tpu.memory_space<vmem>>, vector<1x32xf32>
    %c9 = arith.constant 9 : index
    %c0_48 = arith.constant 0 : index
    %152 = vector.load %arg10[%c9, %c0_48] : memref<56x128xf32, #tpu.memory_space<vmem>>, vector<1x32xf32>
    %cst_49 = arith.constant dense<0.000000e+00> : vector<16xf32>
    %153 = vector.multi_reduction <add>, %150, %cst_49 [1] : vector<16x32xf32> to vector<16xf32>
    %154 = vector.shape_cast %153 : vector<16xf32> to vector<16x1xf32>
    %cst_50 = arith.constant 3.200000e+01 : f32
    %155 = vector.broadcast %cst_50 : f32 to vector<16x1xf32>
    %156 = arith.divf %154, %155 : vector<16x1xf32>
    %157 = vector.broadcast %156 : vector<16x1xf32> to vector<16x32xf32>
    %158 = arith.subf %150, %157 : vector<16x32xf32>
    %159 = arith.mulf %158, %158 : vector<16x32xf32>
    %cst_51 = arith.constant dense<0.000000e+00> : vector<16xf32>
    %160 = vector.multi_reduction <add>, %159, %cst_51 [1] : vector<16x32xf32> to vector<16xf32>
    %161 = vector.shape_cast %160 : vector<16xf32> to vector<16x1xf32>
    %cst_52 = arith.constant 3.200000e+01 : f32
    %162 = vector.broadcast %cst_52 : f32 to vector<16x1xf32>
    %163 = arith.divf %161, %162 : vector<16x1xf32>
    %cst_53 = arith.constant 9.99999974E-6 : f32
    %164 = vector.broadcast %cst_53 : f32 to vector<16x1xf32>
    %165 = arith.addf %163, %164 : vector<16x1xf32>
    %166 = math.rsqrt %165 : vector<16x1xf32>
    %167 = vector.broadcast %166 : vector<16x1xf32> to vector<16x32xf32>
    %168 = arith.mulf %158, %167 : vector<16x32xf32>
    %169 = vector.broadcast %151 : vector<1x32xf32> to vector<16x32xf32>
    %170 = arith.mulf %168, %169 : vector<16x32xf32>
    %171 = vector.broadcast %152 : vector<1x32xf32> to vector<16x32xf32>
    %172 = arith.addf %170, %171 : vector<16x32xf32>
    %c224 = arith.constant 224 : index
    %c0_54 = arith.constant 0 : index
    %173 = vector.load %arg9[%c224, %c0_54] : memref<1184x128xbf16, #tpu.memory_space<vmem>>, vector<32x32xbf16>
    %174 = arith.truncf %172 : vector<16x32xf32> to vector<16x32xbf16>
    %cst_55 = arith.constant dense<0.000000e+00> : vector<16x32xf32>
    %175 = tpu.matmul %174, %173, %cst_55 {dimension_numbers = #tpu.dot_dimension_numbers<[1], [0], [0], [1], [0, 0, 1, 1], [], []>} : vector<16x32xbf16>, vector<32x32xbf16>, vector<16x32xf32> -> vector<16x32xf32>
    %c10 = arith.constant 10 : index
    %c0_56 = arith.constant 0 : index
    %176 = vector.load %arg10[%c10, %c0_56] : memref<56x128xf32, #tpu.memory_space<vmem>>, vector<1x32xf32>
    %177 = vector.broadcast %176 : vector<1x32xf32> to vector<16x32xf32>
    %178 = arith.addf %175, %177 : vector<16x32xf32>
    %c256 = arith.constant 256 : index
    %c0_57 = arith.constant 0 : index
    %179 = vector.load %arg9[%c256, %c0_57] : memref<1184x128xbf16, #tpu.memory_space<vmem>>, vector<32x32xbf16>
    %180 = arith.truncf %172 : vector<16x32xf32> to vector<16x32xbf16>
    %cst_58 = arith.constant dense<0.000000e+00> : vector<16x32xf32>
    %181 = tpu.matmul %180, %179, %cst_58 {dimension_numbers = #tpu.dot_dimension_numbers<[1], [0], [0], [1], [0, 0, 1, 1], [], []>} : vector<16x32xbf16>, vector<32x32xbf16>, vector<16x32xf32> -> vector<16x32xf32>
    %c11 = arith.constant 11 : index
    %c0_59 = arith.constant 0 : index
    %182 = vector.load %arg10[%c11, %c0_59] : memref<56x128xf32, #tpu.memory_space<vmem>>, vector<1x32xf32>
    %183 = vector.broadcast %182 : vector<1x32xf32> to vector<16x32xf32>
    %184 = arith.addf %181, %183 : vector<16x32xf32>
    %c288 = arith.constant 288 : index
    %c0_60 = arith.constant 0 : index
    %185 = vector.load %arg9[%c288, %c0_60] : memref<1184x128xbf16, #tpu.memory_space<vmem>>, vector<32x32xbf16>
    %186 = arith.truncf %172 : vector<16x32xf32> to vector<16x32xbf16>
    %cst_61 = arith.constant dense<0.000000e+00> : vector<16x32xf32>
    %187 = tpu.matmul %186, %185, %cst_61 {dimension_numbers = #tpu.dot_dimension_numbers<[1], [0], [0], [1], [0, 0, 1, 1], [], []>} : vector<16x32xbf16>, vector<32x32xbf16>, vector<16x32xf32> -> vector<16x32xf32>
    %c12 = arith.constant 12 : index
    %c0_62 = arith.constant 0 : index
    %188 = vector.load %arg10[%c12, %c0_62] : memref<56x128xf32, #tpu.memory_space<vmem>>, vector<1x32xf32>
    %189 = vector.broadcast %188 : vector<1x32xf32> to vector<16x32xf32>
    %190 = arith.addf %187, %189 : vector<16x32xf32>
    %191 = vector.broadcast %30 : vector<1x32xf32> to vector<16x32xf32>
    %192 = arith.mulf %178, %191 : vector<16x32xf32>
    %193 = vector.broadcast %32 : vector<1x32xf32> to vector<16x32xf32>
    %194 = arith.mulf %178, %193 : vector<16x32xf32>
    %195 = vector.broadcast %34 : vector<1x32xf32> to vector<16x32xf32>
    %196 = arith.mulf %178, %195 : vector<16x32xf32>
    %197 = vector.broadcast %36 : vector<1x32xf32> to vector<16x32xf32>
    %198 = arith.mulf %178, %197 : vector<16x32xf32>
    %199 = tpu.concatenate %192, %194, %196, %198 in 0 : vector<16x32xf32>, vector<16x32xf32>, vector<16x32xf32>, vector<16x32xf32> -> vector<64x32xf32>
    %cst_63 = arith.constant dense<0.000000e+00> : vector<64x16xf32>
    %200 = tpu.matmul %199, %184, %cst_63 {dimension_numbers = #tpu.dot_dimension_numbers<[1], [1], [0], [0], [0, 0, 1, 0], [], []>} : vector<64x32xf32>, vector<16x32xf32>, vector<64x16xf32> -> vector<64x16xf32>
    %201 = tpu.concatenate %48, %48, %48, %48 in 0 : vector<16x16xf32>, vector<16x16xf32>, vector<16x16xf32>, vector<16x16xf32> -> vector<64x16xf32>
    %202 = arith.addf %200, %201 : vector<64x16xf32>
    %cst_64 = arith.constant dense<0xFF800000> : vector<64xf32>
    %203 = vector.multi_reduction <maximumf>, %202, %cst_64 [1] : vector<64x16xf32> to vector<64xf32>
    %204 = vector.shape_cast %203 : vector<64xf32> to vector<64x1xf32>
    %205 = vector.broadcast %204 : vector<64x1xf32> to vector<64x16xf32>
    %206 = arith.subf %202, %205 : vector<64x16xf32>
    %207 = math.exp %206 : vector<64x16xf32>
    %cst_65 = arith.constant dense<0.000000e+00> : vector<64xf32>
    %208 = vector.multi_reduction <add>, %207, %cst_65 [1] : vector<64x16xf32> to vector<64xf32>
    %209 = vector.shape_cast %208 : vector<64xf32> to vector<64x1xf32>
    %210 = tpu.reciprocal %209 {approx = true} : vector<64x1xf32> -> vector<64x1xf32>
    %211 = vector.broadcast %210 : vector<64x1xf32> to vector<64x16xf32>
    %212 = arith.mulf %207, %211 : vector<64x16xf32>
    %cst_66 = arith.constant dense<0.000000e+00> : vector<64x32xf32>
    %213 = tpu.matmul %212, %190, %cst_66 {dimension_numbers = #tpu.dot_dimension_numbers<[1], [0], [0], [1], [0, 0, 1, 1], [], []>} : vector<64x16xf32>, vector<16x32xf32>, vector<64x32xf32> -> vector<64x32xf32>
    %cst_67 = arith.constant 0.000000e+00 : f32
    %214 = vector.broadcast %cst_67 : f32 to vector<16x32xf32>
    %215 = vector.extract_strided_slice %213 {offsets = [0, 0], sizes = [16, 32], strides = [1, 1]} : vector<64x32xf32> to vector<16x32xf32>
    %216 = vector.broadcast %7 : vector<1x32xf32> to vector<16x32xf32>
    %217 = arith.mulf %215, %216 : vector<16x32xf32>
    %218 = arith.addf %214, %217 : vector<16x32xf32>
    %219 = vector.extract_strided_slice %213 {offsets = [16, 0], sizes = [16, 32], strides = [1, 1]} : vector<64x32xf32> to vector<16x32xf32>
    %220 = vector.broadcast %14 : vector<1x32xf32> to vector<16x32xf32>
    %221 = arith.mulf %219, %220 : vector<16x32xf32>
    %222 = arith.addf %218, %221 : vector<16x32xf32>
    %223 = vector.extract_strided_slice %213 {offsets = [32, 0], sizes = [16, 32], strides = [1, 1]} : vector<64x32xf32> to vector<16x32xf32>
    %224 = vector.broadcast %21 : vector<1x32xf32> to vector<16x32xf32>
    %225 = arith.mulf %223, %224 : vector<16x32xf32>
    %226 = arith.addf %222, %225 : vector<16x32xf32>
    %227 = vector.extract_strided_slice %213 {offsets = [48, 0], sizes = [16, 32], strides = [1, 1]} : vector<64x32xf32> to vector<16x32xf32>
    %228 = vector.broadcast %28 : vector<1x32xf32> to vector<16x32xf32>
    %229 = arith.mulf %227, %228 : vector<16x32xf32>
    %230 = arith.addf %226, %229 : vector<16x32xf32>
    %c320 = arith.constant 320 : index
    %c0_68 = arith.constant 0 : index
    %231 = vector.load %arg9[%c320, %c0_68] : memref<1184x128xbf16, #tpu.memory_space<vmem>>, vector<32x32xbf16>
    %232 = arith.truncf %230 : vector<16x32xf32> to vector<16x32xbf16>
    %cst_69 = arith.constant dense<0.000000e+00> : vector<16x32xf32>
    %233 = tpu.matmul %232, %231, %cst_69 {dimension_numbers = #tpu.dot_dimension_numbers<[1], [0], [0], [1], [0, 0, 1, 1], [], []>} : vector<16x32xbf16>, vector<32x32xbf16>, vector<16x32xf32> -> vector<16x32xf32>
    %c13 = arith.constant 13 : index
    %c0_70 = arith.constant 0 : index
    %234 = vector.load %arg10[%c13, %c0_70] : memref<56x128xf32, #tpu.memory_space<vmem>>, vector<1x32xf32>
    %235 = vector.broadcast %234 : vector<1x32xf32> to vector<16x32xf32>
    %236 = arith.addf %233, %235 : vector<16x32xf32>
    %237 = arith.addf %172, %236 : vector<16x32xf32>
    %c16 = arith.constant 16 : index
    %c0_71 = arith.constant 0 : index
    %238 = vector.load %arg10[%c16, %c0_71] : memref<56x128xf32, #tpu.memory_space<vmem>>, vector<1x32xf32>
    %c17 = arith.constant 17 : index
    %c0_72 = arith.constant 0 : index
    %239 = vector.load %arg10[%c17, %c0_72] : memref<56x128xf32, #tpu.memory_space<vmem>>, vector<1x32xf32>
    %cst_73 = arith.constant dense<0.000000e+00> : vector<16xf32>
    %240 = vector.multi_reduction <add>, %237, %cst_73 [1] : vector<16x32xf32> to vector<16xf32>
    %241 = vector.shape_cast %240 : vector<16xf32> to vector<16x1xf32>
    %cst_74 = arith.constant 3.200000e+01 : f32
    %242 = vector.broadcast %cst_74 : f32 to vector<16x1xf32>
    %243 = arith.divf %241, %242 : vector<16x1xf32>
    %244 = vector.broadcast %243 : vector<16x1xf32> to vector<16x32xf32>
    %245 = arith.subf %237, %244 : vector<16x32xf32>
    %246 = arith.mulf %245, %245 : vector<16x32xf32>
    %cst_75 = arith.constant dense<0.000000e+00> : vector<16xf32>
    %247 = vector.multi_reduction <add>, %246, %cst_75 [1] : vector<16x32xf32> to vector<16xf32>
    %248 = vector.shape_cast %247 : vector<16xf32> to vector<16x1xf32>
    %cst_76 = arith.constant 3.200000e+01 : f32
    %249 = vector.broadcast %cst_76 : f32 to vector<16x1xf32>
    %250 = arith.divf %248, %249 : vector<16x1xf32>
    %cst_77 = arith.constant 9.99999974E-6 : f32
    %251 = vector.broadcast %cst_77 : f32 to vector<16x1xf32>
    %252 = arith.addf %250, %251 : vector<16x1xf32>
    %253 = math.rsqrt %252 : vector<16x1xf32>
    %254 = vector.broadcast %253 : vector<16x1xf32> to vector<16x32xf32>
    %255 = arith.mulf %245, %254 : vector<16x32xf32>
    %256 = vector.broadcast %238 : vector<1x32xf32> to vector<16x32xf32>
    %257 = arith.mulf %255, %256 : vector<16x32xf32>
    %258 = vector.broadcast %239 : vector<1x32xf32> to vector<16x32xf32>
    %259 = arith.addf %257, %258 : vector<16x32xf32>
    %c352 = arith.constant 352 : index
    %c0_78 = arith.constant 0 : index
    %260 = vector.load %arg9[%c352, %c0_78] : memref<1184x128xbf16, #tpu.memory_space<vmem>>, vector<32x64xbf16>
    %261 = arith.truncf %259 : vector<16x32xf32> to vector<16x32xbf16>
    %cst_79 = arith.constant dense<0.000000e+00> : vector<16x64xf32>
    %262 = tpu.matmul %261, %260, %cst_79 {dimension_numbers = #tpu.dot_dimension_numbers<[1], [0], [0], [1], [0, 0, 1, 1], [], []>} : vector<16x32xbf16>, vector<32x64xbf16>, vector<16x64xf32> -> vector<16x64xf32>
    %c14 = arith.constant 14 : index
    %c0_80 = arith.constant 0 : index
    %263 = vector.load %arg10[%c14, %c0_80] : memref<56x128xf32, #tpu.memory_space<vmem>>, vector<1x64xf32>
    %264 = vector.broadcast %263 : vector<1x64xf32> to vector<16x64xf32>
    %265 = arith.addf %262, %264 : vector<16x64xf32>
    %cst_81 = arith.constant 0.000000e+00 : f32
    %266 = vector.broadcast %cst_81 : f32 to vector<16x64xf32>
    %267 = arith.maximumf %265, %266 : vector<16x64xf32>
    %c384 = arith.constant 384 : index
    %c0_82 = arith.constant 0 : index
    %268 = vector.load %arg9[%c384, %c0_82] : memref<1184x128xbf16, #tpu.memory_space<vmem>>, vector<64x32xbf16>
    %269 = arith.truncf %267 : vector<16x64xf32> to vector<16x64xbf16>
    %cst_83 = arith.constant dense<0.000000e+00> : vector<16x32xf32>
    %270 = tpu.matmul %269, %268, %cst_83 {dimension_numbers = #tpu.dot_dimension_numbers<[1], [0], [0], [1], [0, 0, 1, 1], [], []>} : vector<16x64xbf16>, vector<64x32xbf16>, vector<16x32xf32> -> vector<16x32xf32>
    %c15 = arith.constant 15 : index
    %c0_84 = arith.constant 0 : index
    %271 = vector.load %arg10[%c15, %c0_84] : memref<56x128xf32, #tpu.memory_space<vmem>>, vector<1x32xf32>
    %272 = vector.broadcast %271 : vector<1x32xf32> to vector<16x32xf32>
    %273 = arith.addf %270, %272 : vector<16x32xf32>
    %274 = arith.addf %259, %273 : vector<16x32xf32>
    %c18 = arith.constant 18 : index
    %c0_85 = arith.constant 0 : index
    %275 = vector.load %arg10[%c18, %c0_85] : memref<56x128xf32, #tpu.memory_space<vmem>>, vector<1x32xf32>
    %c19 = arith.constant 19 : index
    %c0_86 = arith.constant 0 : index
    %276 = vector.load %arg10[%c19, %c0_86] : memref<56x128xf32, #tpu.memory_space<vmem>>, vector<1x32xf32>
    %cst_87 = arith.constant dense<0.000000e+00> : vector<16xf32>
    %277 = vector.multi_reduction <add>, %274, %cst_87 [1] : vector<16x32xf32> to vector<16xf32>
    %278 = vector.shape_cast %277 : vector<16xf32> to vector<16x1xf32>
    %cst_88 = arith.constant 3.200000e+01 : f32
    %279 = vector.broadcast %cst_88 : f32 to vector<16x1xf32>
    %280 = arith.divf %278, %279 : vector<16x1xf32>
    %281 = vector.broadcast %280 : vector<16x1xf32> to vector<16x32xf32>
    %282 = arith.subf %274, %281 : vector<16x32xf32>
    %283 = arith.mulf %282, %282 : vector<16x32xf32>
    %cst_89 = arith.constant dense<0.000000e+00> : vector<16xf32>
    %284 = vector.multi_reduction <add>, %283, %cst_89 [1] : vector<16x32xf32> to vector<16xf32>
    %285 = vector.shape_cast %284 : vector<16xf32> to vector<16x1xf32>
    %cst_90 = arith.constant 3.200000e+01 : f32
    %286 = vector.broadcast %cst_90 : f32 to vector<16x1xf32>
    %287 = arith.divf %285, %286 : vector<16x1xf32>
    %cst_91 = arith.constant 9.99999974E-6 : f32
    %288 = vector.broadcast %cst_91 : f32 to vector<16x1xf32>
    %289 = arith.addf %287, %288 : vector<16x1xf32>
    %290 = math.rsqrt %289 : vector<16x1xf32>
    %291 = vector.broadcast %290 : vector<16x1xf32> to vector<16x32xf32>
    %292 = arith.mulf %282, %291 : vector<16x32xf32>
    %293 = vector.broadcast %275 : vector<1x32xf32> to vector<16x32xf32>
    %294 = arith.mulf %292, %293 : vector<16x32xf32>
    %295 = vector.broadcast %276 : vector<1x32xf32> to vector<16x32xf32>
    %296 = arith.addf %294, %295 : vector<16x32xf32>
    %c0_92 = arith.constant 0 : index
    %c0_93 = arith.constant 0 : index
    %297 = vector.load %arg1[%c0_92, %c0_93] : memref<16x1xi32, #tpu.memory_space<vmem>>, vector<16x1xi32>
    %298 = tpu.iota {dimensions = array<i32: 1>} : vector<16x48xi32>
    %299 = vector.broadcast %297 : vector<16x1xi32> to vector<16x48xi32>
    %300 = arith.cmpi eq, %298, %299 : vector<16x48xi32>
    %301 = arith.extui %300 : vector<16x48xi1> to vector<16x48xi32>
    %302 = arith.sitofp %301 : vector<16x48xi32> to vector<16x48xf32>
    %c0_94 = arith.constant 0 : index
    %c0_95 = arith.constant 0 : index
    %303 = vector.load %arg8[%c0_94, %c0_95] : memref<48x32xf32, #tpu.memory_space<vmem>>, vector<48x32xf32>
    %cst_96 = arith.constant dense<0.000000e+00> : vector<16x32xf32>
    %304 = tpu.matmul %302, %303, %cst_96 {dimension_numbers = #tpu.dot_dimension_numbers<[1], [0], [0], [1], [0, 0, 1, 1], [], []>} : vector<16x48xf32>, vector<48x32xf32>, vector<16x32xf32> -> vector<16x32xf32>
    %c0_97 = arith.constant 0 : index
    %c0_98 = arith.constant 0 : index
    %305 = vector.load %arg3[%c0_97, %c0_98] : memref<16x32xf32, #tpu.memory_space<vmem>>, vector<16x32xf32>
    %306 = arith.addf %304, %305 : vector<16x32xf32>
    %c0_99 = arith.constant 0 : index
    %c0_100 = arith.constant 0 : index
    %307 = vector.load %arg5[%c0_99, %c0_100] : memref<16x16xf32, #tpu.memory_space<vmem>>, vector<16x16xf32>
    %c0_101 = arith.constant 0 : index
    %c0_102 = arith.constant 0 : index
    %308 = vector.load %arg6[%c0_101, %c0_102] : memref<16x16xf32, #tpu.memory_space<vmem>>, vector<16x16xf32>
    %309 = vector.shape_cast %308 : vector<16x16xf32> to vector<16x16xf32>
    %c448 = arith.constant 448 : index
    %c0_103 = arith.constant 0 : index
    %310 = vector.load %arg9[%c448, %c0_103] : memref<1184x128xbf16, #tpu.memory_space<vmem>>, vector<32x32xbf16>
    %311 = arith.truncf %306 : vector<16x32xf32> to vector<16x32xbf16>
    %cst_104 = arith.constant dense<0.000000e+00> : vector<16x32xf32>
    %312 = tpu.matmul %311, %310, %cst_104 {dimension_numbers = #tpu.dot_dimension_numbers<[1], [0], [0], [1], [0, 0, 1, 1], [], []>} : vector<16x32xbf16>, vector<32x32xbf16>, vector<16x32xf32> -> vector<16x32xf32>
    %c20 = arith.constant 20 : index
    %c0_105 = arith.constant 0 : index
    %313 = vector.load %arg10[%c20, %c0_105] : memref<56x128xf32, #tpu.memory_space<vmem>>, vector<1x32xf32>
    %314 = vector.broadcast %313 : vector<1x32xf32> to vector<16x32xf32>
    %315 = arith.addf %312, %314 : vector<16x32xf32>
    %c480 = arith.constant 480 : index
    %c0_106 = arith.constant 0 : index
    %316 = vector.load %arg9[%c480, %c0_106] : memref<1184x128xbf16, #tpu.memory_space<vmem>>, vector<32x32xbf16>
    %317 = arith.truncf %306 : vector<16x32xf32> to vector<16x32xbf16>
    %cst_107 = arith.constant dense<0.000000e+00> : vector<16x32xf32>
    %318 = tpu.matmul %317, %316, %cst_107 {dimension_numbers = #tpu.dot_dimension_numbers<[1], [0], [0], [1], [0, 0, 1, 1], [], []>} : vector<16x32xbf16>, vector<32x32xbf16>, vector<16x32xf32> -> vector<16x32xf32>
    %c21 = arith.constant 21 : index
    %c0_108 = arith.constant 0 : index
    %319 = vector.load %arg10[%c21, %c0_108] : memref<56x128xf32, #tpu.memory_space<vmem>>, vector<1x32xf32>
    %320 = vector.broadcast %319 : vector<1x32xf32> to vector<16x32xf32>
    %321 = arith.addf %318, %320 : vector<16x32xf32>
    %c512 = arith.constant 512 : index
    %c0_109 = arith.constant 0 : index
    %322 = vector.load %arg9[%c512, %c0_109] : memref<1184x128xbf16, #tpu.memory_space<vmem>>, vector<32x32xbf16>
    %323 = arith.truncf %306 : vector<16x32xf32> to vector<16x32xbf16>
    %cst_110 = arith.constant dense<0.000000e+00> : vector<16x32xf32>
    %324 = tpu.matmul %323, %322, %cst_110 {dimension_numbers = #tpu.dot_dimension_numbers<[1], [0], [0], [1], [0, 0, 1, 1], [], []>} : vector<16x32xbf16>, vector<32x32xbf16>, vector<16x32xf32> -> vector<16x32xf32>
    %c22 = arith.constant 22 : index
    %c0_111 = arith.constant 0 : index
    %325 = vector.load %arg10[%c22, %c0_111] : memref<56x128xf32, #tpu.memory_space<vmem>>, vector<1x32xf32>
    %326 = vector.broadcast %325 : vector<1x32xf32> to vector<16x32xf32>
    %327 = arith.addf %324, %326 : vector<16x32xf32>
    %328 = vector.broadcast %30 : vector<1x32xf32> to vector<16x32xf32>
    %329 = arith.mulf %315, %328 : vector<16x32xf32>
    %330 = vector.broadcast %32 : vector<1x32xf32> to vector<16x32xf32>
    %331 = arith.mulf %315, %330 : vector<16x32xf32>
    %332 = vector.broadcast %34 : vector<1x32xf32> to vector<16x32xf32>
    %333 = arith.mulf %315, %332 : vector<16x32xf32>
    %334 = vector.broadcast %36 : vector<1x32xf32> to vector<16x32xf32>
    %335 = arith.mulf %315, %334 : vector<16x32xf32>
    %336 = tpu.concatenate %329, %331, %333, %335 in 0 : vector<16x32xf32>, vector<16x32xf32>, vector<16x32xf32>, vector<16x32xf32> -> vector<64x32xf32>
    %cst_112 = arith.constant dense<0.000000e+00> : vector<64x16xf32>
    %337 = tpu.matmul %336, %321, %cst_112 {dimension_numbers = #tpu.dot_dimension_numbers<[1], [1], [0], [0], [0, 0, 1, 0], [], []>} : vector<64x32xf32>, vector<16x32xf32>, vector<64x16xf32> -> vector<64x16xf32>
    %338 = tpu.concatenate %307, %307, %307, %307 in 0 : vector<16x16xf32>, vector<16x16xf32>, vector<16x16xf32>, vector<16x16xf32> -> vector<64x16xf32>
    %339 = arith.addf %337, %338 : vector<64x16xf32>
    %cst_113 = arith.constant dense<0xFF800000> : vector<64xf32>
    %340 = vector.multi_reduction <maximumf>, %339, %cst_113 [1] : vector<64x16xf32> to vector<64xf32>
    %341 = vector.shape_cast %340 : vector<64xf32> to vector<64x1xf32>
    %342 = vector.broadcast %341 : vector<64x1xf32> to vector<64x16xf32>
    %343 = arith.subf %339, %342 : vector<64x16xf32>
    %344 = math.exp %343 : vector<64x16xf32>
    %cst_114 = arith.constant dense<0.000000e+00> : vector<64xf32>
    %345 = vector.multi_reduction <add>, %344, %cst_114 [1] : vector<64x16xf32> to vector<64xf32>
    %346 = vector.shape_cast %345 : vector<64xf32> to vector<64x1xf32>
    %347 = tpu.reciprocal %346 {approx = true} : vector<64x1xf32> -> vector<64x1xf32>
    %348 = vector.broadcast %347 : vector<64x1xf32> to vector<64x16xf32>
    %349 = arith.mulf %344, %348 : vector<64x16xf32>
    %cst_115 = arith.constant dense<0.000000e+00> : vector<64x32xf32>
    %350 = tpu.matmul %349, %327, %cst_115 {dimension_numbers = #tpu.dot_dimension_numbers<[1], [0], [0], [1], [0, 0, 1, 1], [], []>} : vector<64x16xf32>, vector<16x32xf32>, vector<64x32xf32> -> vector<64x32xf32>
    %cst_116 = arith.constant 0.000000e+00 : f32
    %351 = vector.broadcast %cst_116 : f32 to vector<16x32xf32>
    %352 = vector.extract_strided_slice %350 {offsets = [0, 0], sizes = [16, 32], strides = [1, 1]} : vector<64x32xf32> to vector<16x32xf32>
    %353 = vector.broadcast %7 : vector<1x32xf32> to vector<16x32xf32>
    %354 = arith.mulf %352, %353 : vector<16x32xf32>
    %355 = arith.addf %351, %354 : vector<16x32xf32>
    %356 = vector.extract_strided_slice %350 {offsets = [16, 0], sizes = [16, 32], strides = [1, 1]} : vector<64x32xf32> to vector<16x32xf32>
    %357 = vector.broadcast %14 : vector<1x32xf32> to vector<16x32xf32>
    %358 = arith.mulf %356, %357 : vector<16x32xf32>
    %359 = arith.addf %355, %358 : vector<16x32xf32>
    %360 = vector.extract_strided_slice %350 {offsets = [32, 0], sizes = [16, 32], strides = [1, 1]} : vector<64x32xf32> to vector<16x32xf32>
    %361 = vector.broadcast %21 : vector<1x32xf32> to vector<16x32xf32>
    %362 = arith.mulf %360, %361 : vector<16x32xf32>
    %363 = arith.addf %359, %362 : vector<16x32xf32>
    %364 = vector.extract_strided_slice %350 {offsets = [48, 0], sizes = [16, 32], strides = [1, 1]} : vector<64x32xf32> to vector<16x32xf32>
    %365 = vector.broadcast %28 : vector<1x32xf32> to vector<16x32xf32>
    %366 = arith.mulf %364, %365 : vector<16x32xf32>
    %367 = arith.addf %363, %366 : vector<16x32xf32>
    %c544 = arith.constant 544 : index
    %c0_117 = arith.constant 0 : index
    %368 = vector.load %arg9[%c544, %c0_117] : memref<1184x128xbf16, #tpu.memory_space<vmem>>, vector<32x32xbf16>
    %369 = arith.truncf %367 : vector<16x32xf32> to vector<16x32xbf16>
    %cst_118 = arith.constant dense<0.000000e+00> : vector<16x32xf32>
    %370 = tpu.matmul %369, %368, %cst_118 {dimension_numbers = #tpu.dot_dimension_numbers<[1], [0], [0], [1], [0, 0, 1, 1], [], []>} : vector<16x32xbf16>, vector<32x32xbf16>, vector<16x32xf32> -> vector<16x32xf32>
    %c23 = arith.constant 23 : index
    %c0_119 = arith.constant 0 : index
    %371 = vector.load %arg10[%c23, %c0_119] : memref<56x128xf32, #tpu.memory_space<vmem>>, vector<1x32xf32>
    %372 = vector.broadcast %371 : vector<1x32xf32> to vector<16x32xf32>
    %373 = arith.addf %370, %372 : vector<16x32xf32>
    %374 = arith.addf %306, %373 : vector<16x32xf32>
    %c30 = arith.constant 30 : index
    %c0_120 = arith.constant 0 : index
    %375 = vector.load %arg10[%c30, %c0_120] : memref<56x128xf32, #tpu.memory_space<vmem>>, vector<1x32xf32>
    %c31 = arith.constant 31 : index
    %c0_121 = arith.constant 0 : index
    %376 = vector.load %arg10[%c31, %c0_121] : memref<56x128xf32, #tpu.memory_space<vmem>>, vector<1x32xf32>
    %cst_122 = arith.constant dense<0.000000e+00> : vector<16xf32>
    %377 = vector.multi_reduction <add>, %374, %cst_122 [1] : vector<16x32xf32> to vector<16xf32>
    %378 = vector.shape_cast %377 : vector<16xf32> to vector<16x1xf32>
    %cst_123 = arith.constant 3.200000e+01 : f32
    %379 = vector.broadcast %cst_123 : f32 to vector<16x1xf32>
    %380 = arith.divf %378, %379 : vector<16x1xf32>
    %381 = vector.broadcast %380 : vector<16x1xf32> to vector<16x32xf32>
    %382 = arith.subf %374, %381 : vector<16x32xf32>
    %383 = arith.mulf %382, %382 : vector<16x32xf32>
    %cst_124 = arith.constant dense<0.000000e+00> : vector<16xf32>
    %384 = vector.multi_reduction <add>, %383, %cst_124 [1] : vector<16x32xf32> to vector<16xf32>
    %385 = vector.shape_cast %384 : vector<16xf32> to vector<16x1xf32>
    %cst_125 = arith.constant 3.200000e+01 : f32
    %386 = vector.broadcast %cst_125 : f32 to vector<16x1xf32>
    %387 = arith.divf %385, %386 : vector<16x1xf32>
    %cst_126 = arith.constant 9.99999974E-6 : f32
    %388 = vector.broadcast %cst_126 : f32 to vector<16x1xf32>
    %389 = arith.addf %387, %388 : vector<16x1xf32>
    %390 = math.rsqrt %389 : vector<16x1xf32>
    %391 = vector.broadcast %390 : vector<16x1xf32> to vector<16x32xf32>
    %392 = arith.mulf %382, %391 : vector<16x32xf32>
    %393 = vector.broadcast %375 : vector<1x32xf32> to vector<16x32xf32>
    %394 = arith.mulf %392, %393 : vector<16x32xf32>
    %395 = vector.broadcast %376 : vector<1x32xf32> to vector<16x32xf32>
    %396 = arith.addf %394, %395 : vector<16x32xf32>
    %c576 = arith.constant 576 : index
    %c0_127 = arith.constant 0 : index
    %397 = vector.load %arg9[%c576, %c0_127] : memref<1184x128xbf16, #tpu.memory_space<vmem>>, vector<32x32xbf16>
    %398 = arith.truncf %396 : vector<16x32xf32> to vector<16x32xbf16>
    %cst_128 = arith.constant dense<0.000000e+00> : vector<16x32xf32>
    %399 = tpu.matmul %398, %397, %cst_128 {dimension_numbers = #tpu.dot_dimension_numbers<[1], [0], [0], [1], [0, 0, 1, 1], [], []>} : vector<16x32xbf16>, vector<32x32xbf16>, vector<16x32xf32> -> vector<16x32xf32>
    %c24 = arith.constant 24 : index
    %c0_129 = arith.constant 0 : index
    %400 = vector.load %arg10[%c24, %c0_129] : memref<56x128xf32, #tpu.memory_space<vmem>>, vector<1x32xf32>
    %401 = vector.broadcast %400 : vector<1x32xf32> to vector<16x32xf32>
    %402 = arith.addf %399, %401 : vector<16x32xf32>
    %c608 = arith.constant 608 : index
    %c0_130 = arith.constant 0 : index
    %403 = vector.load %arg9[%c608, %c0_130] : memref<1184x128xbf16, #tpu.memory_space<vmem>>, vector<32x32xbf16>
    %404 = arith.truncf %296 : vector<16x32xf32> to vector<16x32xbf16>
    %cst_131 = arith.constant dense<0.000000e+00> : vector<16x32xf32>
    %405 = tpu.matmul %404, %403, %cst_131 {dimension_numbers = #tpu.dot_dimension_numbers<[1], [0], [0], [1], [0, 0, 1, 1], [], []>} : vector<16x32xbf16>, vector<32x32xbf16>, vector<16x32xf32> -> vector<16x32xf32>
    %c25 = arith.constant 25 : index
    %c0_132 = arith.constant 0 : index
    %406 = vector.load %arg10[%c25, %c0_132] : memref<56x128xf32, #tpu.memory_space<vmem>>, vector<1x32xf32>
    %407 = vector.broadcast %406 : vector<1x32xf32> to vector<16x32xf32>
    %408 = arith.addf %405, %407 : vector<16x32xf32>
    %c640 = arith.constant 640 : index
    %c0_133 = arith.constant 0 : index
    %409 = vector.load %arg9[%c640, %c0_133] : memref<1184x128xbf16, #tpu.memory_space<vmem>>, vector<32x32xbf16>
    %410 = arith.truncf %296 : vector<16x32xf32> to vector<16x32xbf16>
    %cst_134 = arith.constant dense<0.000000e+00> : vector<16x32xf32>
    %411 = tpu.matmul %410, %409, %cst_134 {dimension_numbers = #tpu.dot_dimension_numbers<[1], [0], [0], [1], [0, 0, 1, 1], [], []>} : vector<16x32xbf16>, vector<32x32xbf16>, vector<16x32xf32> -> vector<16x32xf32>
    %c26 = arith.constant 26 : index
    %c0_135 = arith.constant 0 : index
    %412 = vector.load %arg10[%c26, %c0_135] : memref<56x128xf32, #tpu.memory_space<vmem>>, vector<1x32xf32>
    %413 = vector.broadcast %412 : vector<1x32xf32> to vector<16x32xf32>
    %414 = arith.addf %411, %413 : vector<16x32xf32>
    %415 = vector.broadcast %30 : vector<1x32xf32> to vector<16x32xf32>
    %416 = arith.mulf %402, %415 : vector<16x32xf32>
    %417 = vector.broadcast %32 : vector<1x32xf32> to vector<16x32xf32>
    %418 = arith.mulf %402, %417 : vector<16x32xf32>
    %419 = vector.broadcast %34 : vector<1x32xf32> to vector<16x32xf32>
    %420 = arith.mulf %402, %419 : vector<16x32xf32>
    %421 = vector.broadcast %36 : vector<1x32xf32> to vector<16x32xf32>
    %422 = arith.mulf %402, %421 : vector<16x32xf32>
    %423 = tpu.concatenate %416, %418, %420, %422 in 0 : vector<16x32xf32>, vector<16x32xf32>, vector<16x32xf32>, vector<16x32xf32> -> vector<64x32xf32>
    %cst_136 = arith.constant dense<0.000000e+00> : vector<64x16xf32>
    %424 = tpu.matmul %423, %408, %cst_136 {dimension_numbers = #tpu.dot_dimension_numbers<[1], [1], [0], [0], [0, 0, 1, 0], [], []>} : vector<64x32xf32>, vector<16x32xf32>, vector<64x16xf32> -> vector<64x16xf32>
    %425 = tpu.concatenate %309, %309, %309, %309 in 0 : vector<16x16xf32>, vector<16x16xf32>, vector<16x16xf32>, vector<16x16xf32> -> vector<64x16xf32>
    %426 = arith.addf %424, %425 : vector<64x16xf32>
    %cst_137 = arith.constant dense<0xFF800000> : vector<64xf32>
    %427 = vector.multi_reduction <maximumf>, %426, %cst_137 [1] : vector<64x16xf32> to vector<64xf32>
    %428 = vector.shape_cast %427 : vector<64xf32> to vector<64x1xf32>
    %429 = vector.broadcast %428 : vector<64x1xf32> to vector<64x16xf32>
    %430 = arith.subf %426, %429 : vector<64x16xf32>
    %431 = math.exp %430 : vector<64x16xf32>
    %cst_138 = arith.constant dense<0.000000e+00> : vector<64xf32>
    %432 = vector.multi_reduction <add>, %431, %cst_138 [1] : vector<64x16xf32> to vector<64xf32>
    %433 = vector.shape_cast %432 : vector<64xf32> to vector<64x1xf32>
    %434 = tpu.reciprocal %433 {approx = true} : vector<64x1xf32> -> vector<64x1xf32>
    %435 = vector.broadcast %434 : vector<64x1xf32> to vector<64x16xf32>
    %436 = arith.mulf %431, %435 : vector<64x16xf32>
    %cst_139 = arith.constant dense<0.000000e+00> : vector<64x32xf32>
    %437 = tpu.matmul %436, %414, %cst_139 {dimension_numbers = #tpu.dot_dimension_numbers<[1], [0], [0], [1], [0, 0, 1, 1], [], []>} : vector<64x16xf32>, vector<16x32xf32>, vector<64x32xf32> -> vector<64x32xf32>
    %cst_140 = arith.constant 0.000000e+00 : f32
    %438 = vector.broadcast %cst_140 : f32 to vector<16x32xf32>
    %439 = vector.extract_strided_slice %437 {offsets = [0, 0], sizes = [16, 32], strides = [1, 1]} : vector<64x32xf32> to vector<16x32xf32>
    %440 = vector.broadcast %7 : vector<1x32xf32> to vector<16x32xf32>
    %441 = arith.mulf %439, %440 : vector<16x32xf32>
    %442 = arith.addf %438, %441 : vector<16x32xf32>
    %443 = vector.extract_strided_slice %437 {offsets = [16, 0], sizes = [16, 32], strides = [1, 1]} : vector<64x32xf32> to vector<16x32xf32>
    %444 = vector.broadcast %14 : vector<1x32xf32> to vector<16x32xf32>
    %445 = arith.mulf %443, %444 : vector<16x32xf32>
    %446 = arith.addf %442, %445 : vector<16x32xf32>
    %447 = vector.extract_strided_slice %437 {offsets = [32, 0], sizes = [16, 32], strides = [1, 1]} : vector<64x32xf32> to vector<16x32xf32>
    %448 = vector.broadcast %21 : vector<1x32xf32> to vector<16x32xf32>
    %449 = arith.mulf %447, %448 : vector<16x32xf32>
    %450 = arith.addf %446, %449 : vector<16x32xf32>
    %451 = vector.extract_strided_slice %437 {offsets = [48, 0], sizes = [16, 32], strides = [1, 1]} : vector<64x32xf32> to vector<16x32xf32>
    %452 = vector.broadcast %28 : vector<1x32xf32> to vector<16x32xf32>
    %453 = arith.mulf %451, %452 : vector<16x32xf32>
    %454 = arith.addf %450, %453 : vector<16x32xf32>
    %c672 = arith.constant 672 : index
    %c0_141 = arith.constant 0 : index
    %455 = vector.load %arg9[%c672, %c0_141] : memref<1184x128xbf16, #tpu.memory_space<vmem>>, vector<32x32xbf16>
    %456 = arith.truncf %454 : vector<16x32xf32> to vector<16x32xbf16>
    %cst_142 = arith.constant dense<0.000000e+00> : vector<16x32xf32>
    %457 = tpu.matmul %456, %455, %cst_142 {dimension_numbers = #tpu.dot_dimension_numbers<[1], [0], [0], [1], [0, 0, 1, 1], [], []>} : vector<16x32xbf16>, vector<32x32xbf16>, vector<16x32xf32> -> vector<16x32xf32>
    %c27 = arith.constant 27 : index
    %c0_143 = arith.constant 0 : index
    %458 = vector.load %arg10[%c27, %c0_143] : memref<56x128xf32, #tpu.memory_space<vmem>>, vector<1x32xf32>
    %459 = vector.broadcast %458 : vector<1x32xf32> to vector<16x32xf32>
    %460 = arith.addf %457, %459 : vector<16x32xf32>
    %461 = arith.addf %396, %460 : vector<16x32xf32>
    %c32_144 = arith.constant 32 : index
    %c0_145 = arith.constant 0 : index
    %462 = vector.load %arg10[%c32_144, %c0_145] : memref<56x128xf32, #tpu.memory_space<vmem>>, vector<1x32xf32>
    %c33 = arith.constant 33 : index
    %c0_146 = arith.constant 0 : index
    %463 = vector.load %arg10[%c33, %c0_146] : memref<56x128xf32, #tpu.memory_space<vmem>>, vector<1x32xf32>
    %cst_147 = arith.constant dense<0.000000e+00> : vector<16xf32>
    %464 = vector.multi_reduction <add>, %461, %cst_147 [1] : vector<16x32xf32> to vector<16xf32>
    %465 = vector.shape_cast %464 : vector<16xf32> to vector<16x1xf32>
    %cst_148 = arith.constant 3.200000e+01 : f32
    %466 = vector.broadcast %cst_148 : f32 to vector<16x1xf32>
    %467 = arith.divf %465, %466 : vector<16x1xf32>
    %468 = vector.broadcast %467 : vector<16x1xf32> to vector<16x32xf32>
    %469 = arith.subf %461, %468 : vector<16x32xf32>
    %470 = arith.mulf %469, %469 : vector<16x32xf32>
    %cst_149 = arith.constant dense<0.000000e+00> : vector<16xf32>
    %471 = vector.multi_reduction <add>, %470, %cst_149 [1] : vector<16x32xf32> to vector<16xf32>
    %472 = vector.shape_cast %471 : vector<16xf32> to vector<16x1xf32>
    %cst_150 = arith.constant 3.200000e+01 : f32
    %473 = vector.broadcast %cst_150 : f32 to vector<16x1xf32>
    %474 = arith.divf %472, %473 : vector<16x1xf32>
    %cst_151 = arith.constant 9.99999974E-6 : f32
    %475 = vector.broadcast %cst_151 : f32 to vector<16x1xf32>
    %476 = arith.addf %474, %475 : vector<16x1xf32>
    %477 = math.rsqrt %476 : vector<16x1xf32>
    %478 = vector.broadcast %477 : vector<16x1xf32> to vector<16x32xf32>
    %479 = arith.mulf %469, %478 : vector<16x32xf32>
    %480 = vector.broadcast %462 : vector<1x32xf32> to vector<16x32xf32>
    %481 = arith.mulf %479, %480 : vector<16x32xf32>
    %482 = vector.broadcast %463 : vector<1x32xf32> to vector<16x32xf32>
    %483 = arith.addf %481, %482 : vector<16x32xf32>
    %c704 = arith.constant 704 : index
    %c0_152 = arith.constant 0 : index
    %484 = vector.load %arg9[%c704, %c0_152] : memref<1184x128xbf16, #tpu.memory_space<vmem>>, vector<32x64xbf16>
    %485 = arith.truncf %483 : vector<16x32xf32> to vector<16x32xbf16>
    %cst_153 = arith.constant dense<0.000000e+00> : vector<16x64xf32>
    %486 = tpu.matmul %485, %484, %cst_153 {dimension_numbers = #tpu.dot_dimension_numbers<[1], [0], [0], [1], [0, 0, 1, 1], [], []>} : vector<16x32xbf16>, vector<32x64xbf16>, vector<16x64xf32> -> vector<16x64xf32>
    %c28 = arith.constant 28 : index
    %c0_154 = arith.constant 0 : index
    %487 = vector.load %arg10[%c28, %c0_154] : memref<56x128xf32, #tpu.memory_space<vmem>>, vector<1x64xf32>
    %488 = vector.broadcast %487 : vector<1x64xf32> to vector<16x64xf32>
    %489 = arith.addf %486, %488 : vector<16x64xf32>
    %cst_155 = arith.constant 0.000000e+00 : f32
    %490 = vector.broadcast %cst_155 : f32 to vector<16x64xf32>
    %491 = arith.maximumf %489, %490 : vector<16x64xf32>
    %c736 = arith.constant 736 : index
    %c0_156 = arith.constant 0 : index
    %492 = vector.load %arg9[%c736, %c0_156] : memref<1184x128xbf16, #tpu.memory_space<vmem>>, vector<64x32xbf16>
    %493 = arith.truncf %491 : vector<16x64xf32> to vector<16x64xbf16>
    %cst_157 = arith.constant dense<0.000000e+00> : vector<16x32xf32>
    %494 = tpu.matmul %493, %492, %cst_157 {dimension_numbers = #tpu.dot_dimension_numbers<[1], [0], [0], [1], [0, 0, 1, 1], [], []>} : vector<16x64xbf16>, vector<64x32xbf16>, vector<16x32xf32> -> vector<16x32xf32>
    %c29 = arith.constant 29 : index
    %c0_158 = arith.constant 0 : index
    %495 = vector.load %arg10[%c29, %c0_158] : memref<56x128xf32, #tpu.memory_space<vmem>>, vector<1x32xf32>
    %496 = vector.broadcast %495 : vector<1x32xf32> to vector<16x32xf32>
    %497 = arith.addf %494, %496 : vector<16x32xf32>
    %498 = arith.addf %483, %497 : vector<16x32xf32>
    %c34 = arith.constant 34 : index
    %c0_159 = arith.constant 0 : index
    %499 = vector.load %arg10[%c34, %c0_159] : memref<56x128xf32, #tpu.memory_space<vmem>>, vector<1x32xf32>
    %c35 = arith.constant 35 : index
    %c0_160 = arith.constant 0 : index
    %500 = vector.load %arg10[%c35, %c0_160] : memref<56x128xf32, #tpu.memory_space<vmem>>, vector<1x32xf32>
    %cst_161 = arith.constant dense<0.000000e+00> : vector<16xf32>
    %501 = vector.multi_reduction <add>, %498, %cst_161 [1] : vector<16x32xf32> to vector<16xf32>
    %502 = vector.shape_cast %501 : vector<16xf32> to vector<16x1xf32>
    %cst_162 = arith.constant 3.200000e+01 : f32
    %503 = vector.broadcast %cst_162 : f32 to vector<16x1xf32>
    %504 = arith.divf %502, %503 : vector<16x1xf32>
    %505 = vector.broadcast %504 : vector<16x1xf32> to vector<16x32xf32>
    %506 = arith.subf %498, %505 : vector<16x32xf32>
    %507 = arith.mulf %506, %506 : vector<16x32xf32>
    %cst_163 = arith.constant dense<0.000000e+00> : vector<16xf32>
    %508 = vector.multi_reduction <add>, %507, %cst_163 [1] : vector<16x32xf32> to vector<16xf32>
    %509 = vector.shape_cast %508 : vector<16xf32> to vector<16x1xf32>
    %cst_164 = arith.constant 3.200000e+01 : f32
    %510 = vector.broadcast %cst_164 : f32 to vector<16x1xf32>
    %511 = arith.divf %509, %510 : vector<16x1xf32>
    %cst_165 = arith.constant 9.99999974E-6 : f32
    %512 = vector.broadcast %cst_165 : f32 to vector<16x1xf32>
    %513 = arith.addf %511, %512 : vector<16x1xf32>
    %514 = math.rsqrt %513 : vector<16x1xf32>
    %515 = vector.broadcast %514 : vector<16x1xf32> to vector<16x32xf32>
    %516 = arith.mulf %506, %515 : vector<16x32xf32>
    %517 = vector.broadcast %499 : vector<1x32xf32> to vector<16x32xf32>
    %518 = arith.mulf %516, %517 : vector<16x32xf32>
    %519 = vector.broadcast %500 : vector<1x32xf32> to vector<16x32xf32>
    %520 = arith.addf %518, %519 : vector<16x32xf32>
    %c800 = arith.constant 800 : index
    %c0_166 = arith.constant 0 : index
    %521 = vector.load %arg9[%c800, %c0_166] : memref<1184x128xbf16, #tpu.memory_space<vmem>>, vector<32x32xbf16>
    %522 = arith.truncf %520 : vector<16x32xf32> to vector<16x32xbf16>
    %cst_167 = arith.constant dense<0.000000e+00> : vector<16x32xf32>
    %523 = tpu.matmul %522, %521, %cst_167 {dimension_numbers = #tpu.dot_dimension_numbers<[1], [0], [0], [1], [0, 0, 1, 1], [], []>} : vector<16x32xbf16>, vector<32x32xbf16>, vector<16x32xf32> -> vector<16x32xf32>
    %c36 = arith.constant 36 : index
    %c0_168 = arith.constant 0 : index
    %524 = vector.load %arg10[%c36, %c0_168] : memref<56x128xf32, #tpu.memory_space<vmem>>, vector<1x32xf32>
    %525 = vector.broadcast %524 : vector<1x32xf32> to vector<16x32xf32>
    %526 = arith.addf %523, %525 : vector<16x32xf32>
    %c832 = arith.constant 832 : index
    %c0_169 = arith.constant 0 : index
    %527 = vector.load %arg9[%c832, %c0_169] : memref<1184x128xbf16, #tpu.memory_space<vmem>>, vector<32x32xbf16>
    %528 = arith.truncf %520 : vector<16x32xf32> to vector<16x32xbf16>
    %cst_170 = arith.constant dense<0.000000e+00> : vector<16x32xf32>
    %529 = tpu.matmul %528, %527, %cst_170 {dimension_numbers = #tpu.dot_dimension_numbers<[1], [0], [0], [1], [0, 0, 1, 1], [], []>} : vector<16x32xbf16>, vector<32x32xbf16>, vector<16x32xf32> -> vector<16x32xf32>
    %c37 = arith.constant 37 : index
    %c0_171 = arith.constant 0 : index
    %530 = vector.load %arg10[%c37, %c0_171] : memref<56x128xf32, #tpu.memory_space<vmem>>, vector<1x32xf32>
    %531 = vector.broadcast %530 : vector<1x32xf32> to vector<16x32xf32>
    %532 = arith.addf %529, %531 : vector<16x32xf32>
    %c864 = arith.constant 864 : index
    %c0_172 = arith.constant 0 : index
    %533 = vector.load %arg9[%c864, %c0_172] : memref<1184x128xbf16, #tpu.memory_space<vmem>>, vector<32x32xbf16>
    %534 = arith.truncf %520 : vector<16x32xf32> to vector<16x32xbf16>
    %cst_173 = arith.constant dense<0.000000e+00> : vector<16x32xf32>
    %535 = tpu.matmul %534, %533, %cst_173 {dimension_numbers = #tpu.dot_dimension_numbers<[1], [0], [0], [1], [0, 0, 1, 1], [], []>} : vector<16x32xbf16>, vector<32x32xbf16>, vector<16x32xf32> -> vector<16x32xf32>
    %c38 = arith.constant 38 : index
    %c0_174 = arith.constant 0 : index
    %536 = vector.load %arg10[%c38, %c0_174] : memref<56x128xf32, #tpu.memory_space<vmem>>, vector<1x32xf32>
    %537 = vector.broadcast %536 : vector<1x32xf32> to vector<16x32xf32>
    %538 = arith.addf %535, %537 : vector<16x32xf32>
    %539 = vector.broadcast %30 : vector<1x32xf32> to vector<16x32xf32>
    %540 = arith.mulf %526, %539 : vector<16x32xf32>
    %541 = vector.broadcast %32 : vector<1x32xf32> to vector<16x32xf32>
    %542 = arith.mulf %526, %541 : vector<16x32xf32>
    %543 = vector.broadcast %34 : vector<1x32xf32> to vector<16x32xf32>
    %544 = arith.mulf %526, %543 : vector<16x32xf32>
    %545 = vector.broadcast %36 : vector<1x32xf32> to vector<16x32xf32>
    %546 = arith.mulf %526, %545 : vector<16x32xf32>
    %547 = tpu.concatenate %540, %542, %544, %546 in 0 : vector<16x32xf32>, vector<16x32xf32>, vector<16x32xf32>, vector<16x32xf32> -> vector<64x32xf32>
    %cst_175 = arith.constant dense<0.000000e+00> : vector<64x16xf32>
    %548 = tpu.matmul %547, %532, %cst_175 {dimension_numbers = #tpu.dot_dimension_numbers<[1], [1], [0], [0], [0, 0, 1, 0], [], []>} : vector<64x32xf32>, vector<16x32xf32>, vector<64x16xf32> -> vector<64x16xf32>
    %549 = tpu.concatenate %307, %307, %307, %307 in 0 : vector<16x16xf32>, vector<16x16xf32>, vector<16x16xf32>, vector<16x16xf32> -> vector<64x16xf32>
    %550 = arith.addf %548, %549 : vector<64x16xf32>
    %cst_176 = arith.constant dense<0xFF800000> : vector<64xf32>
    %551 = vector.multi_reduction <maximumf>, %550, %cst_176 [1] : vector<64x16xf32> to vector<64xf32>
    %552 = vector.shape_cast %551 : vector<64xf32> to vector<64x1xf32>
    %553 = vector.broadcast %552 : vector<64x1xf32> to vector<64x16xf32>
    %554 = arith.subf %550, %553 : vector<64x16xf32>
    %555 = math.exp %554 : vector<64x16xf32>
    %cst_177 = arith.constant dense<0.000000e+00> : vector<64xf32>
    %556 = vector.multi_reduction <add>, %555, %cst_177 [1] : vector<64x16xf32> to vector<64xf32>
    %557 = vector.shape_cast %556 : vector<64xf32> to vector<64x1xf32>
    %558 = tpu.reciprocal %557 {approx = true} : vector<64x1xf32> -> vector<64x1xf32>
    %559 = vector.broadcast %558 : vector<64x1xf32> to vector<64x16xf32>
    %560 = arith.mulf %555, %559 : vector<64x16xf32>
    %cst_178 = arith.constant dense<0.000000e+00> : vector<64x32xf32>
    %561 = tpu.matmul %560, %538, %cst_178 {dimension_numbers = #tpu.dot_dimension_numbers<[1], [0], [0], [1], [0, 0, 1, 1], [], []>} : vector<64x16xf32>, vector<16x32xf32>, vector<64x32xf32> -> vector<64x32xf32>
    %cst_179 = arith.constant 0.000000e+00 : f32
    %562 = vector.broadcast %cst_179 : f32 to vector<16x32xf32>
    %563 = vector.extract_strided_slice %561 {offsets = [0, 0], sizes = [16, 32], strides = [1, 1]} : vector<64x32xf32> to vector<16x32xf32>
    %564 = vector.broadcast %7 : vector<1x32xf32> to vector<16x32xf32>
    %565 = arith.mulf %563, %564 : vector<16x32xf32>
    %566 = arith.addf %562, %565 : vector<16x32xf32>
    %567 = vector.extract_strided_slice %561 {offsets = [16, 0], sizes = [16, 32], strides = [1, 1]} : vector<64x32xf32> to vector<16x32xf32>
    %568 = vector.broadcast %14 : vector<1x32xf32> to vector<16x32xf32>
    %569 = arith.mulf %567, %568 : vector<16x32xf32>
    %570 = arith.addf %566, %569 : vector<16x32xf32>
    %571 = vector.extract_strided_slice %561 {offsets = [32, 0], sizes = [16, 32], strides = [1, 1]} : vector<64x32xf32> to vector<16x32xf32>
    %572 = vector.broadcast %21 : vector<1x32xf32> to vector<16x32xf32>
    %573 = arith.mulf %571, %572 : vector<16x32xf32>
    %574 = arith.addf %570, %573 : vector<16x32xf32>
    %575 = vector.extract_strided_slice %561 {offsets = [48, 0], sizes = [16, 32], strides = [1, 1]} : vector<64x32xf32> to vector<16x32xf32>
    %576 = vector.broadcast %28 : vector<1x32xf32> to vector<16x32xf32>
    %577 = arith.mulf %575, %576 : vector<16x32xf32>
    %578 = arith.addf %574, %577 : vector<16x32xf32>
    %c896 = arith.constant 896 : index
    %c0_180 = arith.constant 0 : index
    %579 = vector.load %arg9[%c896, %c0_180] : memref<1184x128xbf16, #tpu.memory_space<vmem>>, vector<32x32xbf16>
    %580 = arith.truncf %578 : vector<16x32xf32> to vector<16x32xbf16>
    %cst_181 = arith.constant dense<0.000000e+00> : vector<16x32xf32>
    %581 = tpu.matmul %580, %579, %cst_181 {dimension_numbers = #tpu.dot_dimension_numbers<[1], [0], [0], [1], [0, 0, 1, 1], [], []>} : vector<16x32xbf16>, vector<32x32xbf16>, vector<16x32xf32> -> vector<16x32xf32>
    %c39 = arith.constant 39 : index
    %c0_182 = arith.constant 0 : index
    %582 = vector.load %arg10[%c39, %c0_182] : memref<56x128xf32, #tpu.memory_space<vmem>>, vector<1x32xf32>
    %583 = vector.broadcast %582 : vector<1x32xf32> to vector<16x32xf32>
    %584 = arith.addf %581, %583 : vector<16x32xf32>
    %585 = arith.addf %520, %584 : vector<16x32xf32>
    %c46 = arith.constant 46 : index
    %c0_183 = arith.constant 0 : index
    %586 = vector.load %arg10[%c46, %c0_183] : memref<56x128xf32, #tpu.memory_space<vmem>>, vector<1x32xf32>
    %c47 = arith.constant 47 : index
    %c0_184 = arith.constant 0 : index
    %587 = vector.load %arg10[%c47, %c0_184] : memref<56x128xf32, #tpu.memory_space<vmem>>, vector<1x32xf32>
    %cst_185 = arith.constant dense<0.000000e+00> : vector<16xf32>
    %588 = vector.multi_reduction <add>, %585, %cst_185 [1] : vector<16x32xf32> to vector<16xf32>
    %589 = vector.shape_cast %588 : vector<16xf32> to vector<16x1xf32>
    %cst_186 = arith.constant 3.200000e+01 : f32
    %590 = vector.broadcast %cst_186 : f32 to vector<16x1xf32>
    %591 = arith.divf %589, %590 : vector<16x1xf32>
    %592 = vector.broadcast %591 : vector<16x1xf32> to vector<16x32xf32>
    %593 = arith.subf %585, %592 : vector<16x32xf32>
    %594 = arith.mulf %593, %593 : vector<16x32xf32>
    %cst_187 = arith.constant dense<0.000000e+00> : vector<16xf32>
    %595 = vector.multi_reduction <add>, %594, %cst_187 [1] : vector<16x32xf32> to vector<16xf32>
    %596 = vector.shape_cast %595 : vector<16xf32> to vector<16x1xf32>
    %cst_188 = arith.constant 3.200000e+01 : f32
    %597 = vector.broadcast %cst_188 : f32 to vector<16x1xf32>
    %598 = arith.divf %596, %597 : vector<16x1xf32>
    %cst_189 = arith.constant 9.99999974E-6 : f32
    %599 = vector.broadcast %cst_189 : f32 to vector<16x1xf32>
    %600 = arith.addf %598, %599 : vector<16x1xf32>
    %601 = math.rsqrt %600 : vector<16x1xf32>
    %602 = vector.broadcast %601 : vector<16x1xf32> to vector<16x32xf32>
    %603 = arith.mulf %593, %602 : vector<16x32xf32>
    %604 = vector.broadcast %586 : vector<1x32xf32> to vector<16x32xf32>
    %605 = arith.mulf %603, %604 : vector<16x32xf32>
    %606 = vector.broadcast %587 : vector<1x32xf32> to vector<16x32xf32>
    %607 = arith.addf %605, %606 : vector<16x32xf32>
    %c928 = arith.constant 928 : index
    %c0_190 = arith.constant 0 : index
    %608 = vector.load %arg9[%c928, %c0_190] : memref<1184x128xbf16, #tpu.memory_space<vmem>>, vector<32x32xbf16>
    %609 = arith.truncf %607 : vector<16x32xf32> to vector<16x32xbf16>
    %cst_191 = arith.constant dense<0.000000e+00> : vector<16x32xf32>
    %610 = tpu.matmul %609, %608, %cst_191 {dimension_numbers = #tpu.dot_dimension_numbers<[1], [0], [0], [1], [0, 0, 1, 1], [], []>} : vector<16x32xbf16>, vector<32x32xbf16>, vector<16x32xf32> -> vector<16x32xf32>
    %c40 = arith.constant 40 : index
    %c0_192 = arith.constant 0 : index
    %611 = vector.load %arg10[%c40, %c0_192] : memref<56x128xf32, #tpu.memory_space<vmem>>, vector<1x32xf32>
    %612 = vector.broadcast %611 : vector<1x32xf32> to vector<16x32xf32>
    %613 = arith.addf %610, %612 : vector<16x32xf32>
    %c960 = arith.constant 960 : index
    %c0_193 = arith.constant 0 : index
    %614 = vector.load %arg9[%c960, %c0_193] : memref<1184x128xbf16, #tpu.memory_space<vmem>>, vector<32x32xbf16>
    %615 = arith.truncf %296 : vector<16x32xf32> to vector<16x32xbf16>
    %cst_194 = arith.constant dense<0.000000e+00> : vector<16x32xf32>
    %616 = tpu.matmul %615, %614, %cst_194 {dimension_numbers = #tpu.dot_dimension_numbers<[1], [0], [0], [1], [0, 0, 1, 1], [], []>} : vector<16x32xbf16>, vector<32x32xbf16>, vector<16x32xf32> -> vector<16x32xf32>
    %c41 = arith.constant 41 : index
    %c0_195 = arith.constant 0 : index
    %617 = vector.load %arg10[%c41, %c0_195] : memref<56x128xf32, #tpu.memory_space<vmem>>, vector<1x32xf32>
    %618 = vector.broadcast %617 : vector<1x32xf32> to vector<16x32xf32>
    %619 = arith.addf %616, %618 : vector<16x32xf32>
    %c992 = arith.constant 992 : index
    %c0_196 = arith.constant 0 : index
    %620 = vector.load %arg9[%c992, %c0_196] : memref<1184x128xbf16, #tpu.memory_space<vmem>>, vector<32x32xbf16>
    %621 = arith.truncf %296 : vector<16x32xf32> to vector<16x32xbf16>
    %cst_197 = arith.constant dense<0.000000e+00> : vector<16x32xf32>
    %622 = tpu.matmul %621, %620, %cst_197 {dimension_numbers = #tpu.dot_dimension_numbers<[1], [0], [0], [1], [0, 0, 1, 1], [], []>} : vector<16x32xbf16>, vector<32x32xbf16>, vector<16x32xf32> -> vector<16x32xf32>
    %c42 = arith.constant 42 : index
    %c0_198 = arith.constant 0 : index
    %623 = vector.load %arg10[%c42, %c0_198] : memref<56x128xf32, #tpu.memory_space<vmem>>, vector<1x32xf32>
    %624 = vector.broadcast %623 : vector<1x32xf32> to vector<16x32xf32>
    %625 = arith.addf %622, %624 : vector<16x32xf32>
    %626 = vector.broadcast %30 : vector<1x32xf32> to vector<16x32xf32>
    %627 = arith.mulf %613, %626 : vector<16x32xf32>
    %628 = vector.broadcast %32 : vector<1x32xf32> to vector<16x32xf32>
    %629 = arith.mulf %613, %628 : vector<16x32xf32>
    %630 = vector.broadcast %34 : vector<1x32xf32> to vector<16x32xf32>
    %631 = arith.mulf %613, %630 : vector<16x32xf32>
    %632 = vector.broadcast %36 : vector<1x32xf32> to vector<16x32xf32>
    %633 = arith.mulf %613, %632 : vector<16x32xf32>
    %634 = tpu.concatenate %627, %629, %631, %633 in 0 : vector<16x32xf32>, vector<16x32xf32>, vector<16x32xf32>, vector<16x32xf32> -> vector<64x32xf32>
    %cst_199 = arith.constant dense<0.000000e+00> : vector<64x16xf32>
    %635 = tpu.matmul %634, %619, %cst_199 {dimension_numbers = #tpu.dot_dimension_numbers<[1], [1], [0], [0], [0, 0, 1, 0], [], []>} : vector<64x32xf32>, vector<16x32xf32>, vector<64x16xf32> -> vector<64x16xf32>
    %636 = tpu.concatenate %309, %309, %309, %309 in 0 : vector<16x16xf32>, vector<16x16xf32>, vector<16x16xf32>, vector<16x16xf32> -> vector<64x16xf32>
    %637 = arith.addf %635, %636 : vector<64x16xf32>
    %cst_200 = arith.constant dense<0xFF800000> : vector<64xf32>
    %638 = vector.multi_reduction <maximumf>, %637, %cst_200 [1] : vector<64x16xf32> to vector<64xf32>
    %639 = vector.shape_cast %638 : vector<64xf32> to vector<64x1xf32>
    %640 = vector.broadcast %639 : vector<64x1xf32> to vector<64x16xf32>
    %641 = arith.subf %637, %640 : vector<64x16xf32>
    %642 = math.exp %641 : vector<64x16xf32>
    %cst_201 = arith.constant dense<0.000000e+00> : vector<64xf32>
    %643 = vector.multi_reduction <add>, %642, %cst_201 [1] : vector<64x16xf32> to vector<64xf32>
    %644 = vector.shape_cast %643 : vector<64xf32> to vector<64x1xf32>
    %645 = tpu.reciprocal %644 {approx = true} : vector<64x1xf32> -> vector<64x1xf32>
    %646 = vector.broadcast %645 : vector<64x1xf32> to vector<64x16xf32>
    %647 = arith.mulf %642, %646 : vector<64x16xf32>
    %cst_202 = arith.constant dense<0.000000e+00> : vector<64x32xf32>
    %648 = tpu.matmul %647, %625, %cst_202 {dimension_numbers = #tpu.dot_dimension_numbers<[1], [0], [0], [1], [0, 0, 1, 1], [], []>} : vector<64x16xf32>, vector<16x32xf32>, vector<64x32xf32> -> vector<64x32xf32>
    %cst_203 = arith.constant 0.000000e+00 : f32
    %649 = vector.broadcast %cst_203 : f32 to vector<16x32xf32>
    %650 = vector.extract_strided_slice %648 {offsets = [0, 0], sizes = [16, 32], strides = [1, 1]} : vector<64x32xf32> to vector<16x32xf32>
    %651 = vector.broadcast %7 : vector<1x32xf32> to vector<16x32xf32>
    %652 = arith.mulf %650, %651 : vector<16x32xf32>
    %653 = arith.addf %649, %652 : vector<16x32xf32>
    %654 = vector.extract_strided_slice %648 {offsets = [16, 0], sizes = [16, 32], strides = [1, 1]} : vector<64x32xf32> to vector<16x32xf32>
    %655 = vector.broadcast %14 : vector<1x32xf32> to vector<16x32xf32>
    %656 = arith.mulf %654, %655 : vector<16x32xf32>
    %657 = arith.addf %653, %656 : vector<16x32xf32>
    %658 = vector.extract_strided_slice %648 {offsets = [32, 0], sizes = [16, 32], strides = [1, 1]} : vector<64x32xf32> to vector<16x32xf32>
    %659 = vector.broadcast %21 : vector<1x32xf32> to vector<16x32xf32>
    %660 = arith.mulf %658, %659 : vector<16x32xf32>
    %661 = arith.addf %657, %660 : vector<16x32xf32>
    %662 = vector.extract_strided_slice %648 {offsets = [48, 0], sizes = [16, 32], strides = [1, 1]} : vector<64x32xf32> to vector<16x32xf32>
    %663 = vector.broadcast %28 : vector<1x32xf32> to vector<16x32xf32>
    %664 = arith.mulf %662, %663 : vector<16x32xf32>
    %665 = arith.addf %661, %664 : vector<16x32xf32>
    %c1024 = arith.constant 1024 : index
    %c0_204 = arith.constant 0 : index
    %666 = vector.load %arg9[%c1024, %c0_204] : memref<1184x128xbf16, #tpu.memory_space<vmem>>, vector<32x32xbf16>
    %667 = arith.truncf %665 : vector<16x32xf32> to vector<16x32xbf16>
    %cst_205 = arith.constant dense<0.000000e+00> : vector<16x32xf32>
    %668 = tpu.matmul %667, %666, %cst_205 {dimension_numbers = #tpu.dot_dimension_numbers<[1], [0], [0], [1], [0, 0, 1, 1], [], []>} : vector<16x32xbf16>, vector<32x32xbf16>, vector<16x32xf32> -> vector<16x32xf32>
    %c43 = arith.constant 43 : index
    %c0_206 = arith.constant 0 : index
    %669 = vector.load %arg10[%c43, %c0_206] : memref<56x128xf32, #tpu.memory_space<vmem>>, vector<1x32xf32>
    %670 = vector.broadcast %669 : vector<1x32xf32> to vector<16x32xf32>
    %671 = arith.addf %668, %670 : vector<16x32xf32>
    %672 = arith.addf %607, %671 : vector<16x32xf32>
    %c48 = arith.constant 48 : index
    %c0_207 = arith.constant 0 : index
    %673 = vector.load %arg10[%c48, %c0_207] : memref<56x128xf32, #tpu.memory_space<vmem>>, vector<1x32xf32>
    %c49 = arith.constant 49 : index
    %c0_208 = arith.constant 0 : index
    %674 = vector.load %arg10[%c49, %c0_208] : memref<56x128xf32, #tpu.memory_space<vmem>>, vector<1x32xf32>
    %cst_209 = arith.constant dense<0.000000e+00> : vector<16xf32>
    %675 = vector.multi_reduction <add>, %672, %cst_209 [1] : vector<16x32xf32> to vector<16xf32>
    %676 = vector.shape_cast %675 : vector<16xf32> to vector<16x1xf32>
    %cst_210 = arith.constant 3.200000e+01 : f32
    %677 = vector.broadcast %cst_210 : f32 to vector<16x1xf32>
    %678 = arith.divf %676, %677 : vector<16x1xf32>
    %679 = vector.broadcast %678 : vector<16x1xf32> to vector<16x32xf32>
    %680 = arith.subf %672, %679 : vector<16x32xf32>
    %681 = arith.mulf %680, %680 : vector<16x32xf32>
    %cst_211 = arith.constant dense<0.000000e+00> : vector<16xf32>
    %682 = vector.multi_reduction <add>, %681, %cst_211 [1] : vector<16x32xf32> to vector<16xf32>
    %683 = vector.shape_cast %682 : vector<16xf32> to vector<16x1xf32>
    %cst_212 = arith.constant 3.200000e+01 : f32
    %684 = vector.broadcast %cst_212 : f32 to vector<16x1xf32>
    %685 = arith.divf %683, %684 : vector<16x1xf32>
    %cst_213 = arith.constant 9.99999974E-6 : f32
    %686 = vector.broadcast %cst_213 : f32 to vector<16x1xf32>
    %687 = arith.addf %685, %686 : vector<16x1xf32>
    %688 = math.rsqrt %687 : vector<16x1xf32>
    %689 = vector.broadcast %688 : vector<16x1xf32> to vector<16x32xf32>
    %690 = arith.mulf %680, %689 : vector<16x32xf32>
    %691 = vector.broadcast %673 : vector<1x32xf32> to vector<16x32xf32>
    %692 = arith.mulf %690, %691 : vector<16x32xf32>
    %693 = vector.broadcast %674 : vector<1x32xf32> to vector<16x32xf32>
    %694 = arith.addf %692, %693 : vector<16x32xf32>
    %c1056 = arith.constant 1056 : index
    %c0_214 = arith.constant 0 : index
    %695 = vector.load %arg9[%c1056, %c0_214] : memref<1184x128xbf16, #tpu.memory_space<vmem>>, vector<32x64xbf16>
    %696 = arith.truncf %694 : vector<16x32xf32> to vector<16x32xbf16>
    %cst_215 = arith.constant dense<0.000000e+00> : vector<16x64xf32>
    %697 = tpu.matmul %696, %695, %cst_215 {dimension_numbers = #tpu.dot_dimension_numbers<[1], [0], [0], [1], [0, 0, 1, 1], [], []>} : vector<16x32xbf16>, vector<32x64xbf16>, vector<16x64xf32> -> vector<16x64xf32>
    %c44 = arith.constant 44 : index
    %c0_216 = arith.constant 0 : index
    %698 = vector.load %arg10[%c44, %c0_216] : memref<56x128xf32, #tpu.memory_space<vmem>>, vector<1x64xf32>
    %699 = vector.broadcast %698 : vector<1x64xf32> to vector<16x64xf32>
    %700 = arith.addf %697, %699 : vector<16x64xf32>
    %cst_217 = arith.constant 0.000000e+00 : f32
    %701 = vector.broadcast %cst_217 : f32 to vector<16x64xf32>
    %702 = arith.maximumf %700, %701 : vector<16x64xf32>
    %c1088 = arith.constant 1088 : index
    %c0_218 = arith.constant 0 : index
    %703 = vector.load %arg9[%c1088, %c0_218] : memref<1184x128xbf16, #tpu.memory_space<vmem>>, vector<64x32xbf16>
    %704 = arith.truncf %702 : vector<16x64xf32> to vector<16x64xbf16>
    %cst_219 = arith.constant dense<0.000000e+00> : vector<16x32xf32>
    %705 = tpu.matmul %704, %703, %cst_219 {dimension_numbers = #tpu.dot_dimension_numbers<[1], [0], [0], [1], [0, 0, 1, 1], [], []>} : vector<16x64xbf16>, vector<64x32xbf16>, vector<16x32xf32> -> vector<16x32xf32>
    %c45 = arith.constant 45 : index
    %c0_220 = arith.constant 0 : index
    %706 = vector.load %arg10[%c45, %c0_220] : memref<56x128xf32, #tpu.memory_space<vmem>>, vector<1x32xf32>
    %707 = vector.broadcast %706 : vector<1x32xf32> to vector<16x32xf32>
    %708 = arith.addf %705, %707 : vector<16x32xf32>
    %709 = arith.addf %694, %708 : vector<16x32xf32>
    %c50 = arith.constant 50 : index
    %c0_221 = arith.constant 0 : index
    %710 = vector.load %arg10[%c50, %c0_221] : memref<56x128xf32, #tpu.memory_space<vmem>>, vector<1x32xf32>
    %c51 = arith.constant 51 : index
    %c0_222 = arith.constant 0 : index
    %711 = vector.load %arg10[%c51, %c0_222] : memref<56x128xf32, #tpu.memory_space<vmem>>, vector<1x32xf32>
    %cst_223 = arith.constant dense<0.000000e+00> : vector<16xf32>
    %712 = vector.multi_reduction <add>, %709, %cst_223 [1] : vector<16x32xf32> to vector<16xf32>
    %713 = vector.shape_cast %712 : vector<16xf32> to vector<16x1xf32>
    %cst_224 = arith.constant 3.200000e+01 : f32
    %714 = vector.broadcast %cst_224 : f32 to vector<16x1xf32>
    %715 = arith.divf %713, %714 : vector<16x1xf32>
    %716 = vector.broadcast %715 : vector<16x1xf32> to vector<16x32xf32>
    %717 = arith.subf %709, %716 : vector<16x32xf32>
    %718 = arith.mulf %717, %717 : vector<16x32xf32>
    %cst_225 = arith.constant dense<0.000000e+00> : vector<16xf32>
    %719 = vector.multi_reduction <add>, %718, %cst_225 [1] : vector<16x32xf32> to vector<16xf32>
    %720 = vector.shape_cast %719 : vector<16xf32> to vector<16x1xf32>
    %cst_226 = arith.constant 3.200000e+01 : f32
    %721 = vector.broadcast %cst_226 : f32 to vector<16x1xf32>
    %722 = arith.divf %720, %721 : vector<16x1xf32>
    %cst_227 = arith.constant 9.99999974E-6 : f32
    %723 = vector.broadcast %cst_227 : f32 to vector<16x1xf32>
    %724 = arith.addf %722, %723 : vector<16x1xf32>
    %725 = math.rsqrt %724 : vector<16x1xf32>
    %726 = vector.broadcast %725 : vector<16x1xf32> to vector<16x32xf32>
    %727 = arith.mulf %717, %726 : vector<16x32xf32>
    %728 = vector.broadcast %710 : vector<1x32xf32> to vector<16x32xf32>
    %729 = arith.mulf %727, %728 : vector<16x32xf32>
    %730 = vector.broadcast %711 : vector<1x32xf32> to vector<16x32xf32>
    %731 = arith.addf %729, %730 : vector<16x32xf32>
    %c1152 = arith.constant 1152 : index
    %c0_228 = arith.constant 0 : index
    %732 = vector.load %arg9[%c1152, %c0_228] : memref<1184x128xbf16, #tpu.memory_space<vmem>>, vector<32x128xbf16>
    %733 = arith.truncf %731 : vector<16x32xf32> to vector<16x32xbf16>
    %cst_229 = arith.constant dense<0.000000e+00> : vector<16x128xf32>
    %734 = tpu.matmul %733, %732, %cst_229 {dimension_numbers = #tpu.dot_dimension_numbers<[1], [0], [0], [1], [0, 0, 1, 1], [], []>} : vector<16x32xbf16>, vector<32x128xbf16>, vector<16x128xf32> -> vector<16x128xf32>
    %c52 = arith.constant 52 : index
    %c0_230 = arith.constant 0 : index
    %735 = vector.load %arg10[%c52, %c0_230] : memref<56x128xf32, #tpu.memory_space<vmem>>, vector<1x128xf32>
    %736 = vector.broadcast %735 : vector<1x128xf32> to vector<16x128xf32>
    %737 = arith.addf %734, %736 : vector<16x128xf32>
    %738 = vector.extract_strided_slice %737 {offsets = [0, 0], sizes = [8, 128], strides = [1, 1]} : vector<16x128xf32> to vector<8x128xf32>
    %c0_231 = arith.constant 0 : index
    %c0_232 = arith.constant 0 : index
    %739 = vector.load %arg11[%c0_231, %c0_232] : memref<8x256xf32, #tpu.memory_space<vmem>>, vector<8x128xf32>
    tpu.vector_store %arg11[%c0_231, %c0_232], %738 {strides = array<i32>} : memref<8x256xf32, #tpu.memory_space<vmem>>, vector<8x128xf32>,
    %740 = vector.extract_strided_slice %737 {offsets = [8, 0], sizes = [8, 128], strides = [1, 1]} : vector<16x128xf32> to vector<8x128xf32>
    %c0_233 = arith.constant 0 : index
    %c128_234 = arith.constant 128 : index
    %741 = vector.load %arg11[%c0_233, %c128_234] : memref<8x256xf32, #tpu.memory_space<vmem>>, vector<8x128xf32>
    tpu.vector_store %arg11[%c0_233, %c128_234], %740 {strides = array<i32>} : memref<8x256xf32, #tpu.memory_space<vmem>>, vector<8x128xf32>,
    return
  }
}

</mosaic_0001>

<bundles_post_ra>
// kernel: tile.28
= control target key start
LH: loop header
LB: loop body
LE: loop exit
PB: predicated region body
PF: predicated region fallthrough
CT: control target
= control target key end

     0   :  { %s154_s0 = inlined_call_operand.vmem [shape: f32[8,8], index: 0, kind: input, shape index: {}]   ;;  %s155_s1 = inlined_call_operand.vmem [shape: f32[2,8,2,8], index: 1, kind: output, shape index: {}]  }
   0x1   :  { %v4_v0 = vld [vmem:[%s154_s0] ss:$0 sm:$0xff]  ;;  %v51_v1 = vld [vmem:[%s154_s0 + $0x1] ss:$0 sm:$0xff]  ;;  %v54_v2 = vld [vmem:[%s154_s0 + $0x2] ss:$0 sm:$0xff] }
   0x2   :  { %5 = vst [vmem:[%s155_s1] sm:$0x3] %v4_v0  ;;  %50 = vst [vmem:[%s155_s1 + $0x10] sm:$0x3] %v4_v0  ;;  %v57_v3 = vld [vmem:[%s154_s0 + $0x3] ss:$0 sm:$0xff] }
   0x3   :  { %52 = vst [vmem:[%s155_s1 + $0x2] sm:$0x3] %v51_v1  ;;  %53 = vst [vmem:[%s155_s1 + $0x12] sm:$0x3] %v51_v1  ;;  %v60_v4 = vld [vmem:[%s154_s0 + $0x4] ss:$0 sm:$0xff] }
   0x4   :  { %55 = vst [vmem:[%s155_s1 + $0x4] sm:$0x3] %v54_v2  ;;  %56 = vst [vmem:[%s155_s1 + $0x14] sm:$0x3] %v54_v2  ;;  %v63_v5 = vld [vmem:[%s154_s0 + $0x5] ss:$0 sm:$0xff] }
   0x5   :  { %58 = vst [vmem:[%s155_s1 + $0x6] sm:$0x3] %v57_v3  ;;  %59 = vst [vmem:[%s155_s1 + $0x16] sm:$0x3] %v57_v3  ;;  %v66_v6 = vld [vmem:[%s154_s0 + $0x6] ss:$0 sm:$0xff] }
   0x6   :  { %61 = vst [vmem:[%s155_s1 + $0x8] sm:$0x3] %v60_v4  ;;  %62 = vst [vmem:[%s155_s1 + $0x18] sm:$0x3] %v60_v4  ;;  %v69_v7 = vld [vmem:[%s154_s0 + $0x7] ss:$0 sm:$0xff] }
   0x7   :  { %64 = vst [vmem:[%s155_s1 + $0xa] sm:$0x3] %v63_v5  ;;  %65 = vst [vmem:[%s155_s1 + $0x1a] sm:$0x3] %v63_v5 }
   0x8   :  { %67 = vst [vmem:[%s155_s1 + $0xc] sm:$0x3] %v66_v6  ;;  %68 = vst [vmem:[%s155_s1 + $0x1c] sm:$0x3] %v66_v6 }
   0x9   :  { %70 = vst [vmem:[%s155_s1 + $0xe] sm:$0x3] %v69_v7  ;;  %71 = vst [vmem:[%s155_s1 + $0x1e] sm:$0x3] %v69_v7 }

// kernel: tile.29
= control target key start
LH: loop header
LB: loop body
LE: loop exit
PB: predicated region body
PF: predicated region fallthrough
CT: control target
= control target key end

     0   :  { %vm82_vm0 = vcmask 1047556   ;;  %vm84_vm1 = vcmask 64512   ;;  %vm103_vm2 = vcmask 130112   ;;  %s225_s0 = inlined_call_operand.vmem [shape: f32[2,8,2,8], index: 0, kind: input, shape index: {}]   ;;  %s226_s1 = inlined_call_operand.vmem [shape: f32[16,16], index: 1, kind: output, shape index: {}]  }
   0x1   :  { %v138_v0 = vld [vmem:[%s225_s0 + $0xe] sm:$0x3]  ;;  %v139_v1 = vld [vmem:[%s225_s0 + $0xc] sm:$0x3]  ;;  %v140_v2 = vld [vmem:[%s225_s0 + $0xa] sm:$0x3] }
   0x2   :  { %48 = vst [vmem:[#allocation0 + $0x38] sm:$0x3] %v138_v0  ;;  %53 = vst [vmem:[#allocation0 + $0x30] sm:$0x3] %v139_v1  ;;  %v141_v3 = vld [vmem:[%s225_s0 + $0x8] sm:$0x3] }
   0x3   :  { %58 = vst [vmem:[#allocation0 + $0x28] sm:$0x3] %v140_v2  ;;  %v142_v4 = vld [vmem:[%s225_s0 + $0x6] sm:$0x3]  ;;  %v143_v5 = vld [vmem:[%s225_s0 + $0x4] sm:$0x3] }
   0x4   :  { %63 = vst [vmem:[#allocation0 + $0x20] sm:$0x3] %v141_v3  ;;  %68 = vst [vmem:[#allocation0 + $0x18] sm:$0x3] %v142_v4  ;;  %v144_v6 = vld [vmem:[%s225_s0 + $0x2] sm:$0x3] }
   0x5   :  { %73 = vst [vmem:[#allocation0 + $0x10] sm:$0x3] %v143_v5  ;;  %v78_v7 = vld [vmem:[%s225_s0] sm:$0x3]  ;;  %77 = vst [vmem:[#allocation0 + $0x8] sm:$0x3] %v144_v6 }
   0x6   :  { %79 = vst [vmem:[#allocation0] sm:$0x3] %v78_v7  ;;  %v130_v8 = vld [vmem:[%s225_s0 + $0x1e] sm:$0x3]  ;;  %v131_v9 = vld [vmem:[%s225_s0 + $0x1c] sm:$0x3] }
   0x7   :  { %v132_v10 = vld [vmem:[%s225_s0 + $0x1a] sm:$0x3]  ;;  %8 = vst [vmem:[#allocation0 + $0x78] sm:$0x3] %v130_v8  ;;  %13 = vst [vmem:[#allocation0 + $0x70] sm:$0x3] %v131_v9 }
   0x8   :  { %18 = vst [vmem:[#allocation0 + $0x68] sm:$0x3] %v132_v10  ;;  %v133_v11 = vld [vmem:[%s225_s0 + $0x18] sm:$0x3]  ;;  %v134_v12 = vld [vmem:[%s225_s0 + $0x16] sm:$0x3] }
   0x9   :  { %v135_v13 = vld [vmem:[%s225_s0 + $0x14] sm:$0x3]  ;;  %23 = vst [vmem:[#allocation0 + $0x60] sm:$0x3] %v133_v11  ;;  %28 = vst [vmem:[#allocation0 + $0x58] sm:$0x3] %v134_v12 }
   0xa   :  { %33 = vst [vmem:[#allocation0 + $0x50] sm:$0x3] %v135_v13  ;;  %v136_v14 = vld [vmem:[%s225_s0 + $0x12] sm:$0x3]  ;;  %v137_v15 = vld [vmem:[%s225_s0 + $0x10] sm:$0x3] }
   0xb   :  { %38 = vst [vmem:[#allocation0 + $0x48] sm:$0x3] %v136_v14  ;;  %43 = vst [vmem:[#allocation0 + $0x40] sm:$0x3] %v137_v15  ;;  %s148_s0 = smov 8  }
   0xc   :  { %v98_v16 = vld [vmem:[#allocation0 + $0x1] ss:$8 sm:$0xf0]   ;;  %v81_v17 = vld [vmem:[#allocation0] ss:$8 sm:$0xf0]  }
   0xd   :  { %v96_v18 = vld [vmem:[#allocation0 + $0x1] ss:$8 sm:$0xf]   ;;  %v80_v19 = vld [vmem:[#allocation0] ss:$8 sm:$0xf]  }
   0xe   :  { %v100_v20 = vsel %vm82_vm0, %v98_v16, %v96_v18  ;;  %v83_v21 = vsel %vm82_vm0, %v81_v17, %v80_v19 }
   0xf   :  { %101 = vrot.lane.b32.xlu0 %v100_v20, %s148_s0  ;;  %85 = vst.msk [vmem:[%s226_s1] sm:$0xff] %vm84_vm1, %v83_v21  }
  0x10   :  { %v108_v22 = vld [vmem:[#allocation0 + $0x41] ss:$8 sm:$0xf0]   ;;  %v89_v23 = vld [vmem:[#allocation0 + $0x40] ss:$8 sm:$0xf0]  }
  0x12   :  { %v106_v24 = vld [vmem:[#allocation0 + $0x41] ss:$8 sm:$0xf]   ;;  %v87_v25 = vld [vmem:[#allocation0 + $0x40] ss:$8 sm:$0xf]  }
  0x13   :  { %v110_v26 = vsel %vm82_vm0, %v108_v22, %v106_v24  ;;  %v91_v27 = vsel %vm82_vm0, %v89_v23, %v87_v25 }
  0x14   :  { %145 = vst.msk [vmem:[%s226_s1 + $0x8] sm:$0xff] %vm84_vm1, %v91_v27   ;;  %111 = vrot.lane.b32.xlu0 %v110_v26, %s148_s0 }
  0x81   :  { %v102_v28 = vpop.permute.xlu0 %101  }
  0x82   :  { %104 = vst.msk [vmem:[%s226_s1] sm:$0xff] %vm103_vm2, %v102_v28  }
  0x86   :  { %v112_v29 = vpop.permute.xlu0 %111  }
  0x87   :  { %146 = vst.msk [vmem:[%s226_s1 + $0x8] sm:$0xff] %vm103_vm2, %v112_v29  }

// kernel: nmt_forward.1
= control target key start
LH: loop header
LB: loop body
LE: loop exit
PB: predicated region body
PF: predicated region fallthrough
CT: control target
= control target key end

     0   :  { %16 = vsyncpa [#allocation3], 0  ;;  %s6629_s17 = smov [#allocation2]   ;;  %s7627_s0 = inlined_call_operand.vmem [shape: s32[16,1], index: 0, kind: input, shape index: {}]   ;;  %s7628_s1 = inlined_call_operand.vmem [shape: s32[16,1], index: 1, kind: input, shape index: {}]   ;;  %s7629_s2 = inlined_call_operand.vmem [shape: f32[16,32], index: 2, kind: input, shape index: {}, may-alias: {2,3}]   ;;  %s7630_s3 = inlined_call_operand.vmem [shape: f32[16,32], index: 3, kind: input, shape index: {}, may-alias: {2,3}]   ;;  %s7631_s4 = inlined_call_operand.vmem [shape: f32[16,16], index: 4, kind: input, shape index: {}, may-alias: {4,6}]   ;;  %s7632_s5 = inlined_call_operand.vmem [shape: f32[16,16], index: 5, kind: input, shape index: {}]   ;;  %s7633_s6 = inlined_call_operand.vmem [shape: f32[16,16], index: 6, kind: input, shape index: {}, may-alias: {4,6}]   ;;  %s7634_s7 = inlined_call_operand.vmem [shape: f32[40,32], index: 7, kind: input, shape index: {}]   ;;  %s7635_s8 = inlined_call_operand.vmem [shape: f32[48,32], index: 8, kind: input, shape index: {}]   ;;  %s7636_s9 = inlined_call_operand.hbm [shape: bf16[1184,128], index: 9, kind: input, shape index: {}]   ;;  %s7637_s10 = inlined_call_operand.vmem [shape: f32[56,128], index: 10, kind: input, shape index: {}]   ;;  %s7638_s11 = inlined_call_operand.vmem [shape: f32[8,256], index: 11, kind: output, shape index: {}]  }
   0x1   :  { %s40_s18 = sshll.u32 %s6629_s17, 4  ;;  %s6605_s21 = scalar_lea.hbm %s7636_s9, 9472  ;;  %s41_s18 = int_to_ptr.vmem [resolvable:$true] %s40_s18 }
   0x2   :  { %p6606_p0 = scmp.ne.s32.totalorder %s7636_s9, %s6605_s21  ;;  %p6609_p1 = scmp.lt.u32.totalorder %s6605_s21, %s7636_s9 }
   0x4   :  { %p6611_p2 = pnand %p6609_p1, %p6606_p0 }
   0x6   :  { %6614 = shalt.err (!%p6611_p2)
}
   0x7   :  { %s6615_s26 = scalar_lea.vmem %s41_s18, 9472  ;;  %p6620_p4 = scmp.lt.s32.totalorder %s41_s18, %s41_s18 }
   0x8   :  { %p6616_p3 = scmp.ne.s32.totalorder %s41_s18, %s6615_s26  ;;  %p6621_p5 = scmp.lt.s32.totalorder %s6615_s26, %s6615_s26 }
   0xa   :  { %p6622_p6 = por %p6621_p5, %p6620_p4 }
   0xc   :  { %p6623_p7 = pnand %p6622_p6, %p6616_p3 }
   0xe   :  { %6626 = shalt.err (!%p6623_p7)
}
   0xf   :  { %s6630_s27 = smov 64   ;;  %s6631_s28 = smov 4  }
  0x10   :  { %46 = dma.hbm_to_vmem [thread:$0]  %s7636_s9, 9472, %s41_s18, [#allocation3], %s6630_s27, %s6630_s27, %s6631_s28  }
  0x11   :  { %6627 = dma.done.wait [#allocation3], 9472  }
  0x12   :  { %6628 = vsyncadd [#allocation3], 4294957824  ;;  %v6632_v0 = vmov 0   ;;  %v79_v1 = vld [vmem:[%s7627_s0] sm:$0xff]  ;;  %v94_v3 = vld [vmem:[%s7634_s7 + $0x8] sm:$0xff]  ;;  %v6633_v6 = vmov 0.0   ;;  %v53_v12 = vlaneseq }
  0x13   :  { %6293 = vset.pattern.permute.xlu0 %v6632_v0  ;;  %6294 = vset.pattern.permute.xlu1 %v6632_v0  ;;  %v93_v2 = vld [vmem:[%s7634_s7] sm:$0xff]  ;;  %v95_v4 = vld [vmem:[%s7634_s7 + $0x10] sm:$0xff]  ;;  %v96_v5 = vld [vmem:[%s7634_s7 + $0x18] sm:$0xff]  ;;  %vm100_vm0 = vcmask 326656   ;;  %vm6634_vm3 = vmmov 0   ;;  %vm206_vm4 = vcmask 261120  }
  0x14   :  { %82 = vperm.xlu0 %6293, %v79_v1   ;;  %5720 = vmatprep.subr.bf16.mxu1 %v6633_v6  ;;  %v80_v7 = vld [vmem:[%s7627_s0 + $0x8] sm:$0xff]  ;;  %v6207_v8 = vpack.c.bf16 %v94_v3, %v93_v2  ;;  %v6211_v9 = vpack.c.bf16 %v96_v5, %v95_v4  ;;  %v97_v10 = vld [vmem:[%s7634_s7 + $0x20] sm:$0xff]  ;;  %v6731_v13 = vand.u32 127, %v53_v12  ;;  %v6299_v27 = vld [vmem:[#allocation2 + $0x10] sm:$0xff]  }
  0x15   :  { %v6295_v11 = vld [vmem:[#allocation2] sm:$0xff]   ;;  %v6297_v19 = vld [vmem:[#allocation2 + $0x8] sm:$0xff]   ;;  %5724 = vmatprep.mubr.msk.bf16.mxu1 %vm6634_vm3, %v6633_v6  ;;  %v6300_v29 = vld [vmem:[#allocation2 + $0x18] sm:$0xff]  }
  0x16   :  { %6208 = vmatprep.subr.bf16.mxu0 %v6207_v8  ;;  %5721 = vmatpush3.bf16.msra.mxu1 %v6295_v11  ;;  %v6296_v17 = vld [vmem:[#allocation2 + $0x20] sm:$0xff]   ;;  %v6298_v20 = vld [vmem:[#allocation2 + $0x28] sm:$0xff]   ;;  %vm56_vm5 = vcmp.lt.s32.totalorder %v6731_v13, 8  ;;  %vm60_vm6 = vcmp.ge.s32.totalorder %v6731_v13, 8  ;;  %vm61_vm7 = vcmp.lt.s32.totalorder %v6731_v13, 16  ;;  %vm6784_vm9 = vmpackc.low %vm206_vm4, %vm206_vm4  ;;  %vm65_vm10 = vcmp.ge.s32.totalorder %v6731_v13, 16 }
  0x17   :  { %6210 = vmatpush3.bf16.msra.mxu0 %v6207_v8  ;;  %5722 = vmatprep.subr.bf16.mxu1 %v6633_v6  ;;  %v99_v21 = vld [vmem:[%s7629_s2 + $0x8] sm:$0xff]  ;;  %v98_v22 = vld [vmem:[%s7629_s2] sm:$0xff]  ;;  %v6763_v30 = vsel %vm56_vm5, 1.0, %v6633_v6  ;;  %vm62_vm8 = vmand %vm60_vm6, %vm61_vm7  ;;  %vm66_vm11 = vcmp.lt.s32.totalorder %v6731_v13, 24  ;;  %vm70_vm13 = vcmp.ge.s32.totalorder %v6731_v13, 24  ;;  %vm71_vm14 = vcmp.lt.s32.totalorder %v6731_v13, 32 }
  0x18   :  { %85 = vperm.xlu0 %6293, %v80_v7   ;;  %6212 = vmatprep.subr.bf16.mxu0 %v6211_v9  ;;  %v5193_v31 = vld [vmem:[%s7637_s10] ss:$0 sm:$0xff]  ;;  %v6769_v32 = vmul.f32 0.35355338, %v6763_v30  ;;  %v5201_v34 = vld [vmem:[%s7637_s10 + $0x2] ss:$0 sm:$0xff]  ;;  %vm67_vm12 = vmand %vm65_vm10, %vm66_vm11 }
  0x19   :  { %v5197_v47 = vld [vmem:[%s7637_s10 + $0x1] ss:$0 sm:$0xff]  ;;  %v6793_v56 = vsel %vm62_vm8, 1.0, %v6633_v6  ;;  %v6804_v59 = vsel %vm67_vm12, 1.0, %v6633_v6  ;;  %vm72_vm15 = vmand %vm70_vm13, %vm71_vm14  ;;  %v6834_v7 = vld [vmem:[%s7631_s4 + $0x8] sm:$0xff]  ;;  %vm1942_vm5 = vcmask 392192  }
  0x1a   :  { %5723 = vmatpush3.bf16.msra.mxu1 %v6297_v19  ;;  %v6801_v58 = vmul.f32 0.35355338, %v6793_v56  ;;  %v6809_v62 = vmul.f32 0.35355338, %v6804_v59  ;;  %v6813_v63 = vsel %vm72_vm15, 1.0, %v6633_v6  ;;  %v6356_v54 = vld [vmem:[#allocation2 + $0x1d8] sm:$0xff]  }
  0x1b   :  { %6214 = vmatpush3.bf16.msra.mxu0 %v6211_v9  ;;  %5728 = vmatprep.subr.bf16.mxu1 %v6633_v6  ;;  %v6819_v2 = vmul.f32 0.35355338, %v6813_v63  ;;  %v6839_v9 = vld [vmem:[%s7631_s4] sm:$0xff] }
  0x1c   :  { %5715 = vmatprep.subr.mxu0 %v97_v10 }
  0x1f   :  { %5716 = vmatpush3.msra.mxu0 %v97_v10 }
  0x20   :  { %5736 = vmatprep.subr.bf16.mxu0 %v6633_v6 }
  0x93   :  { %v83_v14 = vpop.permute.xlu0 %82 }
  0x94   :  { %vm87_vm1 = vcmp.eq.s32.totalorder %v6731_v13, %v83_v14 }
  0x95   :  { %v5189_v15 = vsel %vm87_vm1, 1.0, %v6633_v6  ;;  %vm967_vm1 = vcmask 523264  }
  0x96   :  { %5717 = vmatprep.mubr.msk.f32.mxu0 %vm100_vm0, %v5189_v15 }
  0x97   :  { %v86_v16 = vpop.permute.xlu0 %85 }
  0x98   :  { %vm88_vm2 = vcmp.eq.s32.totalorder %v6731_v13, %v86_v16 }
  0x99   :  { %v5190_v18 = vsel %vm88_vm2, 1.0, %v6633_v6 }
  0x9a   :  { %5718 = vmatmul.mubr.msk.f32.vlgmr.msra.gmra.mrb[0].mxu0 %vm100_vm0, %v5190_v18  ;;  %vm518_vm0 = vcmask 130048  }
  0x9b   :  { %5737 = vmatpush3.bf16.msra.mxu0 %v6296_v17  ;;  %5740 = vmatprep.mubr.msk.bf16.mxu0 %vm6634_vm3, %v6633_v6 }
  0x9c   :  { %5738 = vmatprep.subr.bf16.mxu0 %v6633_v6 }
  0x9f   :  { %5739 = vmatpush3.bf16.msra.mxu0 %v6298_v20 }
 0x16d   :  { %v5719_v23 = vpop.f32.mrb[0].mxu0 }
 0x16e   :  { %v6749_v24 = vadd.f32 %v5719_v23, %v99_v21  ;;  %v173_v25 = vpop.f32.mrb[1].mxu0 }
 0x16f   :  { %v6751_v26 = vadd.f32 %v173_v25, %v98_v22 }
 0x171   :  { %v188_v28 = vpack.c.bf16 %v6749_v24, %v6751_v26 }
 0x173   :  { %5725 = vmatmul.mubr.msk.bf16.vlgmr.msra.gmra.mrb[0].mxu1 %vm206_vm4, %v188_v28  ;;  %5741 = vmatmul.mubr.msk.bf16.vlgmr.msra.gmra.mrb[4].mxu0 %vm206_vm4, %v188_v28 }
 0x174   :  { %5729 = vmatpush3.bf16.msra.mxu1 %v6299_v27  ;;  %5732 = vmatprep.mubr.msk.bf16.mxu1 %vm6634_vm3, %v6633_v6 }
 0x175   :  { %5730 = vmatprep.subr.bf16.mxu1 %v6633_v6 }
 0x178   :  { %5731 = vmatpush3.bf16.msra.mxu1 %v6300_v29 }
 0x17b   :  { %5733 = vmatmul.mubr.msk.bf16.vlgmr.msra.gmra.mrb[4].mxu1 %vm206_vm4, %v188_v28 }
 0x246   :  { %v244_v33 = vpop.f32.mrb[0].mxu1  ;;  %v368_v35 = vpop.f32.mrb[4].mxu0 }
 0x247   :  { %v245_v36 = vadd.f32 %v5193_v31, %v244_v33  ;;  %v5726_v37 = vpop.f32.mrb[1].mxu1  ;;  %v5742_v38 = vpop.f32.mrb[5].mxu0  ;;  %v369_v41 = vadd.f32 %v5201_v34, %v368_v35 }
 0x248   :  { %v247_v39 = vpop.f32.mrb[2].mxu1  ;;  %v371_v40 = vpop.f32.mrb[6].mxu0 }
 0x249   :  { %v372_v42 = vadd.f32 %v5201_v34, %v371_v40  ;;  %v5727_v43 = vpop.f32.mrb[3].mxu1  ;;  %v5743_v44 = vpop.f32.mrb[7].mxu0  ;;  %v375_v45 = vmul.f32 %v245_v36, %v6769_v32  ;;  %v248_v57 = vadd.f32 %v5193_v31, %v247_v39  ;;  %v377_v61 = vmul.f32 %v245_v36, %v6801_v58 }
 0x24a   :  { %v379_v1 = vmul.f32 %v245_v36, %v6809_v62  ;;  %v381_v4 = vmul.f32 %v245_v36, %v6819_v2 }
 0x24b   :  { %v6221_v46 = vpack.c.bf16 %v372_v42, %v369_v41  ;;  %5748 = vmatprep.mubr.msk.f32.mxu1 %vm206_vm4, %v375_v45  ;;  %v376_v60 = vmul.f32 %v248_v57, %v6769_v32  ;;  %v378_v0 = vmul.f32 %v248_v57, %v6801_v58  ;;  %v380_v3 = vmul.f32 %v248_v57, %v6809_v62 }
 0x24c   :  { %v382_v5 = vmul.f32 %v248_v57, %v6819_v2 }
 0x24d   :  { %6222 = vmatprep.subr.bf16.mxu0 %v6221_v46 }
 0x24e   :  { %v306_v48 = vpop.f32.mrb[4].mxu1  ;;  %6224 = vmatpush3.bf16.msra.mxu0 %v6221_v46 }
 0x24f   :  { %v5734_v49 = vpop.f32.mrb[5].mxu1  ;;  %5784 = vmatprep.subr.bf16.mxu0 %v6633_v6  ;;  %v307_v51 = vadd.f32 %v5197_v47, %v306_v48 }
 0x250   :  { %v309_v50 = vpop.f32.mrb[6].mxu1 }
 0x251   :  { %v310_v52 = vadd.f32 %v5197_v47, %v309_v50  ;;  %v5735_v53 = vpop.f32.mrb[7].mxu1 }
 0x253   :  { %v6215_v55 = vpack.c.bf16 %v310_v52, %v307_v51 }
 0x255   :  { %6217 = vmatprep.subr.msk.bf16.mxu1 %vm6784_vm9, %v6215_v55 }
 0x256   :  { %6220 = vmatpush3.bf16.xpose.msk.msra.mxu1 %vm6784_vm9, %v6215_v55 }
 0x257   :  { %5776 = vmatprep.subr.bf16.mxu1 %v6633_v6 }
 0x25d   :  { %5749 = vmatmul.mubr.msk.f32.vlgmr.msra.gmra.mrb[8].mxu1 %vm206_vm4, %v376_v60 }
 0x25e   :  { %5751 = vmatprep.mubr.msk.f32.mxu1 %vm206_vm4, %v377_v61 }
 0x261   :  { %5752 = vmatmul.mubr.msk.f32.gmra.mrb[10].mxu1 %vm206_vm4, %v378_v0 }
 0x262   :  { %5754 = vmatprep.mubr.msk.f32.mxu1 %vm206_vm4, %v379_v1 }
 0x265   :  { %5755 = vmatmul.mubr.msk.f32.gmra.mrb[12].mxu1 %vm206_vm4, %v380_v3 }
 0x266   :  { %5757 = vmatprep.mubr.msk.f32.mxu1 %vm206_vm4, %v381_v4 }
 0x269   :  { %5758 = vmatmul.mubr.msk.f32.gmra.mrb[14].mxu1 %vm206_vm4, %v382_v5 }
 0x26a   :  { %5780 = vmatprep.mubr.msk.bf16.mxu1 %vm6634_vm3, %v6633_v6 }
 0x330   :  { %v5750_v8 = vpop.f32.mrb[8].mxu1 }
 0x331   :  { %v485_v10 = vadd.f32 %v5750_v8, %v6834_v7  ;;  %v479_v11 = vpop.f32.mrb[9].mxu1 }
 0x332   :  { %v480_v12 = vadd.f32 %v479_v11, %v6839_v9 }
 0x333   :  { %v522_v14 = vsel %vm518_vm0, %v485_v10, -inf }
 0x334   :  { %523 = vmax.xlane.f32.xlu1 %v522_v14  ;;  %v5753_v15 = vpop.f32.mrb[10].mxu1  ;;  %v519_v19 = vsel %vm518_vm0, %v480_v12, -inf }
 0x335   :  { %v489_v16 = vpop.f32.mrb[11].mxu1  ;;  %v495_v18 = vadd.f32 %v5753_v15, %v6834_v7 }
 0x336   :  { %v490_v17 = vadd.f32 %v489_v16, %v6839_v9 }
 0x337   :  { %v528_v25 = vsel %vm518_vm0, %v495_v18, -inf }
 0x338   :  { %v5756_v20 = vpop.f32.mrb[12].mxu1  ;;  %520 = vmax.xlane.f32.xlu1 %v519_v19  ;;  %v525_v21 = vsel %vm518_vm0, %v490_v17, -inf }
 0x339   :  { %v499_v22 = vpop.f32.mrb[13].mxu1  ;;  %526 = vmax.xlane.f32.xlu0 %v525_v21  ;;  %v505_v23 = vadd.f32 %v5756_v20, %v6834_v7 }
 0x33a   :  { %v500_v29 = vadd.f32 %v499_v22, %v6839_v9 }
 0x33b   :  { %v534_v31 = vsel %vm518_vm0, %v505_v23, -inf }
 0x33c   :  { %v5759_v27 = vpop.f32.mrb[14].mxu1  ;;  %529 = vmax.xlane.f32.xlu1 %v528_v25  ;;  %v531_v34 = vsel %vm518_vm0, %v500_v29, -inf }
 0x33d   :  { %v509_v28 = vpop.f32.mrb[15].mxu1  ;;  %v515_v35 = vadd.f32 %v5759_v27, %v6834_v7 }
 0x33e   :  { %v510_v33 = vadd.f32 %v509_v28, %v6839_v9 }
 0x33f   :  { %v540_v37 = vsel %vm518_vm0, %v515_v35, -inf }
 0x340   :  { %535 = vmax.xlane.f32.xlu1 %v534_v31  ;;  %v537_v36 = vsel %vm518_vm0, %v510_v33, -inf }
 0x344   :  { %532 = vmax.xlane.f32.xlu1 %v531_v34 }
 0x348   :  { %538 = vmax.xlane.f32.xlu1 %v537_v36 }
 0x34c   :  { %541 = vmax.xlane.f32.xlu1 %v540_v37 }
 0x3c1   :  { %v524_v38 = vpop.xlane.xlu1 %523 }
 0x3c2   :  { %v544_v39 = vsub.f32 %v485_v10, %v524_v38 }
 0x3c4   :  { %v553_v40 = vmul.f32 1.442695, %v544_v39 }
 0x3c5   :  { %v521_v41 = vpop.xlane.xlu1 %520 }
 0x3c6   :  { %6369 = vpow2.f32 %v553_v40  ;;  %v543_v42 = vsub.f32 %v480_v12, %v521_v41  ;;  %v527_v43 = vpop.xlane.xlu0 %526 }
 0x3c7   :  { %v545_v44 = vsub.f32 %v490_v17, %v527_v43 }
 0x3c8   :  { %v551_v45 = vmul.f32 1.442695, %v543_v42 }
 0x3c9   :  { %v555_v46 = vmul.f32 1.442695, %v545_v44  ;;  %v530_v47 = vpop.xlane.xlu1 %529 }
 0x3ca   :  { %6371 = vpow2.f32 %v551_v45  ;;  %v546_v48 = vsub.f32 %v495_v18, %v530_v47 }
 0x3cb   :  { %6373 = vpow2.f32 %v555_v46 }
 0x3cc   :  { %v557_v49 = vmul.f32 1.442695, %v546_v48 }
 0x3cd   :  { %v536_v50 = vpop.xlane.xlu1 %535 }
 0x3ce   :  { %6375 = vpow2.f32 %v557_v49  ;;  %v548_v51 = vsub.f32 %v505_v23, %v536_v50 }
 0x3d0   :  { %v6370_v52 = vpop.eup %6369  ;;  %v561_v53 = vmul.f32 1.442695, %v548_v51 }
 0x3d1   :  { %v533_v55 = vpop.xlane.xlu1 %532  ;;  %v570_v57 = vsel %vm518_vm0, %v6370_v52, 0.0 }
 0x3d2   :  { %6377 = vpow2.f32 %v561_v53  ;;  %v547_v60 = vsub.f32 %v500_v29, %v533_v55  ;;  %571 = vadd.xlane.f32.xlu1 %v570_v57  ;;  %v6301_v53 = vld [vmem:[#allocation2 + $0x30] sm:$0xff]   ;;  %v6302_v55 = vld [vmem:[#allocation2 + $0x38] sm:$0xff]  }
 0x3d3   :  { %5777 = vmatpush3.bf16.msra.mxu1 %v6301_v53 }
 0x3d4   :  { %v6372_v61 = vpop.eup %6371  ;;  %v559_v0 = vmul.f32 1.442695, %v547_v60  ;;  %5778 = vmatprep.subr.bf16.mxu1 %v6633_v6 }
 0x3d5   :  { %v539_v1 = vpop.xlane.xlu1 %538  ;;  %v567_v3 = vsel %vm518_vm0, %v6372_v61, 0.0  ;;  %v6374_v4 = vpop.eup %6373 }
 0x3d6   :  { %6379 = vpow2.f32 %v559_v0  ;;  %v549_v5 = vsub.f32 %v510_v33, %v539_v1  ;;  %568 = vadd.xlane.f32.xlu1 %v567_v3  ;;  %v573_v12 = vsel %vm518_vm0, %v6374_v4, 0.0 }
 0x3d7   :  { %5779 = vmatpush3.bf16.msra.mxu1 %v6302_v55 }
 0x3d8   :  { %v6376_v8 = vpop.eup %6375  ;;  %v563_v10 = vmul.f32 1.442695, %v549_v5  ;;  %5792 = vmatprep.subr.bf16.mxu1 %v6633_v6 }
 0x3d9   :  { %v542_v11 = vpop.xlane.xlu1 %541  ;;  %v576_v14 = vsel %vm518_vm0, %v6376_v8, 0.0 }
 0x3da   :  { %6381 = vpow2.f32 %v563_v10  ;;  %v550_v15 = vsub.f32 %v515_v35, %v542_v11  ;;  %574 = vadd.xlane.f32.xlu1 %v573_v12  ;;  %577 = vadd.xlane.f32.xlu0 %v576_v14 }
 0x3dc   :  { %v6378_v16 = vpop.eup %6377  ;;  %v565_v17 = vmul.f32 1.442695, %v550_v15 }
 0x3dd   :  { %v582_v18 = vsel %vm518_vm0, %v6378_v16, 0.0 }
 0x3de   :  { %6383 = vpow2.f32 %v565_v17  ;;  %583 = vadd.xlane.f32.xlu0 %v582_v18 }
 0x3e0   :  { %v6380_v19 = vpop.eup %6379 }
 0x3e1   :  { %v579_v20 = vsel %vm518_vm0, %v6380_v19, 0.0 }
 0x3e2   :  { %580 = vadd.xlane.f32.xlu1 %v579_v20 }
 0x3e4   :  { %v6382_v21 = vpop.eup %6381 }
 0x3e5   :  { %v585_v22 = vsel %vm518_vm0, %v6382_v21, 0.0 }
 0x3e6   :  { %586 = vadd.xlane.f32.xlu1 %v585_v22 }
 0x3e8   :  { %v6384_v23 = vpop.eup %6383 }
 0x3e9   :  { %v588_v25 = vsel %vm518_vm0, %v6384_v23, 0.0 }
 0x3ea   :  { %589 = vadd.xlane.f32.xlu0 %v588_v25 }
 0x45f   :  { %v572_v27 = vpop.xlane.xlu1 %571 }
 0x460   :  { %6385 = vrcp.f32 %v572_v27  ;;  %v5223_v27 = vld [vmem:[%s7637_s10 + $0x3] ss:$0 sm:$0xff] }
 0x463   :  { %v569_v28 = vpop.xlane.xlu1 %568 }
 0x464   :  { %6387 = vrcp.f32 %v569_v28 }
 0x467   :  { %v578_v29 = vpop.xlane.xlu0 %577  ;;  %v575_v31 = vpop.xlane.xlu1 %574 }
 0x468   :  { %6389 = vrcp.f32 %v578_v29 }
 0x469   :  { %6391 = vrcp.f32 %v575_v31 }
 0x46a   :  { %v6386_v34 = vpop.eup %6385 }
 0x46b   :  { %v584_v33 = vpop.xlane.xlu0 %583  ;;  %v600_v38 = vmul.f32 %v6386_v34, %v6370_v52 }
 0x46c   :  { %6393 = vrcp.f32 %v584_v33 }
 0x46e   :  { %v6388_v35 = vpop.eup %6387 }
 0x46f   :  { %v581_v36 = vpop.xlane.xlu1 %580  ;;  %v599_v37 = vmul.f32 %v6388_v35, %v6372_v61 }
 0x470   :  { %6395 = vrcp.f32 %v581_v36 }
 0x471   :  { %5764 = vmatprep.mubr.msk.f32.mxu0 %vm518_vm0, %v599_v37 }
 0x472   :  { %v6390_v39 = vpop.eup %6389  ;;  %5765 = vmatmul.mubr.msk.f32.vlgmr.msra.gmra.mrb[2].mxu0 %vm518_vm0, %v600_v38 }
 0x473   :  { %v6392_v40 = vpop.eup %6391  ;;  %v587_v41 = vpop.xlane.xlu1 %586  ;;  %v602_v42 = vmul.f32 %v6390_v39, %v6376_v8 }
 0x474   :  { %6397 = vrcp.f32 %v587_v41  ;;  %v601_v43 = vmul.f32 %v6392_v40, %v6374_v4 }
 0x476   :  { %5767 = vmatprep.mubr.msk.f32.mxu0 %vm518_vm0, %v601_v43  ;;  %v6394_v45 = vpop.eup %6393 }
 0x477   :  { %5768 = vmatmul.mubr.msk.f32.gmra.mrb[8].mxu0 %vm518_vm0, %v602_v42  ;;  %v590_v44 = vpop.xlane.xlu0 %589  ;;  %v604_v48 = vmul.f32 %v6394_v45, %v6378_v16 }
 0x478   :  { %6399 = vrcp.f32 %v590_v44 }
 0x47a   :  { %v6396_v46 = vpop.eup %6395 }
 0x47b   :  { %v603_v47 = vmul.f32 %v6396_v46, %v6380_v19 }
 0x47d   :  { %5770 = vmatprep.mubr.msk.f32.mxu0 %vm518_vm0, %v603_v47 }
 0x47e   :  { %v6398_v49 = vpop.eup %6397  ;;  %5771 = vmatmul.mubr.msk.f32.gmra.mrb[10].mxu0 %vm518_vm0, %v604_v48 }
 0x47f   :  { %v605_v50 = vmul.f32 %v6398_v49, %v6382_v21  ;;  %v6303_v49 = vld [vmem:[#allocation2 + $0x40] sm:$0xff]  }
 0x480   :  { %5785 = vmatpush3.bf16.msra.mxu0 %v6303_v49 }
 0x481   :  { %5773 = vmatprep.mubr.msk.f32.mxu0 %vm518_vm0, %v605_v50  ;;  %5786 = vmatprep.subr.bf16.mxu0 %v6633_v6  ;;  %v6305_v50 = vld [vmem:[#allocation2 + $0x50] sm:$0xff]  }
 0x482   :  { %v6400_v51 = vpop.eup %6399 }
 0x483   :  { %v606_v52 = vmul.f32 %v6400_v51, %v6384_v23  ;;  %v6306_v51 = vld [vmem:[#allocation2 + $0x58] sm:$0xff]  }
 0x485   :  { %5774 = vmatmul.mubr.msk.f32.gmra.mrb[12].mxu0 %vm518_vm0, %v606_v52 }
 0x486   :  { %5788 = vmatprep.mubr.msk.bf16.mxu0 %vm6634_vm3, %v6633_v6 }
 0x545   :  { %v5766_v57 = vpop.f32.mrb[2].mxu0 }
 0x546   :  { %v697_v60 = vpop.f32.mrb[3].mxu0  ;;  %v737_v0 = vmul.f32 %v5766_v57, %v6763_v30 }
 0x547   :  { %v736_v4 = vmul.f32 %v6763_v30, %v697_v60 }
 0x54a   :  { %v5769_v61 = vpop.f32.mrb[8].mxu0 }
 0x54b   :  { %v741_v1 = vmul.f32 %v5769_v61, %v6793_v56  ;;  %v707_v3 = vpop.f32.mrb[9].mxu0 }
 0x54c   :  { %v740_v5 = vmul.f32 %v6793_v56, %v707_v3 }
 0x54d   :  { %v743_v8 = vadd.f32 %v741_v1, %v737_v0  ;;  %v5227_v1 = vld [vmem:[%s7637_s10 + $0x6] ss:$0 sm:$0xff] }
 0x54e   :  { %v742_v10 = vadd.f32 %v740_v5, %v736_v4 }
 0x551   :  { %v5772_v11 = vpop.f32.mrb[10].mxu0 }
 0x552   :  { %v745_v12 = vmul.f32 %v5772_v11, %v6804_v59  ;;  %v717_v14 = vpop.f32.mrb[11].mxu0 }
 0x553   :  { %v744_v15 = vmul.f32 %v6804_v59, %v717_v14 }
 0x554   :  { %v747_v16 = vadd.f32 %v745_v12, %v743_v8 }
 0x555   :  { %v746_v17 = vadd.f32 %v744_v15, %v742_v10  ;;  %v5228_v10 = vld [vmem:[%s7637_s10 + $0x7] ss:$0 sm:$0xff] }
 0x558   :  { %v5775_v18 = vpop.f32.mrb[12].mxu0 }
 0x559   :  { %v749_v19 = vmul.f32 %v5775_v18, %v6813_v63  ;;  %v727_v20 = vpop.f32.mrb[13].mxu0  ;;  %v5229_v18 = vld [vmem:[%s7637_s10 + $0x4] ss:$0 sm:$0xff] }
 0x55a   :  { %v748_v21 = vmul.f32 %v6813_v63, %v727_v20 }
 0x55b   :  { %v751_v22 = vadd.f32 %v749_v19, %v747_v16  ;;  %v6307_v16 = vld [vmem:[#allocation2 + $0x60] sm:$0xff]  }
 0x55c   :  { %v750_v23 = vadd.f32 %v748_v21, %v746_v17  ;;  %v6308_v17 = vld [vmem:[#allocation2 + $0x68] sm:$0xff]  }
 0x55e   :  { %v756_v25 = vpack.c.bf16 %v751_v22, %v750_v23 }
 0x560   :  { %5781 = vmatmul.mubr.msk.bf16.vlgmr.msra.gmra.mrb[16].mxu1 %vm206_vm4, %v756_v25 }
 0x561   :  { %5800 = vmatprep.mubr.msk.bf16.mxu1 %vm6634_vm3, %v6633_v6  ;;  %5793 = vmatpush3.bf16.msra.mxu1 %v6305_v50 }
 0x562   :  { %5794 = vmatprep.subr.bf16.mxu1 %v6633_v6 }
 0x565   :  { %5795 = vmatpush3.bf16.msra.mxu1 %v6306_v51  ;;  %v6309_v51 = vld [vmem:[#allocation2 + $0x70] sm:$0xff]  }
 0x566   :  { %5796 = vmatprep.subr.bf16.mxu1 %v6633_v6 }
 0x569   :  { %5797 = vmatpush3.bf16.msra.mxu1 %v6307_v16 }
 0x56a   :  { %5798 = vmatprep.subr.bf16.mxu1 %v6633_v6 }
 0x56d   :  { %5799 = vmatpush3.bf16.msra.mxu1 %v6308_v17 }
 0x56e   :  { %5820 = vmatprep.subr.bf16.mxu1 %v6633_v6 }
 0x633   :  { %v811_v28 = vpop.f32.mrb[16].mxu1 }
 0x634   :  { %v812_v29 = vadd.f32 %v5223_v27, %v811_v28  ;;  %v5782_v31 = vpop.f32.mrb[17].mxu1 }
 0x635   :  { %v814_v33 = vpop.f32.mrb[18].mxu1  ;;  %v5233_v31 = vld [vmem:[%s7637_s10 + $0x5] ss:$0 sm:$0xff] }
 0x636   :  { %v815_v34 = vadd.f32 %v5223_v27, %v814_v33  ;;  %v5783_v35 = vpop.f32.mrb[19].mxu1  ;;  %v818_v36 = vadd.f32 %v812_v29, %v6751_v26 }
 0x638   :  { %v822_v37 = vsel %vm206_vm4, %v818_v36, 0.0  ;;  %v819_v38 = vadd.f32 %v815_v34, %v6749_v24  ;;  %v6304_v24 = vld [vmem:[#allocation2 + $0x48] sm:$0xff]  }
 0x639   :  { %823 = vadd.xlane.f32.xlu1 %v822_v37  ;;  %5787 = vmatpush3.bf16.msra.mxu0 %v6304_v24 }
 0x63a   :  { %v825_v39 = vsel %vm206_vm4, %v819_v38, 0.0  ;;  %5804 = vmatprep.subr.bf16.mxu0 %v6633_v6 }
 0x63b   :  { %826 = vadd.xlane.f32.xlu0 %v825_v39 }
 0x6c6   :  { %v824_v40 = vpop.xlane.xlu1 %823 }
 0x6c7   :  { %v829_v41 = vmul.f32 0.03125, %v824_v40 }
 0x6c8   :  { %v827_v42 = vpop.xlane.xlu0 %826 }
 0x6c9   :  { %v831_v43 = vsub.f32 %v818_v36, %v829_v41  ;;  %v830_v44 = vmul.f32 0.03125, %v827_v42 }
 0x6cb   :  { %v832_v45 = vsub.f32 %v819_v38, %v830_v44  ;;  %v833_v46 = vmul.f32 %v831_v43, %v831_v43 }
 0x6cd   :  { %v835_v47 = vsel %vm206_vm4, %v833_v46, 0.0  ;;  %v834_v48 = vmul.f32 %v832_v45, %v832_v45 }
 0x6ce   :  { %836 = vadd.xlane.f32.xlu1 %v835_v47 }
 0x6cf   :  { %v838_v26 = vsel %vm206_vm4, %v834_v48, 0.0 }
 0x6d0   :  { %839 = vadd.xlane.f32.xlu0 %v838_v26 }
 0x75b   :  { %v837_v52 = vpop.xlane.xlu1 %836 }
 0x75c   :  { %v841_v53 = vmul.f32 0.03125, %v837_v52  ;;  %v6310_v52 = vld [vmem:[#allocation2 + $0x90] sm:$0xff]  }
 0x75d   :  { %v840_v55 = vpop.xlane.xlu0 %839 }
 0x75e   :  { %v843_v57 = vadd.f32 1e-05, %v841_v53  ;;  %v842_v60 = vmul.f32 0.03125, %v840_v55  ;;  %v6311_v53 = vld [vmem:[#allocation2 + $0x78] sm:$0xff]  }
 0x75f   :  { %v6312_v55 = vld [vmem:[#allocation2 + $0x98] sm:$0xff]  }
 0x760   :  { %6401 = vrsqrt.f32 %v843_v57  ;;  %v844_v61 = vadd.f32 1e-05, %v842_v60 }
 0x762   :  { %6403 = vrsqrt.f32 %v844_v61 }
 0x76a   :  { %v6402_v0 = vpop.eup %6401 }
 0x76b   :  { %v847_v3 = vmul.f32 %v6402_v0, %v831_v43 }
 0x76c   :  { %v6404_v4 = vpop.eup %6403 }
 0x76d   :  { %v853_v5 = vmul.f32 %v5227_v1, %v847_v3  ;;  %v848_v8 = vmul.f32 %v6404_v4, %v832_v45 }
 0x76f   :  { %v854_v11 = vmul.f32 %v5227_v1, %v848_v8  ;;  %v859_v12 = vadd.f32 %v5228_v10, %v853_v5  ;;  %v5239_v5 = vld [vmem:[%s7637_s10 + $0x8] ss:$0 sm:$0xff] }
 0x771   :  { %v860_v14 = vadd.f32 %v5228_v10, %v854_v11 }
 0x773   :  { %v865_v15 = vpack.c.bf16 %v860_v14, %v859_v12 }
 0x775   :  { %5789 = vmatmul.mubr.msk.bf16.vlgmr.msra.gmra.mrb[16].mxu0 %vm206_vm4, %v865_v15 }
 0x776   :  { %5808 = vmatprep.mubr.msk.bf16.mxu0 %vm6634_vm3, %v6633_v6  ;;  %5805 = vmatpush3.bf16.msra.mxu0 %v6309_v51 }
 0x777   :  { %5806 = vmatprep.subr.bf16.mxu0 %v6633_v6 }
 0x77a   :  { %5807 = vmatpush3.bf16.msra.mxu0 %v6311_v53 }
 0x77b   :  { %5812 = vmatprep.subr.bf16.mxu0 %v6633_v6 }
 0x848   :  { %v920_v19 = vpop.f32.mrb[16].mxu0 }
 0x849   :  { %v921_v20 = vadd.f32 %v5229_v18, %v920_v19  ;;  %v5790_v21 = vpop.f32.mrb[17].mxu0 }
 0x84a   :  { %v923_v22 = vpop.f32.mrb[18].mxu0  ;;  %v5241_v21 = vld [vmem:[%s7637_s10 + $0xa] ss:$0 sm:$0xff] }
 0x84b   :  { %v924_v23 = vadd.f32 %v5229_v18, %v923_v22  ;;  %v5791_v25 = vpop.f32.mrb[19].mxu0  ;;  %v927_v27 = vmax.f32 %v921_v20, 0.0  ;;  %v6313_v18 = vld [vmem:[#allocation2 + $0x80] sm:$0xff]   ;;  %v6314_v20 = vld [vmem:[#allocation2 + $0x88] sm:$0xff]  }
 0x84d   :  { %v928_v28 = vmax.f32 %v924_v23, 0.0  ;;  %v5249_v23 = vld [vmem:[%s7637_s10 + $0xc] ss:$0 sm:$0xff] }
 0x84f   :  { %v937_v29 = vpack.c.bf16 %v928_v28, %v927_v27 }
 0x851   :  { %5801 = vmatmul.mubr.msk.bf16.vlgmr.msra.gmra.mrb[20].mxu1 %vm967_vm1, %v937_v29 }
 0x852   :  { %5824 = vmatprep.mubr.msk.bf16.mxu1 %vm6634_vm3, %v6633_v6  ;;  %5821 = vmatpush3.bf16.msra.mxu1 %v6310_v52 }
 0x853   :  { %5822 = vmatprep.subr.bf16.mxu1 %v6633_v6 }
 0x856   :  { %5823 = vmatpush3.bf16.msra.mxu1 %v6312_v55 }
 0x924   :  { %v1005_v33 = vpop.f32.mrb[20].mxu1 }
 0x925   :  { %v1006_v34 = vadd.f32 %v5233_v31, %v1005_v33  ;;  %v5802_v35 = vpop.f32.mrb[21].mxu1 }
 0x926   :  { %v1008_v36 = vpop.f32.mrb[22].mxu1 }
 0x927   :  { %v1009_v37 = vadd.f32 %v5233_v31, %v1008_v36  ;;  %v5803_v38 = vpop.f32.mrb[23].mxu1  ;;  %v1012_v39 = vadd.f32 %v1006_v34, %v859_v12 }
 0x929   :  { %v1016_v40 = vsel %vm206_vm4, %v1012_v39, 0.0  ;;  %v1013_v41 = vadd.f32 %v1009_v37, %v860_v14  ;;  %v5240_v14 = vld [vmem:[%s7637_s10 + $0x9] ss:$0 sm:$0xff] }
 0x92a   :  { %1017 = vadd.xlane.f32.xlu1 %v1016_v40  ;;  %v5245_v40 = vld [vmem:[%s7637_s10 + $0xb] ss:$0 sm:$0xff] }
 0x92b   :  { %v1019_v42 = vsel %vm206_vm4, %v1013_v41, 0.0 }
 0x92c   :  { %1020 = vadd.xlane.f32.xlu0 %v1019_v42 }
 0x9b7   :  { %v1018_v43 = vpop.xlane.xlu1 %1017 }
 0x9b8   :  { %v1022_v44 = vmul.f32 0.03125, %v1018_v43 }
 0x9b9   :  { %v1021_v45 = vpop.xlane.xlu0 %1020 }
 0x9ba   :  { %v1024_v46 = vsub.f32 %v1012_v39, %v1022_v44  ;;  %v1023_v47 = vmul.f32 0.03125, %v1021_v45 }
 0x9bc   :  { %v1025_v48 = vsub.f32 %v1013_v41, %v1023_v47  ;;  %v1026_v26 = vmul.f32 %v1024_v46, %v1024_v46 }
 0x9be   :  { %v1028_v49 = vsel %vm206_vm4, %v1026_v26, 0.0  ;;  %v1027_v24 = vmul.f32 %v1025_v48, %v1025_v48 }
 0x9bf   :  { %1029 = vadd.xlane.f32.xlu1 %v1028_v49 }
 0x9c0   :  { %v1031_v50 = vsel %vm206_vm4, %v1027_v24, 0.0 }
 0x9c1   :  { %1032 = vadd.xlane.f32.xlu0 %v1031_v50 }
 0xa4c   :  { %v1030_v57 = vpop.xlane.xlu1 %1029 }
 0xa4d   :  { %v1034_v60 = vmul.f32 0.03125, %v1030_v57 }
 0xa4e   :  { %v1033_v61 = vpop.xlane.xlu0 %1032 }
 0xa4f   :  { %v1036_v0 = vadd.f32 1e-05, %v1034_v60  ;;  %v1035_v1 = vmul.f32 0.03125, %v1033_v61 }
 0xa51   :  { %6405 = vrsqrt.f32 %v1036_v0  ;;  %v1037_v3 = vadd.f32 1e-05, %v1035_v1 }
 0xa53   :  { %6407 = vrsqrt.f32 %v1037_v3 }
 0xa5b   :  { %v6406_v4 = vpop.eup %6405 }
 0xa5c   :  { %v1040_v8 = vmul.f32 %v6406_v4, %v1024_v46 }
 0xa5d   :  { %v6408_v10 = vpop.eup %6407 }
 0xa5e   :  { %v1046_v11 = vmul.f32 %v5239_v5, %v1040_v8  ;;  %v1041_v12 = vmul.f32 %v6408_v10, %v1025_v48 }
 0xa60   :  { %v1047_v15 = vmul.f32 %v5239_v5, %v1041_v12  ;;  %v6934_v16 = vadd.f32 %v5240_v14, %v1046_v11 }
 0xa62   :  { %v6936_v17 = vadd.f32 %v5240_v14, %v1047_v15 }
 0xa64   :  { %v1058_v19 = vpack.c.bf16 %v6936_v17, %v6934_v16 }
 0xa66   :  { %5809 = vmatmul.mubr.msk.bf16.vlgmr.msra.gmra.mrb[20].mxu0 %vm206_vm4, %v1058_v19  ;;  %5825 = vmatmul.mubr.msk.bf16.vlgmr.msra.gmra.mrb[24].mxu1 %vm206_vm4, %v1058_v19 }
 0xa67   :  { %5813 = vmatpush3.bf16.msra.mxu0 %v6313_v18  ;;  %5816 = vmatprep.mubr.msk.bf16.mxu0 %vm6634_vm3, %v6633_v6 }
 0xa68   :  { %5814 = vmatprep.subr.bf16.mxu0 %v6633_v6 }
 0xa6b   :  { %5815 = vmatpush3.bf16.msra.mxu0 %v6314_v20 }
 0xa6e   :  { %5817 = vmatmul.mubr.msk.bf16.vlgmr.msra.gmra.mrb[24].mxu0 %vm206_vm4, %v1058_v19 }
 0xb39   :  { %v1113_v22 = vpop.f32.mrb[20].mxu0  ;;  %v1237_v25 = vpop.f32.mrb[24].mxu1 }
 0xb3a   :  { %v1114_v27 = vadd.f32 %v5241_v21, %v1113_v22  ;;  %v5810_v28 = vpop.f32.mrb[21].mxu0  ;;  %v5826_v29 = vpop.f32.mrb[25].mxu1  ;;  %v1238_v34 = vadd.f32 %v5249_v23, %v1237_v25 }
 0xb3b   :  { %v1116_v31 = vpop.f32.mrb[22].mxu0  ;;  %v1240_v33 = vpop.f32.mrb[26].mxu1 }
 0xb3c   :  { %v1241_v35 = vadd.f32 %v5249_v23, %v1240_v33  ;;  %v5811_v36 = vpop.f32.mrb[23].mxu0  ;;  %v5827_v37 = vpop.f32.mrb[27].mxu1  ;;  %v1244_v38 = vmul.f32 %v1114_v27, %v6769_v32  ;;  %v1117_v48 = vadd.f32 %v5241_v21, %v1116_v31  ;;  %v1246_v49 = vmul.f32 %v1114_v27, %v6801_v58 }
 0xb3d   :  { %v1248_v50 = vmul.f32 %v1114_v27, %v6809_v62  ;;  %v1250_v52 = vmul.f32 %v1114_v27, %v6819_v2 }
 0xb3e   :  { %v6231_v39 = vpack.c.bf16 %v1241_v35, %v1238_v34  ;;  %5832 = vmatprep.mubr.msk.f32.mxu0 %vm206_vm4, %v1244_v38  ;;  %v1245_v26 = vmul.f32 %v1117_v48, %v6769_v32  ;;  %v1247_v24 = vmul.f32 %v1117_v48, %v6801_v58  ;;  %v1249_v51 = vmul.f32 %v1117_v48, %v6809_v62 }
 0xb3f   :  { %v1251_v53 = vmul.f32 %v1117_v48, %v6819_v2 }
 0xb40   :  { %6232 = vmatprep.subr.bf16.mxu1 %v6231_v39 }
 0xb41   :  { %v1175_v41 = vpop.f32.mrb[24].mxu0  ;;  %6234 = vmatpush3.bf16.msra.mxu1 %v6231_v39 }
 0xb42   :  { %v5818_v42 = vpop.f32.mrb[25].mxu0  ;;  %5868 = vmatprep.subr.bf16.mxu1 %v6633_v6  ;;  %v1176_v44 = vadd.f32 %v5245_v40, %v1175_v41 }
 0xb43   :  { %v1178_v43 = vpop.f32.mrb[26].mxu0 }
 0xb44   :  { %v1179_v45 = vadd.f32 %v5245_v40, %v1178_v43  ;;  %v5819_v46 = vpop.f32.mrb[27].mxu0 }
 0xb46   :  { %v6225_v47 = vpack.c.bf16 %v1179_v45, %v1176_v44 }
 0xb48   :  { %6227 = vmatprep.subr.msk.bf16.mxu0 %vm6784_vm9, %v6225_v47 }
 0xb49   :  { %6230 = vmatpush3.bf16.xpose.msk.msra.mxu0 %vm6784_vm9, %v6225_v47 }
 0xb4a   :  { %5860 = vmatprep.subr.bf16.mxu0 %v6633_v6 }
 0xb50   :  { %5833 = vmatmul.mubr.msk.f32.vlgmr.msra.gmra.mrb[14].mxu0 %vm206_vm4, %v1245_v26 }
 0xb51   :  { %5835 = vmatprep.mubr.msk.f32.mxu0 %vm206_vm4, %v1246_v49 }
 0xb54   :  { %5836 = vmatmul.mubr.msk.f32.gmra.mrb[28].mxu0 %vm206_vm4, %v1247_v24 }
 0xb55   :  { %5838 = vmatprep.mubr.msk.f32.mxu0 %vm206_vm4, %v1248_v50 }
 0xb58   :  { %5839 = vmatmul.mubr.msk.f32.gmra.mrb[30].mxu0 %vm206_vm4, %v1249_v51 }
 0xb59   :  { %5841 = vmatprep.mubr.msk.f32.mxu0 %vm206_vm4, %v1250_v52 }
 0xb5c   :  { %5842 = vmatmul.mubr.msk.f32.gmra.mrb[32].mxu0 %vm206_vm4, %v1251_v53 }
 0xb5d   :  { %5864 = vmatprep.mubr.msk.bf16.mxu0 %vm6634_vm3, %v6633_v6 }
 0xc23   :  { %v5834_v55 = vpop.f32.mrb[14].mxu0 }
 0xc24   :  { %v1354_v57 = vadd.f32 %v5834_v55, %v6834_v7  ;;  %v1348_v60 = vpop.f32.mrb[15].mxu0 }
 0xc25   :  { %v1349_v61 = vadd.f32 %v1348_v60, %v6839_v9 }
 0xc26   :  { %v1390_v0 = vsel %vm518_vm0, %v1354_v57, -inf }
 0xc27   :  { %1391 = vmax.xlane.f32.xlu0 %v1390_v0  ;;  %v5837_v1 = vpop.f32.mrb[28].mxu0  ;;  %v1387_v3 = vsel %vm518_vm0, %v1349_v61, -inf }
 0xc28   :  { %v1364_v4 = vadd.f32 %v5837_v1, %v6834_v7  ;;  %v1358_v5 = vpop.f32.mrb[29].mxu0  ;;  %1388 = vmax.xlane.f32.xlu1 %v1387_v3 }
 0xc29   :  { %v1359_v8 = vadd.f32 %v1358_v5, %v6839_v9 }
 0xc2a   :  { %v1396_v10 = vsel %vm518_vm0, %v1364_v4, -inf }
 0xc2b   :  { %1397 = vmax.xlane.f32.xlu0 %v1396_v10  ;;  %v5840_v11 = vpop.f32.mrb[30].mxu0  ;;  %v1393_v12 = vsel %vm518_vm0, %v1359_v8, -inf }
 0xc2c   :  { %v1374_v14 = vadd.f32 %v5840_v11, %v6834_v7  ;;  %v1368_v15 = vpop.f32.mrb[31].mxu0  ;;  %1394 = vmax.xlane.f32.xlu1 %v1393_v12 }
 0xc2d   :  { %v1369_v18 = vadd.f32 %v1368_v15, %v6839_v9 }
 0xc2e   :  { %v1402_v19 = vsel %vm518_vm0, %v1374_v14, -inf }
 0xc2f   :  { %1403 = vmax.xlane.f32.xlu0 %v1402_v19  ;;  %v5843_v20 = vpop.f32.mrb[32].mxu0  ;;  %v1399_v21 = vsel %vm518_vm0, %v1369_v18, -inf }
 0xc30   :  { %v1384_v22 = vadd.f32 %v5843_v20, %v6834_v7  ;;  %v1378_v23 = vpop.f32.mrb[33].mxu0  ;;  %1400 = vmax.xlane.f32.xlu1 %v1399_v21 }
 0xc31   :  { %v1379_v25 = vadd.f32 %v1378_v23, %v6839_v9 }
 0xc32   :  { %v1408_v27 = vsel %vm518_vm0, %v1384_v22, -inf }
 0xc33   :  { %1409 = vmax.xlane.f32.xlu0 %v1408_v27  ;;  %v1405_v28 = vsel %vm518_vm0, %v1379_v25, -inf }
 0xc34   :  { %1406 = vmax.xlane.f32.xlu1 %v1405_v28 }
 0xcb4   :  { %v1392_v29 = vpop.xlane.xlu0 %1391 }
 0xcb5   :  { %v1412_v31 = vsub.f32 %v1354_v57, %v1392_v29  ;;  %v1389_v33 = vpop.xlane.xlu1 %1388 }
 0xcb6   :  { %v1411_v34 = vsub.f32 %v1349_v61, %v1389_v33 }
 0xcb7   :  { %v1421_v35 = vmul.f32 1.442695, %v1412_v31 }
 0xcb8   :  { %v1419_v36 = vmul.f32 1.442695, %v1411_v34  ;;  %v1398_v37 = vpop.xlane.xlu0 %1397 }
 0xcb9   :  { %6409 = vpow2.f32 %v1421_v35  ;;  %v1414_v38 = vsub.f32 %v1364_v4, %v1398_v37  ;;  %v1395_v7 = vpop.xlane.xlu1 %1394 }
 0xcba   :  { %6411 = vpow2.f32 %v1419_v36  ;;  %v1413_v39 = vsub.f32 %v1359_v8, %v1395_v7 }
 0xcbb   :  { %v1425_v40 = vmul.f32 1.442695, %v1414_v38 }
 0xcbc   :  { %v1423_v9 = vmul.f32 1.442695, %v1413_v39  ;;  %v1404_v41 = vpop.xlane.xlu0 %1403 }
 0xcbd   :  { %6413 = vpow2.f32 %v1425_v40  ;;  %v1416_v42 = vsub.f32 %v1374_v14, %v1404_v41  ;;  %v1401_v43 = vpop.xlane.xlu1 %1400 }
 0xcbe   :  { %6415 = vpow2.f32 %v1423_v9  ;;  %v1415_v44 = vsub.f32 %v1369_v18, %v1401_v43  ;;  %v6316_v43 = vld [vmem:[#allocation2 + $0xa8] sm:$0xff]  }
 0xcbf   :  { %v1429_v45 = vmul.f32 1.442695, %v1416_v42  ;;  %v6315_v42 = vld [vmem:[#allocation2 + $0xa0] sm:$0xff]  }
 0xcc0   :  { %v1427_v46 = vmul.f32 1.442695, %v1415_v44  ;;  %v1410_v47 = vpop.xlane.xlu0 %1409  ;;  %5861 = vmatpush3.bf16.msra.mxu0 %v6315_v42  ;;  %v6319_v42 = vld [vmem:[#allocation2 + $0xc0] sm:$0xff]  }
 0xcc1   :  { %6417 = vpow2.f32 %v1429_v45  ;;  %v1418_v48 = vsub.f32 %v1384_v22, %v1410_v47  ;;  %v1407_v26 = vpop.xlane.xlu1 %1406  ;;  %5862 = vmatprep.subr.bf16.mxu0 %v6633_v6 }
 0xcc2   :  { %6419 = vpow2.f32 %v1427_v46  ;;  %v1417_v49 = vsub.f32 %v1379_v25, %v1407_v26 }
 0xcc3   :  { %v6410_v24 = vpop.eup %6409  ;;  %v1433_v50 = vmul.f32 1.442695, %v1418_v48 }
 0xcc4   :  { %v6412_v51 = vpop.eup %6411  ;;  %v1431_v52 = vmul.f32 1.442695, %v1417_v49  ;;  %v1438_v53 = vsel %vm518_vm0, %v6410_v24, 0.0  ;;  %5863 = vmatpush3.bf16.msra.mxu0 %v6316_v43  ;;  %v6320_v43 = vld [vmem:[#allocation2 + $0xc8] sm:$0xff]  }
 0xcc5   :  { %6421 = vpow2.f32 %v1433_v50  ;;  %1439 = vadd.xlane.f32.xlu0 %v1438_v53  ;;  %v1435_v55 = vsel %vm518_vm0, %v6412_v51, 0.0  ;;  %5876 = vmatprep.subr.bf16.mxu0 %v6633_v6 }
 0xcc6   :  { %6423 = vpow2.f32 %v1431_v52  ;;  %1436 = vadd.xlane.f32.xlu1 %v1435_v55 }
 0xcc7   :  { %v6414_v57 = vpop.eup %6413 }
 0xcc8   :  { %v6416_v60 = vpop.eup %6415  ;;  %v1444_v61 = vsel %vm518_vm0, %v6414_v57, 0.0 }
 0xcc9   :  { %1445 = vadd.xlane.f32.xlu0 %v1444_v61  ;;  %v1441_v0 = vsel %vm518_vm0, %v6416_v60, 0.0 }
 0xcca   :  { %1442 = vadd.xlane.f32.xlu1 %v1441_v0 }
 0xccb   :  { %v6418_v1 = vpop.eup %6417 }
 0xccc   :  { %v6420_v3 = vpop.eup %6419  ;;  %v1450_v4 = vsel %vm518_vm0, %v6418_v1, 0.0 }
 0xccd   :  { %1451 = vadd.xlane.f32.xlu0 %v1450_v4  ;;  %v1447_v5 = vsel %vm518_vm0, %v6420_v3, 0.0 }
 0xcce   :  { %1448 = vadd.xlane.f32.xlu1 %v1447_v5 }
 0xccf   :  { %v6422_v8 = vpop.eup %6421 }
 0xcd0   :  { %v6424_v10 = vpop.eup %6423  ;;  %v1456_v11 = vsel %vm518_vm0, %v6422_v8, 0.0 }
 0xcd1   :  { %1457 = vadd.xlane.f32.xlu0 %v1456_v11  ;;  %v1453_v12 = vsel %vm518_vm0, %v6424_v10, 0.0  ;;  %v5271_v11 = vld [vmem:[%s7637_s10 + $0xd] ss:$0 sm:$0xff] }
 0xcd2   :  { %1454 = vadd.xlane.f32.xlu1 %v1453_v12 }
 0xd52   :  { %v1440_v14 = vpop.xlane.xlu0 %1439 }
 0xd53   :  { %6425 = vrcp.f32 %v1440_v14  ;;  %v1437_v15 = vpop.xlane.xlu1 %1436 }
 0xd54   :  { %6427 = vrcp.f32 %v1437_v15 }
 0xd56   :  { %v1446_v18 = vpop.xlane.xlu0 %1445 }
 0xd57   :  { %6429 = vrcp.f32 %v1446_v18  ;;  %v1443_v19 = vpop.xlane.xlu1 %1442 }
 0xd58   :  { %6431 = vrcp.f32 %v1443_v19 }
 0xd5a   :  { %v1452_v20 = vpop.xlane.xlu0 %1451 }
 0xd5b   :  { %6433 = vrcp.f32 %v1452_v20  ;;  %v1449_v21 = vpop.xlane.xlu1 %1448 }
 0xd5c   :  { %6435 = vrcp.f32 %v1449_v21 }
 0xd5d   :  { %v6426_v22 = vpop.eup %6425 }
 0xd5e   :  { %v6428_v23 = vpop.eup %6427  ;;  %v1458_v25 = vpop.xlane.xlu0 %1457  ;;  %v1468_v29 = vmul.f32 %v6426_v22, %v6410_v24 }
 0xd5f   :  { %6437 = vrcp.f32 %v1458_v25  ;;  %v1455_v27 = vpop.xlane.xlu1 %1454  ;;  %v1467_v28 = vmul.f32 %v6428_v23, %v6412_v51 }
 0xd60   :  { %6439 = vrcp.f32 %v1455_v27 }
 0xd61   :  { %v6430_v31 = vpop.eup %6429  ;;  %5848 = vmatprep.mubr.msk.f32.mxu1 %vm518_vm0, %v1467_v28 }
 0xd62   :  { %v6432_v33 = vpop.eup %6431  ;;  %5849 = vmatmul.mubr.msk.f32.vlgmr.msra.gmra.mrb[28].mxu1 %vm518_vm0, %v1468_v29  ;;  %v1470_v35 = vmul.f32 %v6430_v31, %v6414_v57 }
 0xd63   :  { %v1469_v34 = vmul.f32 %v6432_v33, %v6416_v60 }
 0xd65   :  { %v6434_v36 = vpop.eup %6433  ;;  %5851 = vmatprep.mubr.msk.f32.mxu1 %vm518_vm0, %v1469_v34 }
 0xd66   :  { %v6436_v37 = vpop.eup %6435  ;;  %5852 = vmatmul.mubr.msk.f32.gmra.mrb[30].mxu1 %vm518_vm0, %v1470_v35  ;;  %v1472_v7 = vmul.f32 %v6434_v36, %v6418_v1 }
 0xd67   :  { %v1471_v38 = vmul.f32 %v6436_v37, %v6420_v3 }
 0xd69   :  { %v6438_v39 = vpop.eup %6437  ;;  %5854 = vmatprep.mubr.msk.f32.mxu1 %vm518_vm0, %v1471_v38  ;;  %v1921_v38 = vld [vmem:[%s7628_s1 + $0x8] sm:$0xff] }
 0xd6a   :  { %v6440_v40 = vpop.eup %6439  ;;  %5855 = vmatmul.mubr.msk.f32.gmra.mrb[32].mxu1 %vm518_vm0, %v1472_v7  ;;  %v1474_v41 = vmul.f32 %v6438_v39, %v6422_v8  ;;  %v6317_v7 = vld [vmem:[#allocation2 + $0xb0] sm:$0xff]   ;;  %v6318_v39 = vld [vmem:[#allocation2 + $0xb8] sm:$0xff]  }
 0xd6b   :  { %v1473_v9 = vmul.f32 %v6440_v40, %v6424_v10  ;;  %5869 = vmatpush3.bf16.msra.mxu1 %v6317_v7  ;;  %v1934_v40 = vld [vmem:[%s7635_s8] sm:$0xff] }
 0xd6c   :  { %5870 = vmatprep.subr.bf16.mxu1 %v6633_v6 }
 0xd6d   :  { %5857 = vmatprep.mubr.msk.f32.mxu1 %vm518_vm0, %v1473_v9  ;;  %v1935_v9 = vld [vmem:[%s7635_s8 + $0x8] sm:$0xff] }
 0xd6e   :  { %5858 = vmatmul.mubr.msk.f32.gmra.mrb[34].mxu1 %vm518_vm0, %v1474_v41  ;;  %v6235_v41 = vpack.c.bf16 %v1935_v9, %v1934_v40  ;;  %v6327_v40 = vld [vmem:[#allocation2 + $0x100] sm:$0xff]  }
 0xd6f   :  { %5872 = vmatprep.mubr.msk.bf16.mxu1 %vm6634_vm3, %v6633_v6  ;;  %5871 = vmatpush3.bf16.msra.mxu1 %v6318_v39 }
 0xd70   :  { %6236 = vmatprep.subr.bf16.mxu1 %v6235_v41 }
 0xe35   :  { %v5850_v44 = vpop.f32.mrb[28].mxu1 }
 0xe36   :  { %v1565_v45 = vpop.f32.mrb[29].mxu1  ;;  %v1605_v47 = vmul.f32 %v5850_v44, %v6763_v30 }
 0xe37   :  { %v1604_v49 = vmul.f32 %v6763_v30, %v1565_v45 }
 0xe39   :  { %v5853_v46 = vpop.f32.mrb[30].mxu1 }
 0xe3a   :  { %v1609_v48 = vmul.f32 %v5853_v46, %v6793_v56  ;;  %v1575_v26 = vpop.f32.mrb[31].mxu1 }
 0xe3b   :  { %v1608_v24 = vmul.f32 %v6793_v56, %v1575_v26 }
 0xe3c   :  { %v1611_v50 = vadd.f32 %v1609_v48, %v1605_v47 }
 0xe3d   :  { %v1610_v51 = vadd.f32 %v1608_v24, %v1604_v49  ;;  %v5856_v52 = vpop.f32.mrb[32].mxu1  ;;  %v5275_v24 = vld [vmem:[%s7637_s10 + $0x10] ss:$0 sm:$0xff] }
 0xe3e   :  { %v1613_v53 = vmul.f32 %v5856_v52, %v6804_v59  ;;  %v1585_v55 = vpop.f32.mrb[33].mxu1 }
 0xe3f   :  { %v1612_v57 = vmul.f32 %v6804_v59, %v1585_v55 }
 0xe40   :  { %v1615_v60 = vadd.f32 %v1613_v53, %v1611_v50 }
 0xe41   :  { %v1614_v61 = vadd.f32 %v1612_v57, %v1610_v51  ;;  %v5859_v0 = vpop.f32.mrb[34].mxu1  ;;  %v5276_v57 = vld [vmem:[%s7637_s10 + $0x11] ss:$0 sm:$0xff] }
 0xe42   :  { %v1617_v1 = vmul.f32 %v5859_v0, %v6813_v63  ;;  %v1595_v3 = vpop.f32.mrb[35].mxu1  ;;  %v1937_v0 = vld [vmem:[%s7635_s8 + $0x18] sm:$0xff] }
 0xe43   :  { %v1616_v4 = vmul.f32 %v6813_v63, %v1595_v3 }
 0xe44   :  { %v1619_v5 = vadd.f32 %v1617_v1, %v1615_v60 }
 0xe45   :  { %v1618_v8 = vadd.f32 %v1616_v4, %v1614_v61  ;;  %v1936_v61 = vld [vmem:[%s7635_s8 + $0x10] sm:$0xff] }
 0xe47   :  { %v1624_v10 = vpack.c.bf16 %v1619_v5, %v1618_v8  ;;  %v6239_v5 = vpack.c.bf16 %v1937_v0, %v1936_v61 }
 0xe49   :  { %5865 = vmatmul.mubr.msk.bf16.vlgmr.msra.gmra.mrb[36].mxu0 %vm206_vm4, %v1624_v10  ;;  %v1938_v10 = vld [vmem:[%s7635_s8 + $0x20] sm:$0xff] }
 0xe4a   :  { %5884 = vmatprep.mubr.msk.bf16.mxu0 %vm6634_vm3, %v6633_v6  ;;  %5877 = vmatpush3.bf16.msra.mxu0 %v6319_v42 }
 0xe4b   :  { %5878 = vmatprep.subr.bf16.mxu0 %v6633_v6 }
 0xe4e   :  { %5879 = vmatpush3.bf16.msra.mxu0 %v6320_v43 }
 0xe4f   :  { %5880 = vmatprep.subr.bf16.mxu0 %v6633_v6 }
 0xf1c   :  { %v1679_v12 = vpop.f32.mrb[36].mxu0 }
 0xf1d   :  { %v1680_v14 = vadd.f32 %v5271_v11, %v1679_v12  ;;  %v5866_v15 = vpop.f32.mrb[37].mxu0 }
 0xf1e   :  { %v1682_v18 = vpop.f32.mrb[38].mxu0 }
 0xf1f   :  { %v1683_v19 = vadd.f32 %v5271_v11, %v1682_v18  ;;  %v5867_v20 = vpop.f32.mrb[39].mxu0  ;;  %v1686_v21 = vadd.f32 %v1680_v14, %v6934_v16  ;;  %v1939_v11 = vld [vmem:[%s7635_s8 + $0x28] sm:$0xff]  ;;  %v6321_v18 = vld [vmem:[#allocation2 + $0xd0] sm:$0xff]  }
 0xf20   :  { %v6243_v12 = vpack.c.bf16 %v1939_v11, %v1938_v10  ;;  %5881 = vmatpush3.bf16.msra.mxu0 %v6321_v18  ;;  %v6324_v20 = vld [vmem:[#allocation2 + $0xf0] sm:$0xff]  }
 0xf21   :  { %v1690_v22 = vsel %vm206_vm4, %v1686_v21, 0.0  ;;  %v1687_v23 = vadd.f32 %v1683_v19, %v6936_v17  ;;  %v1920_v17 = vld [vmem:[%s7628_s1] sm:$0xff]  ;;  %5882 = vmatprep.subr.bf16.mxu0 %v6633_v6  ;;  %v6322_v19 = vld [vmem:[#allocation2 + $0xd8] sm:$0xff]  }
 0xf22   :  { %1691 = vadd.xlane.f32.xlu1 %v1690_v22 }
 0xf23   :  { %v1693_v25 = vsel %vm206_vm4, %v1687_v23, 0.0 }
 0xf24   :  { %1694 = vadd.xlane.f32.xlu0 %v1693_v25  ;;  %5883 = vmatpush3.bf16.msra.mxu0 %v6322_v19 }
 0xf25   :  { %5903 = vmatprep.subr.bf16.mxu0 %v6633_v6 }
 0xfaf   :  { %v1692_v27 = vpop.xlane.xlu1 %1691 }
 0xfb0   :  { %v1696_v28 = vmul.f32 0.03125, %v1692_v27 }
 0xfb1   :  { %v1695_v29 = vpop.xlane.xlu0 %1694 }
 0xfb2   :  { %v1698_v31 = vsub.f32 %v1686_v21, %v1696_v28  ;;  %v1697_v33 = vmul.f32 0.03125, %v1695_v29  ;;  %v5277_v21 = vld [vmem:[%s7637_s10 + $0xe] ss:$0 sm:$0xff] }
 0xfb4   :  { %v1699_v34 = vsub.f32 %v1687_v23, %v1697_v33  ;;  %v1700_v35 = vmul.f32 %v1698_v31, %v1698_v31 }
 0xfb6   :  { %v1702_v36 = vsel %vm206_vm4, %v1700_v35, 0.0  ;;  %v1701_v37 = vmul.f32 %v1699_v34, %v1699_v34 }
 0xfb7   :  { %1703 = vadd.xlane.f32.xlu1 %v1702_v36  ;;  %v1941_v36 = vld [vmem:[%s7630_s3 + $0x8] sm:$0xff] }
 0xfb8   :  { %v1705_v16 = vsel %vm206_vm4, %v1701_v37, 0.0  ;;  %v6325_v37 = vld [vmem:[#allocation2 + $0xe8] sm:$0xff]  }
 0xfb9   :  { %1706 = vadd.xlane.f32.xlu0 %v1705_v16  ;;  %v1940_v16 = vld [vmem:[%s7630_s3] sm:$0xff] }
 0xfc8   :  { %1923 = vperm.xlu1 %6294, %v1920_v17  }
 0xfcf   :  { %1926 = vperm.xlu0 %6293, %v1921_v38  }
0x1044   :  { %v1704_v44 = vpop.xlane.xlu1 %1703 }
0x1045   :  { %v1708_v45 = vmul.f32 0.03125, %v1704_v44 }
0x1046   :  { %v1707_v46 = vpop.xlane.xlu0 %1706 }
0x1047   :  { %v1710_v47 = vadd.f32 1e-05, %v1708_v45  ;;  %v1709_v48 = vmul.f32 0.03125, %v1707_v46  ;;  %v5293_v46 = vld [vmem:[%s7637_s10 + $0x14] ss:$0 sm:$0xff] }
0x1048   :  { %v1924_v55 = vpop.permute.xlu1 %1923 }
0x1049   :  { %6441 = vrsqrt.f32 %v1710_v47  ;;  %v1711_v26 = vadd.f32 1e-05, %v1709_v48  ;;  %vm1928_vm2 = vcmp.eq.s32.totalorder %v6731_v13, %v1924_v55  ;;  %v5297_v48 = vld [vmem:[%s7637_s10 + $0x15] ss:$0 sm:$0xff] }
0x104a   :  { %v5289_v8 = vsel %vm1928_vm2, 1.0, %v6633_v6 }
0x104b   :  { %6443 = vrsqrt.f32 %v1711_v26 }
0x104e   :  { %v1927_v14 = vpop.permute.xlu0 %1926 }
0x104f   :  { %vm1929_vm6 = vcmp.eq.s32.totalorder %v6731_v13, %v1927_v14  ;;  %v6326_v13 = vld [vmem:[#allocation2 + $0xf8] sm:$0xff]  }
0x1050   :  { %v5290_v15 = vsel %vm1929_vm6, 1.0, %v6633_v6 }
0x1053   :  { %v6442_v49 = vpop.eup %6441 }
0x1054   :  { %v1714_v50 = vmul.f32 %v6442_v49, %v1698_v31 }
0x1055   :  { %v6444_v51 = vpop.eup %6443 }
0x1056   :  { %v1720_v52 = vmul.f32 %v5275_v24, %v1714_v50  ;;  %v1715_v53 = vmul.f32 %v6444_v51, %v1699_v34  ;;  %v6323_v34 = vld [vmem:[#allocation2 + $0xe0] sm:$0xff]  }
0x1058   :  { %v1721_v60 = vmul.f32 %v5275_v24, %v1715_v53  ;;  %v7063_v1 = vadd.f32 %v5276_v57, %v1720_v52 }
0x105a   :  { %v7065_v3 = vadd.f32 %v5276_v57, %v1721_v60 }
0x105c   :  { %v1732_v4 = vpack.c.bf16 %v7065_v3, %v7063_v1 }
0x105e   :  { %5873 = vmatmul.mubr.msk.bf16.vlgmr.msra.gmra.mrb[36].mxu1 %vm206_vm4, %v1732_v4  ;;  %v5301_v4 = vld [vmem:[%s7637_s10 + $0x16] ss:$0 sm:$0xff] }
0x105f   :  { %6238 = vmatpush3.bf16.msra.mxu1 %v6235_v41  ;;  %5900 = vmatprep.mubr.msk.f32.mxu1 %vm1942_vm5, %v5289_v8  ;;  %v6328_v41 = vld [vmem:[#allocation2 + $0x108] sm:$0xff]  }
0x1060   :  { %6240 = vmatprep.subr.bf16.mxu1 %v6239_v5 }
0x1063   :  { %6242 = vmatpush3.bf16.msra.mxu1 %v6239_v5 }
0x1064   :  { %6244 = vmatprep.subr.bf16.mxu1 %v6243_v12 }
0x1067   :  { %6246 = vmatpush3.bf16.msra.mxu1 %v6243_v12 }
0x1068   :  { %5911 = vmatprep.subr.bf16.mxu1 %v6633_v6 }
0x106a   :  { %5901 = vmatmul.mubr.msk.f32.vlgmr.msra.gmra.mrb[40].mxu1 %vm1942_vm5, %v5290_v15 }
0x106b   :  { %5915 = vmatprep.mubr.msk.bf16.mxu1 %vm6634_vm3, %v6633_v6  ;;  %5912 = vmatpush3.bf16.msra.mxu1 %v6324_v20 }
0x106c   :  { %5913 = vmatprep.subr.bf16.mxu1 %v6633_v6 }
0x106f   :  { %5914 = vmatpush3.bf16.msra.mxu1 %v6326_v13 }
0x1131   :  { %v1787_v22 = vpop.f32.mrb[36].mxu1 }
0x1132   :  { %v1788_v23 = vadd.f32 %v5277_v21, %v1787_v22  ;;  %v5874_v25 = vpop.f32.mrb[37].mxu1 }
0x1133   :  { %v1790_v27 = vpop.f32.mrb[38].mxu1 }
0x1134   :  { %v1791_v28 = vadd.f32 %v5277_v21, %v1790_v27  ;;  %v5875_v29 = vpop.f32.mrb[39].mxu1  ;;  %v1794_v31 = vmax.f32 %v1788_v23, 0.0  ;;  %v2025_v27 = vld [vmem:[%s7632_s5 + $0x8] sm:$0xff] }
0x1136   :  { %v1795_v33 = vmax.f32 %v1791_v28, 0.0  ;;  %v2024_v28 = vld [vmem:[%s7632_s5] sm:$0xff] }
0x1138   :  { %v1804_v35 = vpack.c.bf16 %v1795_v33, %v1794_v31 }
0x113a   :  { %5885 = vmatmul.mubr.msk.bf16.vlgmr.msra.gmra.mrb[40].mxu0 %vm967_vm1, %v1804_v35 }
0x113b   :  { %5904 = vmatpush3.bf16.msra.mxu0 %v6323_v34  ;;  %5907 = vmatprep.mubr.msk.bf16.mxu0 %vm6634_vm3, %v6633_v6 }
0x113c   :  { %5905 = vmatprep.subr.bf16.mxu0 %v6633_v6 }
0x113d   :  { %v5902_v17 = vpop.f32.mrb[40].mxu1 }
0x113e   :  { %v7098_v38 = vadd.f32 %v5902_v17, %v1941_v36  ;;  %v2015_v7 = vpop.f32.mrb[41].mxu1 }
0x113f   :  { %v7100_v39 = vadd.f32 %v2015_v7, %v1940_v16  ;;  %5906 = vmatpush3.bf16.msra.mxu0 %v6325_v37 }
0x1140   :  { %5919 = vmatprep.subr.bf16.mxu0 %v6633_v6 }
0x1141   :  { %v2032_v9 = vpack.c.bf16 %v7098_v38, %v7100_v39 }
0x1143   :  { %5908 = vmatmul.mubr.msk.bf16.vlgmr.msra.gmra.mrb[44].mxu0 %vm206_vm4, %v2032_v9  ;;  %5916 = vmatmul.mubr.msk.bf16.vlgmr.msra.gmra.mrb[44].mxu1 %vm206_vm4, %v2032_v9 }
0x1144   :  { %5920 = vmatpush3.bf16.msra.mxu0 %v6327_v40  ;;  %5923 = vmatprep.mubr.msk.bf16.mxu0 %vm6634_vm3, %v6633_v6 }
0x1145   :  { %5921 = vmatprep.subr.bf16.mxu0 %v6633_v6 }
0x1148   :  { %5922 = vmatpush3.bf16.msra.mxu0 %v6328_v41 }
0x114b   :  { %5924 = vmatmul.mubr.msk.bf16.vlgmr.msra.gmra.mrb[48].mxu0 %vm206_vm4, %v2032_v9 }
0x120d   :  { %v7111_v42 = vpop.f32.mrb[40].mxu0 }
0x120e   :  { %v5886_v43 = vpop.f32.mrb[41].mxu0 }
0x120f   :  { %v7113_v44 = vpop.f32.mrb[42].mxu0 }
0x1210   :  { %v5887_v45 = vpop.f32.mrb[43].mxu0 }
0x1216   :  { %v2087_v47 = vpop.f32.mrb[44].mxu0  ;;  %v2149_v26 = vpop.f32.mrb[44].mxu1 }
0x1217   :  { %v2088_v49 = vadd.f32 %v5293_v46, %v2087_v47  ;;  %v5909_v24 = vpop.f32.mrb[45].mxu0  ;;  %v5917_v50 = vpop.f32.mrb[45].mxu1  ;;  %v2150_v53 = vadd.f32 %v5297_v48, %v2149_v26 }
0x1218   :  { %v2090_v51 = vpop.f32.mrb[46].mxu0  ;;  %v2152_v52 = vpop.f32.mrb[46].mxu1 }
0x1219   :  { %v2153_v55 = vadd.f32 %v5297_v48, %v2152_v52  ;;  %v5910_v57 = vpop.f32.mrb[47].mxu0  ;;  %v5918_v60 = vpop.f32.mrb[47].mxu1  ;;  %v2218_v61 = vmul.f32 %v2088_v49, %v6769_v32  ;;  %v2091_v8 = vadd.f32 %v5293_v46, %v2090_v51  ;;  %v2220_v20 = vmul.f32 %v2088_v49, %v6801_v58 }
0x121a   :  { %v2222_v21 = vmul.f32 %v2088_v49, %v6809_v62  ;;  %v2224_v23 = vmul.f32 %v2088_v49, %v6819_v2 }
0x121b   :  { %v6247_v0 = vpack.c.bf16 %v2153_v55, %v2150_v53  ;;  %5931 = vmatprep.mubr.msk.f32.mxu1 %vm206_vm4, %v2218_v61  ;;  %v2219_v18 = vmul.f32 %v2091_v8, %v6769_v32  ;;  %v2221_v13 = vmul.f32 %v2091_v8, %v6801_v58  ;;  %v2223_v22 = vmul.f32 %v2091_v8, %v6809_v62 }
0x121c   :  { %v2225_v25 = vmul.f32 %v2091_v8, %v6819_v2 }
0x121d   :  { %6249 = vmatprep.subr.msk.bf16.mxu1 %vm6784_vm9, %v6247_v0 }
0x121e   :  { %v2211_v5 = vpop.f32.mrb[48].mxu0  ;;  %6252 = vmatpush3.bf16.xpose.msk.msra.mxu1 %vm6784_vm9, %v6247_v0 }
0x121f   :  { %v5925_v10 = vpop.f32.mrb[49].mxu0  ;;  %5959 = vmatprep.subr.bf16.mxu1 %v6633_v6  ;;  %v2212_v12 = vadd.f32 %v5301_v4, %v2211_v5 }
0x1220   :  { %v2214_v11 = vpop.f32.mrb[50].mxu0 }
0x1221   :  { %v2215_v14 = vadd.f32 %v5301_v4, %v2214_v11  ;;  %v5926_v15 = vpop.f32.mrb[51].mxu0 }
0x1223   :  { %v6253_v19 = vpack.c.bf16 %v2215_v14, %v2212_v12 }
0x1225   :  { %5932 = vmatmul.mubr.msk.f32.vlgmr.msra.gmra.mrb[42].mxu1 %vm206_vm4, %v2219_v18  ;;  %6254 = vmatprep.subr.bf16.mxu0 %v6253_v19 }
0x1226   :  { %5934 = vmatprep.mubr.msk.f32.mxu1 %vm206_vm4, %v2220_v20  ;;  %6256 = vmatpush3.bf16.msra.mxu0 %v6253_v19 }
0x1227   :  { %5967 = vmatprep.subr.bf16.mxu0 %v6633_v6 }
0x1229   :  { %5935 = vmatmul.mubr.msk.f32.gmra.mrb[48].mxu1 %vm206_vm4, %v2221_v13 }
0x122a   :  { %5937 = vmatprep.mubr.msk.f32.mxu1 %vm206_vm4, %v2222_v21 }
0x122d   :  { %5938 = vmatmul.mubr.msk.f32.gmra.mrb[50].mxu1 %vm206_vm4, %v2223_v22 }
0x122e   :  { %5940 = vmatprep.mubr.msk.f32.mxu1 %vm206_vm4, %v2224_v23 }
0x1231   :  { %5941 = vmatmul.mubr.msk.f32.gmra.mrb[52].mxu1 %vm206_vm4, %v2225_v25 }
0x1232   :  { %5963 = vmatprep.mubr.msk.bf16.mxu1 %vm6634_vm3, %v6633_v6 }
0x12f8   :  { %v5933_v29 = vpop.f32.mrb[42].mxu1 }
0x12f9   :  { %v2328_v31 = vadd.f32 %v5933_v29, %v2025_v27  ;;  %v2322_v33 = vpop.f32.mrb[43].mxu1 }
0x12fa   :  { %v2323_v34 = vadd.f32 %v2322_v33, %v2024_v28 }
0x12fb   :  { %v2364_v35 = vsel %vm518_vm0, %v2328_v31, -inf }
0x12fc   :  { %2365 = vmax.xlane.f32.xlu0 %v2364_v35  ;;  %v5936_v36 = vpop.f32.mrb[48].mxu1  ;;  %v2361_v37 = vsel %vm518_vm0, %v2323_v34, -inf }
0x12fd   :  { %v2338_v16 = vadd.f32 %v5936_v36, %v2025_v27  ;;  %v2332_v17 = vpop.f32.mrb[49].mxu1  ;;  %2362 = vmax.xlane.f32.xlu1 %v2361_v37 }
0x12fe   :  { %v2333_v7 = vadd.f32 %v2332_v17, %v2024_v28  ;;  %v5281_v17 = vld [vmem:[%s7637_s10 + $0xf] ss:$0 sm:$0xff] }
0x12ff   :  { %v2370_v40 = vsel %vm518_vm0, %v2338_v16, -inf }
0x1300   :  { %2371 = vmax.xlane.f32.xlu0 %v2370_v40  ;;  %v5939_v9 = vpop.f32.mrb[50].mxu1  ;;  %v2367_v41 = vsel %vm518_vm0, %v2333_v7, -inf }
0x1301   :  { %v2348_v43 = vadd.f32 %v5939_v9, %v2025_v27  ;;  %v2342_v45 = vpop.f32.mrb[51].mxu1  ;;  %2368 = vmax.xlane.f32.xlu1 %v2367_v41  ;;  %v1875_v9 = vadd.f32 %v5281_v17, %v7113_v44 }
0x1302   :  { %v2343_v46 = vadd.f32 %v2342_v45, %v2024_v28 }
0x1303   :  { %v2376_v47 = vsel %vm518_vm0, %v2348_v43, -inf }
0x1304   :  { %2377 = vmax.xlane.f32.xlu0 %v2376_v47  ;;  %v5942_v48 = vpop.f32.mrb[52].mxu1  ;;  %v2373_v26 = vsel %vm518_vm0, %v2343_v46, -inf }
0x1305   :  { %v2358_v49 = vadd.f32 %v5942_v48, %v2025_v27  ;;  %v2352_v24 = vpop.f32.mrb[53].mxu1  ;;  %2374 = vmax.xlane.f32.xlu1 %v2373_v26  ;;  %v7175_v26 = vadd.f32 %v1875_v9, %v7065_v3 }
0x1306   :  { %v2353_v50 = vadd.f32 %v2352_v24, %v2024_v28 }
0x1307   :  { %v2382_v51 = vsel %vm518_vm0, %v2358_v49, -inf }
0x1308   :  { %2383 = vmax.xlane.f32.xlu0 %v2382_v51  ;;  %v2379_v52 = vsel %vm518_vm0, %v2353_v50, -inf }
0x1309   :  { %2380 = vmax.xlane.f32.xlu1 %v2379_v52 }
0x1389   :  { %v2366_v53 = vpop.xlane.xlu0 %2365 }
0x138a   :  { %v2386_v55 = vsub.f32 %v2328_v31, %v2366_v53  ;;  %v2363_v57 = vpop.xlane.xlu1 %2362 }
0x138b   :  { %v2385_v60 = vsub.f32 %v2323_v34, %v2363_v57 }
0x138c   :  { %v2395_v61 = vmul.f32 1.442695, %v2386_v55 }
0x138d   :  { %v2393_v0 = vmul.f32 1.442695, %v2385_v60  ;;  %v2372_v4 = vpop.xlane.xlu0 %2371 }
0x138e   :  { %6445 = vpow2.f32 %v2395_v61  ;;  %v2388_v5 = vsub.f32 %v2338_v16, %v2372_v4  ;;  %v2369_v8 = vpop.xlane.xlu1 %2368 }
0x138f   :  { %6447 = vpow2.f32 %v2393_v0  ;;  %v2387_v10 = vsub.f32 %v2333_v7, %v2369_v8 }
0x1390   :  { %v2399_v11 = vmul.f32 1.442695, %v2388_v5 }
0x1391   :  { %v2397_v12 = vmul.f32 1.442695, %v2387_v10  ;;  %v2378_v14 = vpop.xlane.xlu0 %2377 }
0x1392   :  { %6449 = vpow2.f32 %v2399_v11  ;;  %v2390_v15 = vsub.f32 %v2348_v43, %v2378_v14  ;;  %v2375_v18 = vpop.xlane.xlu1 %2374  ;;  %v1872_v43 = vadd.f32 %v5281_v17, %v7111_v42  ;;  %v1885_v42 = vsel %vm206_vm4, %v7175_v26, 0.0 }
0x1393   :  { %6451 = vpow2.f32 %v2397_v12  ;;  %v2389_v19 = vsub.f32 %v2343_v46, %v2375_v18 }
0x1394   :  { %v2403_v20 = vmul.f32 1.442695, %v2390_v15  ;;  %v7179_v44 = vadd.f32 %v1872_v43, %v7063_v1 }
0x1395   :  { %v2401_v13 = vmul.f32 1.442695, %v2389_v19  ;;  %v2384_v21 = vpop.xlane.xlu0 %2383 }
0x1396   :  { %6453 = vpow2.f32 %v2403_v20  ;;  %v2392_v22 = vsub.f32 %v2358_v49, %v2384_v21  ;;  %v2381_v23 = vpop.xlane.xlu1 %2380  ;;  %v1882_v24 = vsel %vm206_vm4, %v7179_v44, 0.0 }
0x1397   :  { %6455 = vpow2.f32 %v2401_v13  ;;  %v2391_v25 = vsub.f32 %v2353_v50, %v2381_v23  ;;  %v6330_v23 = vld [vmem:[#allocation2 + $0x118] sm:$0xff]  }
0x1398   :  { %v6446_v27 = vpop.eup %6445  ;;  %v2407_v28 = vmul.f32 1.442695, %v2392_v22  ;;  %v6329_v22 = vld [vmem:[#allocation2 + $0x110] sm:$0xff]  }
0x1399   :  { %v6448_v29 = vpop.eup %6447  ;;  %v2405_v31 = vmul.f32 1.442695, %v2391_v25  ;;  %v2412_v33 = vsel %vm518_vm0, %v6446_v27, 0.0  ;;  %5960 = vmatpush3.bf16.msra.mxu1 %v6329_v22 }
0x139a   :  { %6457 = vpow2.f32 %v2407_v28  ;;  %2413 = vadd.xlane.f32.xlu0 %v2412_v33  ;;  %v2409_v34 = vsel %vm518_vm0, %v6448_v29, 0.0  ;;  %5961 = vmatprep.subr.bf16.mxu1 %v6633_v6 }
0x139b   :  { %6459 = vpow2.f32 %v2405_v31  ;;  %2410 = vadd.xlane.f32.xlu1 %v2409_v34 }
0x139c   :  { %v6450_v35 = vpop.eup %6449 }
0x139d   :  { %v6452_v36 = vpop.eup %6451  ;;  %v2418_v37 = vsel %vm518_vm0, %v6450_v35, 0.0  ;;  %5962 = vmatpush3.bf16.msra.mxu1 %v6330_v23 }
0x139e   :  { %2419 = vadd.xlane.f32.xlu0 %v2418_v37  ;;  %v2415_v16 = vsel %vm518_vm0, %v6452_v36, 0.0  ;;  %5975 = vmatprep.subr.bf16.mxu1 %v6633_v6 }
0x139f   :  { %2416 = vadd.xlane.f32.xlu1 %v2415_v16 }
0x13a0   :  { %v6454_v7 = vpop.eup %6453 }
0x13a1   :  { %v6456_v40 = vpop.eup %6455  ;;  %v2424_v41 = vsel %vm518_vm0, %v6454_v7, 0.0 }
0x13a2   :  { %2425 = vadd.xlane.f32.xlu0 %v2424_v41  ;;  %v2421_v45 = vsel %vm518_vm0, %v6456_v40, 0.0 }
0x13a3   :  { %2422 = vadd.xlane.f32.xlu1 %v2421_v45 }
0x13a4   :  { %v6458_v46 = vpop.eup %6457 }
0x13a5   :  { %v6460_v47 = vpop.eup %6459  ;;  %v2430_v48 = vsel %vm518_vm0, %v6458_v46, 0.0 }
0x13a6   :  { %2431 = vadd.xlane.f32.xlu0 %v2430_v48  ;;  %v2427_v49 = vsel %vm518_vm0, %v6460_v47, 0.0 }
0x13a7   :  { %2428 = vadd.xlane.f32.xlu1 %v2427_v49 }
0x13aa   :  { %1886 = vadd.xlane.f32.xlu0 %v1885_v42 }
0x13ab   :  { %1883 = vadd.xlane.f32.xlu1 %v1882_v24 }
0x1427   :  { %v2414_v50 = vpop.xlane.xlu0 %2413 }
0x1428   :  { %6461 = vrcp.f32 %v2414_v50  ;;  %v2411_v51 = vpop.xlane.xlu1 %2410 }
0x1429   :  { %6463 = vrcp.f32 %v2411_v51 }
0x142b   :  { %v2420_v3 = vpop.xlane.xlu0 %2419 }
0x142c   :  { %6465 = vrcp.f32 %v2420_v3  ;;  %v2417_v52 = vpop.xlane.xlu1 %2416  ;;  %v5323_v3 = vld [vmem:[%s7637_s10 + $0x17] ss:$0 sm:$0xff] }
0x142d   :  { %6467 = vrcp.f32 %v2417_v52 }
0x142f   :  { %v2426_v53 = vpop.xlane.xlu0 %2425 }
0x1430   :  { %6469 = vrcp.f32 %v2426_v53  ;;  %v2423_v1 = vpop.xlane.xlu1 %2422 }
0x1431   :  { %6471 = vrcp.f32 %v2423_v1 }
0x1432   :  { %v6462_v55 = vpop.eup %6461 }
0x1433   :  { %v6464_v57 = vpop.eup %6463  ;;  %v2432_v60 = vpop.xlane.xlu0 %2431  ;;  %v2442_v4 = vmul.f32 %v6462_v55, %v6446_v27 }
0x1434   :  { %6473 = vrcp.f32 %v2432_v60  ;;  %v2429_v61 = vpop.xlane.xlu1 %2428  ;;  %v2441_v0 = vmul.f32 %v6464_v57, %v6448_v29 }
0x1435   :  { %6475 = vrcp.f32 %v2429_v61 }
0x1436   :  { %v6466_v5 = vpop.eup %6465  ;;  %5947 = vmatprep.mubr.msk.f32.mxu0 %vm518_vm0, %v2441_v0 }
0x1437   :  { %v6468_v8 = vpop.eup %6467  ;;  %5948 = vmatmul.mubr.msk.f32.vlgmr.msra.gmra.mrb[34].mxu0 %vm518_vm0, %v2442_v4  ;;  %v2444_v11 = vmul.f32 %v6466_v5, %v6450_v35  ;;  %v1887_v50 = vpop.xlane.xlu0 %1886 }
0x1438   :  { %v2443_v10 = vmul.f32 %v6468_v8, %v6452_v36  ;;  %v1884_v24 = vpop.xlane.xlu1 %1883  ;;  %v1889_v52 = vmul.f32 0.03125, %v1887_v50 }
0x1439   :  { %v1888_v51 = vmul.f32 0.03125, %v1884_v24 }
0x143a   :  { %v6470_v12 = vpop.eup %6469  ;;  %5950 = vmatprep.mubr.msk.f32.mxu0 %vm518_vm0, %v2443_v10  ;;  %v1891_v61 = vsub.f32 %v7175_v26, %v1889_v52  ;;  %v6331_v26 = vld [vmem:[#allocation2 + $0x130] sm:$0xff]  }
0x143b   :  { %v6472_v14 = vpop.eup %6471  ;;  %5951 = vmatmul.mubr.msk.f32.gmra.mrb[52].mxu0 %vm518_vm0, %v2444_v11  ;;  %v2446_v18 = vmul.f32 %v6470_v12, %v6454_v7  ;;  %v1890_v1 = vsub.f32 %v7179_v44, %v1888_v51 }
0x143c   :  { %v2445_v15 = vmul.f32 %v6472_v14, %v6456_v40  ;;  %v1893_v14 = vmul.f32 %v1891_v61, %v1891_v61 }
0x143d   :  { %v1892_v11 = vmul.f32 %v1890_v1, %v1890_v1 }
0x143e   :  { %v6474_v19 = vpop.eup %6473  ;;  %5953 = vmatprep.mubr.msk.f32.mxu0 %vm518_vm0, %v2445_v15  ;;  %v1897_v15 = vsel %vm206_vm4, %v1893_v14, 0.0 }
0x143f   :  { %v6476_v20 = vpop.eup %6475  ;;  %5954 = vmatmul.mubr.msk.f32.gmra.mrb[54].mxu0 %vm518_vm0, %v2446_v18  ;;  %v2448_v21 = vmul.f32 %v6474_v19, %v6458_v46  ;;  %v1894_v44 = vsel %vm206_vm4, %v1892_v11, 0.0  ;;  %v6332_v18 = vld [vmem:[#allocation2 + $0x138] sm:$0xff]   ;;  %v6336_v11 = vld [vmem:[#allocation2 + $0x148] sm:$0xff]  }
0x1440   :  { %v2447_v13 = vmul.f32 %v6476_v20, %v6460_v47 }
0x1442   :  { %5956 = vmatprep.mubr.msk.f32.mxu0 %vm518_vm0, %v2447_v13 }
0x1443   :  { %5957 = vmatmul.mubr.msk.f32.gmra.mrb[56].mxu0 %vm518_vm0, %v2448_v21 }
0x1444   :  { %5971 = vmatprep.mubr.msk.bf16.mxu0 %vm6634_vm3, %v6633_v6 }
0x150a   :  { %v5949_v25 = vpop.f32.mrb[34].mxu0 }
0x150b   :  { %v2539_v27 = vpop.f32.mrb[35].mxu0  ;;  %v2579_v29 = vmul.f32 %v5949_v25, %v6763_v30 }
0x150c   :  { %v2578_v34 = vmul.f32 %v6763_v30, %v2539_v27 }
0x150e   :  { %v5952_v28 = vpop.f32.mrb[52].mxu0 }
0x150f   :  { %v2583_v31 = vmul.f32 %v5952_v28, %v6793_v56  ;;  %v2549_v33 = vpop.f32.mrb[53].mxu0 }
0x1510   :  { %v2582_v35 = vmul.f32 %v6793_v56, %v2549_v33 }
0x1511   :  { %v2585_v36 = vadd.f32 %v2583_v31, %v2579_v29 }
0x1512   :  { %v2584_v37 = vadd.f32 %v2582_v35, %v2578_v34  ;;  %v5955_v16 = vpop.f32.mrb[54].mxu0 }
0x1513   :  { %v2587_v17 = vmul.f32 %v5955_v16, %v6804_v59  ;;  %v2559_v7 = vpop.f32.mrb[55].mxu0 }
0x1514   :  { %v2586_v40 = vmul.f32 %v6804_v59, %v2559_v7 }
0x1515   :  { %v2589_v9 = vadd.f32 %v2587_v17, %v2585_v36 }
0x1516   :  { %v2588_v41 = vadd.f32 %v2586_v40, %v2584_v37  ;;  %v5958_v43 = vpop.f32.mrb[56].mxu0  ;;  %v5287_v37 = vld [vmem:[%s7637_s10 + $0x12] ss:$0 sm:$0xff] }
0x1517   :  { %v2591_v45 = vmul.f32 %v5958_v43, %v6813_v63  ;;  %v2569_v46 = vpop.f32.mrb[57].mxu0 }
0x1518   :  { %v2590_v47 = vmul.f32 %v6813_v63, %v2569_v46 }
0x1519   :  { %v2593_v48 = vadd.f32 %v2591_v45, %v2589_v9  ;;  %v5288_v9 = vld [vmem:[%s7637_s10 + $0x13] ss:$0 sm:$0xff] }
0x151a   :  { %v2592_v49 = vadd.f32 %v2590_v47, %v2588_v41  ;;  %v6333_v47 = vld [vmem:[#allocation2 + $0x120] sm:$0xff]  }
0x151b   :  { %5968 = vmatpush3.bf16.msra.mxu0 %v6333_v47  ;;  %v2026_v47 = vld [vmem:[%s7633_s6] sm:$0xff] }
0x151c   :  { %v2598_v42 = vpack.c.bf16 %v2593_v48, %v2592_v49  ;;  %5969 = vmatprep.subr.bf16.mxu0 %v6633_v6  ;;  %v6334_v48 = vld [vmem:[#allocation2 + $0x128] sm:$0xff]  }
0x151e   :  { %5964 = vmatmul.mubr.msk.bf16.vlgmr.msra.gmra.mrb[56].mxu1 %vm206_vm4, %v2598_v42 }
0x151f   :  { %5979 = vmatprep.mubr.msk.bf16.mxu1 %vm6634_vm3, %v6633_v6  ;;  %5976 = vmatpush3.bf16.msra.mxu1 %v6331_v26 }
0x1520   :  { %5977 = vmatprep.subr.bf16.mxu1 %v6633_v6  ;;  %5970 = vmatpush3.bf16.msra.mxu0 %v6334_v48 }
0x1521   :  { %5983 = vmatprep.subr.bf16.mxu0 %v6633_v6 }
0x1523   :  { %5978 = vmatpush3.bf16.msra.mxu1 %v6332_v18 }
0x15f1   :  { %v2653_v53 = vpop.f32.mrb[56].mxu1 }
0x15f2   :  { %v2654_v55 = vadd.f32 %v5323_v3, %v2653_v53  ;;  %v5965_v57 = vpop.f32.mrb[57].mxu1  ;;  %v5327_v53 = vld [vmem:[%s7637_s10 + $0x1e] ss:$0 sm:$0xff] }
0x15f3   :  { %v2656_v60 = vpop.f32.mrb[58].mxu1 }
0x15f4   :  { %v2657_v0 = vadd.f32 %v5323_v3, %v2656_v60  ;;  %v5966_v4 = vpop.f32.mrb[59].mxu1  ;;  %v2660_v5 = vadd.f32 %v2654_v55, %v7100_v39 }
0x15f6   :  { %v2664_v8 = vsel %vm206_vm4, %v2660_v5, 0.0  ;;  %v2661_v10 = vadd.f32 %v2657_v0, %v7098_v38 }
0x15f7   :  { %2665 = vadd.xlane.f32.xlu1 %v2664_v8  ;;  %v6335_v8 = vld [vmem:[#allocation2 + $0x140] sm:$0xff]  }
0x15f8   :  { %v2667_v12 = vsel %vm206_vm4, %v2661_v10, 0.0 }
0x15f9   :  { %2668 = vadd.xlane.f32.xlu0 %v2667_v12  ;;  %v5333_v12 = vld [vmem:[%s7637_s10 + $0x19] ss:$0 sm:$0xff] }
0x15fb   :  { %1895 = vadd.xlane.f32.xlu1 %v1894_v44 }
0x15fd   :  { %1898 = vadd.xlane.f32.xlu0 %v1897_v15 }
0x1684   :  { %v2666_v39 = vpop.xlane.xlu1 %2665 }
0x1685   :  { %v2670_v38 = vmul.f32 0.03125, %v2666_v39 }
0x1686   :  { %v2669_v19 = vpop.xlane.xlu0 %2668 }
0x1687   :  { %v2672_v20 = vsub.f32 %v2660_v5, %v2670_v38  ;;  %v2671_v13 = vmul.f32 0.03125, %v2669_v19  ;;  %v5329_v19 = vld [vmem:[%s7637_s10 + $0x18] ss:$0 sm:$0xff] }
0x1688   :  { %v1896_v21 = vpop.xlane.xlu1 %1895 }
0x1689   :  { %v2673_v22 = vsub.f32 %v2661_v10, %v2671_v13  ;;  %v1900_v23 = vmul.f32 0.03125, %v1896_v21  ;;  %v2674_v25 = vmul.f32 %v2672_v20, %v2672_v20 }
0x168a   :  { %v1899_v27 = vpop.xlane.xlu0 %1898 }
0x168b   :  { %v1902_v28 = vadd.f32 1e-05, %v1900_v23  ;;  %v1901_v29 = vmul.f32 0.03125, %v1899_v27  ;;  %v2676_v31 = vsel %vm206_vm4, %v2674_v25, 0.0  ;;  %v2675_v33 = vmul.f32 %v2673_v22, %v2673_v22 }
0x168c   :  { %2677 = vadd.xlane.f32.xlu1 %v2676_v31  ;;  %v5337_v31 = vld [vmem:[%s7637_s10 + $0x1a] ss:$0 sm:$0xff] }
0x168d   :  { %6477 = vrsqrt.f32 %v1902_v28  ;;  %v1903_v34 = vadd.f32 1e-05, %v1901_v29  ;;  %v2679_v35 = vsel %vm206_vm4, %v2675_v33, 0.0 }
0x168e   :  { %2680 = vadd.xlane.f32.xlu0 %v2679_v35 }
0x168f   :  { %6479 = vrsqrt.f32 %v1903_v34 }
0x1697   :  { %v6478_v36 = vpop.eup %6477 }
0x1698   :  { %v1906_v16 = vmul.f32 %v6478_v36, %v1890_v1 }
0x1699   :  { %v6480_v17 = vpop.eup %6479 }
0x169a   :  { %v1912_v7 = vmul.f32 %v5287_v37, %v1906_v16  ;;  %v1907_v40 = vmul.f32 %v6480_v17, %v1891_v61  ;;  %v5328_v61 = vld [vmem:[%s7637_s10 + $0x1f] ss:$0 sm:$0xff] }
0x169c   :  { %v1913_v41 = vmul.f32 %v5287_v37, %v1907_v40  ;;  %v1918_v43 = vadd.f32 %v5288_v9, %v1912_v7 }
0x169e   :  { %v1919_v45 = vadd.f32 %v5288_v9, %v1913_v41 }
0x16a0   :  { %v7228_v46 = vpack.c.bf16 %v1919_v45, %v1918_v43  ;;  %v2027_v45 = vld [vmem:[%s7633_s6 + $0x8] sm:$0xff] }
0x16a2   :  { %5980 = vmatmul.mubr.msk.bf16.vlgmr.msra.gmra.mrb[60].mxu1 %vm206_vm4, %v7228_v46 }
0x1719   :  { %v2678_v49 = vpop.xlane.xlu1 %2677 }
0x171a   :  { %v2682_v42 = vmul.f32 0.03125, %v2678_v49 }
0x171b   :  { %v2681_v24 = vpop.xlane.xlu0 %2680 }
0x171c   :  { %v2684_v50 = vadd.f32 1e-05, %v2682_v42  ;;  %v2683_v51 = vmul.f32 0.03125, %v2681_v24 }
0x171e   :  { %6481 = vrsqrt.f32 %v2684_v50  ;;  %v2685_v3 = vadd.f32 1e-05, %v2683_v51 }
0x1720   :  { %6483 = vrsqrt.f32 %v2685_v3 }
0x1728   :  { %v6482_v52 = vpop.eup %6481 }
0x1729   :  { %v2688_v1 = vmul.f32 %v6482_v52, %v2672_v20 }
0x172a   :  { %v6484_v55 = vpop.eup %6483 }
0x172b   :  { %v2694_v57 = vmul.f32 %v5327_v53, %v2688_v1  ;;  %v2689_v60 = vmul.f32 %v6484_v55, %v2673_v22 }
0x172d   :  { %v2695_v0 = vmul.f32 %v5327_v53, %v2689_v60  ;;  %v7240_v4 = vadd.f32 %v5328_v61, %v2694_v57 }
0x172f   :  { %v7242_v5 = vadd.f32 %v5328_v61, %v2695_v0 }
0x1731   :  { %v2706_v10 = vpack.c.bf16 %v7242_v5, %v7240_v4 }
0x1733   :  { %5972 = vmatmul.mubr.msk.bf16.vlgmr.msra.gmra.mrb[60].mxu0 %vm206_vm4, %v2706_v10 }
0x1734   :  { %5984 = vmatpush3.bf16.msra.mxu0 %v6335_v8  ;;  %5987 = vmatprep.mubr.msk.bf16.mxu0 %vm6634_vm3, %v6633_v6 }
0x1735   :  { %5985 = vmatprep.subr.bf16.mxu0 %v6633_v6 }
0x1738   :  { %5986 = vmatpush3.bf16.msra.mxu0 %v6336_v11 }
0x173b   :  { %5988 = vmatmul.mubr.msk.bf16.vlgmr.msra.gmra.mrb[64].mxu0 %vm206_vm4, %v7228_v46 }
0x1775   :  { %v2827_v14 = vpop.f32.mrb[60].mxu1 }
0x1776   :  { %v5981_v44 = vpop.f32.mrb[61].mxu1  ;;  %v2828_v26 = vadd.f32 %v5333_v12, %v2827_v14 }
0x1777   :  { %v2830_v15 = vpop.f32.mrb[62].mxu1 }
0x1778   :  { %v2831_v18 = vadd.f32 %v5333_v12, %v2830_v15  ;;  %v5982_v39 = vpop.f32.mrb[63].mxu1 }
0x177a   :  { %v6257_v38 = vpack.c.bf16 %v2831_v18, %v2828_v26 }
0x177c   :  { %6259 = vmatprep.subr.msk.bf16.mxu1 %vm6784_vm9, %v6257_v38 }
0x177d   :  { %6262 = vmatpush3.bf16.xpose.msk.msra.mxu1 %vm6784_vm9, %v6257_v38 }
0x177e   :  { %6023 = vmatprep.subr.bf16.mxu1 %v6633_v6 }
0x1806   :  { %v2761_v20 = vpop.f32.mrb[60].mxu0 }
0x1807   :  { %v2762_v13 = vadd.f32 %v5329_v19, %v2761_v20  ;;  %v5973_v21 = vpop.f32.mrb[61].mxu0 }
0x1808   :  { %v2764_v22 = vpop.f32.mrb[62].mxu0 }
0x1809   :  { %v2765_v23 = vadd.f32 %v5329_v19, %v2764_v22  ;;  %v5974_v25 = vpop.f32.mrb[63].mxu0  ;;  %v2896_v27 = vmul.f32 %v2762_v13, %v6769_v32  ;;  %v2898_v29 = vmul.f32 %v2762_v13, %v6801_v58  ;;  %v2900_v37 = vmul.f32 %v2762_v13, %v6809_v62 }
0x180a   :  { %v2902_v41 = vmul.f32 %v2762_v13, %v6819_v2 }
0x180b   :  { %v2897_v28 = vmul.f32 %v2765_v23, %v6769_v32  ;;  %5995 = vmatprep.mubr.msk.f32.mxu1 %vm206_vm4, %v2896_v27  ;;  %v2899_v35 = vmul.f32 %v2765_v23, %v6801_v58  ;;  %v2901_v9 = vmul.f32 %v2765_v23, %v6809_v62  ;;  %v2903_v43 = vmul.f32 %v2765_v23, %v6819_v2 }
0x180d   :  { %5996 = vmatmul.mubr.msk.f32.vlgmr.msra.gmra.mrb[54].mxu1 %vm206_vm4, %v2897_v28 }
0x180e   :  { %v2889_v33 = vpop.f32.mrb[64].mxu0  ;;  %5998 = vmatprep.mubr.msk.f32.mxu1 %vm206_vm4, %v2898_v29 }
0x180f   :  { %v5989_v34 = vpop.f32.mrb[65].mxu0  ;;  %v2890_v16 = vadd.f32 %v5337_v31, %v2889_v33 }
0x1810   :  { %v2892_v36 = vpop.f32.mrb[66].mxu0 }
0x1811   :  { %v2893_v17 = vadd.f32 %v5337_v31, %v2892_v36  ;;  %v5990_v7 = vpop.f32.mrb[67].mxu0  ;;  %5999 = vmatmul.mubr.msk.f32.gmra.mrb[64].mxu1 %vm206_vm4, %v2899_v35 }
0x1812   :  { %6001 = vmatprep.mubr.msk.f32.mxu1 %vm206_vm4, %v2900_v37 }
0x1813   :  { %v6263_v40 = vpack.c.bf16 %v2893_v17, %v2890_v16 }
0x1815   :  { %6002 = vmatmul.mubr.msk.f32.gmra.mrb[66].mxu1 %vm206_vm4, %v2901_v9  ;;  %6264 = vmatprep.subr.bf16.mxu0 %v6263_v40 }
0x1816   :  { %6004 = vmatprep.mubr.msk.f32.mxu1 %vm206_vm4, %v2902_v41  ;;  %6266 = vmatpush3.bf16.msra.mxu0 %v6263_v40 }
0x1817   :  { %6031 = vmatprep.subr.bf16.mxu0 %v6633_v6 }
0x1819   :  { %6005 = vmatmul.mubr.msk.f32.gmra.mrb[68].mxu1 %vm206_vm4, %v2903_v43 }
0x181a   :  { %6027 = vmatprep.mubr.msk.bf16.mxu1 %vm6634_vm3, %v6633_v6 }
0x18e0   :  { %v5997_v48 = vpop.f32.mrb[54].mxu1 }
0x18e1   :  { %v3006_v49 = vadd.f32 %v5997_v48, %v2027_v45  ;;  %v3000_v42 = vpop.f32.mrb[55].mxu1 }
0x18e2   :  { %v3001_v24 = vadd.f32 %v3000_v42, %v2026_v47 }
0x18e3   :  { %v3042_v50 = vsel %vm518_vm0, %v3006_v49, -inf }
0x18e4   :  { %3043 = vmax.xlane.f32.xlu0 %v3042_v50  ;;  %v6000_v51 = vpop.f32.mrb[64].mxu1  ;;  %v3039_v3 = vsel %vm518_vm0, %v3001_v24, -inf }
0x18e5   :  { %v3016_v52 = vadd.f32 %v6000_v51, %v2027_v45  ;;  %v3010_v53 = vpop.f32.mrb[65].mxu1  ;;  %3040 = vmax.xlane.f32.xlu1 %v3039_v3 }
0x18e6   :  { %v3011_v1 = vadd.f32 %v3010_v53, %v2026_v47 }
0x18e7   :  { %v3048_v55 = vsel %vm518_vm0, %v3016_v52, -inf }
0x18e8   :  { %3049 = vmax.xlane.f32.xlu0 %v3048_v55  ;;  %v6003_v57 = vpop.f32.mrb[66].mxu1  ;;  %v3045_v60 = vsel %vm518_vm0, %v3011_v1, -inf }
0x18e9   :  { %v3026_v61 = vadd.f32 %v6003_v57, %v2027_v45  ;;  %v3020_v0 = vpop.f32.mrb[67].mxu1  ;;  %3046 = vmax.xlane.f32.xlu1 %v3045_v60 }
0x18ea   :  { %v3021_v8 = vadd.f32 %v3020_v0, %v2026_v47 }
0x18eb   :  { %v3054_v10 = vsel %vm518_vm0, %v3026_v61, -inf }
0x18ec   :  { %3055 = vmax.xlane.f32.xlu0 %v3054_v10  ;;  %v6006_v11 = vpop.f32.mrb[68].mxu1  ;;  %v3051_v12 = vsel %vm518_vm0, %v3021_v8, -inf }
0x18ed   :  { %v3036_v14 = vadd.f32 %v6006_v11, %v2027_v45  ;;  %v3030_v44 = vpop.f32.mrb[69].mxu1  ;;  %3052 = vmax.xlane.f32.xlu1 %v3051_v12 }
0x18ee   :  { %v3031_v15 = vadd.f32 %v3030_v44, %v2026_v47 }
0x18ef   :  { %v3060_v26 = vsel %vm518_vm0, %v3036_v14, -inf }
0x18f0   :  { %3061 = vmax.xlane.f32.xlu0 %v3060_v26  ;;  %v3057_v18 = vsel %vm518_vm0, %v3031_v15, -inf }
0x18f1   :  { %3058 = vmax.xlane.f32.xlu1 %v3057_v18 }
0x1971   :  { %v3044_v39 = vpop.xlane.xlu0 %3043 }
0x1972   :  { %v3064_v38 = vsub.f32 %v3006_v49, %v3044_v39  ;;  %v3041_v19 = vpop.xlane.xlu1 %3040 }
0x1973   :  { %v3063_v20 = vsub.f32 %v3001_v24, %v3041_v19 }
0x1974   :  { %v3073_v13 = vmul.f32 1.442695, %v3064_v38 }
0x1975   :  { %v3071_v21 = vmul.f32 1.442695, %v3063_v20  ;;  %v3050_v22 = vpop.xlane.xlu0 %3049 }
0x1976   :  { %6485 = vpow2.f32 %v3073_v13  ;;  %v3066_v23 = vsub.f32 %v3016_v52, %v3050_v22  ;;  %v3047_v25 = vpop.xlane.xlu1 %3046 }
0x1977   :  { %6487 = vpow2.f32 %v3071_v21  ;;  %v3065_v27 = vsub.f32 %v3011_v1, %v3047_v25 }
0x1978   :  { %v3077_v28 = vmul.f32 1.442695, %v3066_v23 }
0x1979   :  { %v3075_v29 = vmul.f32 1.442695, %v3065_v27  ;;  %v3056_v31 = vpop.xlane.xlu0 %3055 }
0x197a   :  { %6489 = vpow2.f32 %v3077_v28  ;;  %v3068_v33 = vsub.f32 %v3026_v61, %v3056_v31  ;;  %v3053_v34 = vpop.xlane.xlu1 %3052 }
0x197b   :  { %6491 = vpow2.f32 %v3075_v29  ;;  %v3067_v35 = vsub.f32 %v3021_v8, %v3053_v34  ;;  %v6338_v34 = vld [vmem:[#allocation2 + $0x158] sm:$0xff]  }
0x197c   :  { %v3081_v36 = vmul.f32 1.442695, %v3068_v33  ;;  %v6337_v33 = vld [vmem:[#allocation2 + $0x150] sm:$0xff]  }
0x197d   :  { %v3079_v37 = vmul.f32 1.442695, %v3067_v35  ;;  %v3062_v16 = vpop.xlane.xlu0 %3061  ;;  %6024 = vmatpush3.bf16.msra.mxu1 %v6337_v33 }
0x197e   :  { %6493 = vpow2.f32 %v3081_v36  ;;  %v3070_v17 = vsub.f32 %v3036_v14, %v3062_v16  ;;  %v3059_v7 = vpop.xlane.xlu1 %3058  ;;  %6025 = vmatprep.subr.bf16.mxu1 %v6633_v6 }
0x197f   :  { %6495 = vpow2.f32 %v3079_v37  ;;  %v3069_v40 = vsub.f32 %v3031_v15, %v3059_v7 }
0x1980   :  { %v6486_v9 = vpop.eup %6485  ;;  %v3085_v41 = vmul.f32 1.442695, %v3070_v17 }
0x1981   :  { %v6488_v43 = vpop.eup %6487  ;;  %v3083_v45 = vmul.f32 1.442695, %v3069_v40  ;;  %v3090_v47 = vsel %vm518_vm0, %v6486_v9, 0.0  ;;  %6026 = vmatpush3.bf16.msra.mxu1 %v6338_v34 }
0x1982   :  { %6497 = vpow2.f32 %v3085_v41  ;;  %3091 = vadd.xlane.f32.xlu0 %v3090_v47  ;;  %v3087_v48 = vsel %vm518_vm0, %v6488_v43, 0.0  ;;  %6039 = vmatprep.subr.bf16.mxu1 %v6633_v6 }
0x1983   :  { %6499 = vpow2.f32 %v3083_v45  ;;  %3088 = vadd.xlane.f32.xlu1 %v3087_v48 }
0x1984   :  { %v6490_v49 = vpop.eup %6489 }
0x1985   :  { %v6492_v42 = vpop.eup %6491  ;;  %v3096_v24 = vsel %vm518_vm0, %v6490_v49, 0.0 }
0x1986   :  { %3097 = vadd.xlane.f32.xlu0 %v3096_v24  ;;  %v3093_v50 = vsel %vm518_vm0, %v6492_v42, 0.0 }
0x1987   :  { %3094 = vadd.xlane.f32.xlu1 %v3093_v50 }
0x1988   :  { %v6494_v51 = vpop.eup %6493 }
0x1989   :  { %v6496_v3 = vpop.eup %6495  ;;  %v3102_v52 = vsel %vm518_vm0, %v6494_v51, 0.0 }
0x198a   :  { %3103 = vadd.xlane.f32.xlu0 %v3102_v52  ;;  %v3099_v53 = vsel %vm518_vm0, %v6496_v3, 0.0 }
0x198b   :  { %3100 = vadd.xlane.f32.xlu1 %v3099_v53 }
0x198c   :  { %v6498_v1 = vpop.eup %6497 }
0x198d   :  { %v6500_v55 = vpop.eup %6499  ;;  %v3108_v57 = vsel %vm518_vm0, %v6498_v1, 0.0 }
0x198e   :  { %3109 = vadd.xlane.f32.xlu0 %v3108_v57  ;;  %v3105_v60 = vsel %vm518_vm0, %v6500_v55, 0.0  ;;  %v5359_v57 = vld [vmem:[%s7637_s10 + $0x1b] ss:$0 sm:$0xff] }
0x198f   :  { %3106 = vadd.xlane.f32.xlu1 %v3105_v60 }
0x1a0f   :  { %v3092_v61 = vpop.xlane.xlu0 %3091 }
0x1a10   :  { %6501 = vrcp.f32 %v3092_v61  ;;  %v3089_v0 = vpop.xlane.xlu1 %3088 }
0x1a11   :  { %6503 = vrcp.f32 %v3089_v0 }
0x1a13   :  { %v3098_v8 = vpop.xlane.xlu0 %3097 }
0x1a14   :  { %6505 = vrcp.f32 %v3098_v8  ;;  %v3095_v10 = vpop.xlane.xlu1 %3094 }
0x1a15   :  { %6507 = vrcp.f32 %v3095_v10 }
0x1a17   :  { %v3104_v11 = vpop.xlane.xlu0 %3103 }
0x1a18   :  { %6509 = vrcp.f32 %v3104_v11  ;;  %v3101_v12 = vpop.xlane.xlu1 %3100 }
0x1a19   :  { %6511 = vrcp.f32 %v3101_v12 }
0x1a1a   :  { %v6502_v14 = vpop.eup %6501 }
0x1a1b   :  { %v6504_v44 = vpop.eup %6503  ;;  %v3110_v15 = vpop.xlane.xlu0 %3109  ;;  %v3120_v39 = vmul.f32 %v6502_v14, %v6486_v9 }
0x1a1c   :  { %6513 = vrcp.f32 %v3110_v15  ;;  %v3107_v26 = vpop.xlane.xlu1 %3106  ;;  %v3119_v18 = vmul.f32 %v6504_v44, %v6488_v43 }
0x1a1d   :  { %6515 = vrcp.f32 %v3107_v26 }
0x1a1e   :  { %v6506_v38 = vpop.eup %6505  ;;  %6011 = vmatprep.mubr.msk.f32.mxu0 %vm518_vm0, %v3119_v18 }
0x1a1f   :  { %v6508_v19 = vpop.eup %6507  ;;  %6012 = vmatmul.mubr.msk.f32.vlgmr.msra.gmra.mrb[58].mxu0 %vm518_vm0, %v3120_v39  ;;  %v3122_v13 = vmul.f32 %v6506_v38, %v6490_v49 }
0x1a20   :  { %v3121_v20 = vmul.f32 %v6508_v19, %v6492_v42 }
0x1a22   :  { %v6510_v21 = vpop.eup %6509  ;;  %6014 = vmatprep.mubr.msk.f32.mxu0 %vm518_vm0, %v3121_v20 }
0x1a23   :  { %v6512_v22 = vpop.eup %6511  ;;  %6015 = vmatmul.mubr.msk.f32.gmra.mrb[68].mxu0 %vm518_vm0, %v3122_v13  ;;  %v3124_v25 = vmul.f32 %v6510_v21, %v6494_v51 }
0x1a24   :  { %v3123_v23 = vmul.f32 %v6512_v22, %v6496_v3 }
0x1a26   :  { %v6514_v27 = vpop.eup %6513  ;;  %6017 = vmatprep.mubr.msk.f32.mxu0 %vm518_vm0, %v3123_v23  ;;  %v6339_v23 = vld [vmem:[#allocation2 + $0x160] sm:$0xff]  }
0x1a27   :  { %v6516_v28 = vpop.eup %6515  ;;  %6018 = vmatmul.mubr.msk.f32.gmra.mrb[70].mxu0 %vm518_vm0, %v3124_v25  ;;  %v3126_v31 = vmul.f32 %v6514_v27, %v6498_v1  ;;  %v6341_v25 = vld [vmem:[#allocation2 + $0x170] sm:$0xff]   ;;  %v6342_v27 = vld [vmem:[#allocation2 + $0x178] sm:$0xff]  }
0x1a28   :  { %v3125_v29 = vmul.f32 %v6516_v28, %v6500_v55  ;;  %6032 = vmatpush3.bf16.msra.mxu0 %v6339_v23 }
0x1a29   :  { %6033 = vmatprep.subr.bf16.mxu0 %v6633_v6 }
0x1a2a   :  { %6020 = vmatprep.mubr.msk.f32.mxu0 %vm518_vm0, %v3125_v29 }
0x1a2b   :  { %6021 = vmatmul.mubr.msk.f32.gmra.mrb[72].mxu0 %vm518_vm0, %v3126_v31 }
0x1a2c   :  { %6035 = vmatprep.mubr.msk.bf16.mxu0 %vm6634_vm3, %v6633_v6 }
0x1af2   :  { %v6013_v35 = vpop.f32.mrb[58].mxu0 }
0x1af3   :  { %v3217_v36 = vpop.f32.mrb[59].mxu0  ;;  %v3257_v16 = vmul.f32 %v6013_v35, %v6763_v30 }
0x1af4   :  { %v3256_v40 = vmul.f32 %v6763_v30, %v3217_v36 }
0x1af6   :  { %v6016_v37 = vpop.f32.mrb[68].mxu0 }
0x1af7   :  { %v3261_v17 = vmul.f32 %v6016_v37, %v6793_v56  ;;  %v3227_v7 = vpop.f32.mrb[69].mxu0  ;;  %v5363_v37 = vld [vmem:[%s7637_s10 + $0x20] ss:$0 sm:$0xff] }
0x1af8   :  { %v3260_v9 = vmul.f32 %v6793_v56, %v3227_v7 }
0x1af9   :  { %v3263_v41 = vadd.f32 %v3261_v17, %v3257_v16 }
0x1afa   :  { %v3262_v43 = vadd.f32 %v3260_v9, %v3256_v40  ;;  %v6019_v45 = vpop.f32.mrb[70].mxu0  ;;  %v5364_v9 = vld [vmem:[%s7637_s10 + $0x21] ss:$0 sm:$0xff] }
0x1afb   :  { %v3265_v47 = vmul.f32 %v6019_v45, %v6804_v59  ;;  %v3237_v48 = vpop.f32.mrb[71].mxu0 }
0x1afc   :  { %v3264_v49 = vmul.f32 %v6804_v59, %v3237_v48  ;;  %v6343_v48 = vld [vmem:[#allocation2 + $0x180] sm:$0xff]  }
0x1afd   :  { %v3267_v42 = vadd.f32 %v3265_v47, %v3263_v41 }
0x1afe   :  { %v3266_v24 = vadd.f32 %v3264_v49, %v3262_v43  ;;  %v6022_v50 = vpop.f32.mrb[72].mxu0  ;;  %v6344_v49 = vld [vmem:[#allocation2 + $0x188] sm:$0xff]  }
0x1aff   :  { %v3269_v51 = vmul.f32 %v6022_v50, %v6813_v63  ;;  %v3247_v3 = vpop.f32.mrb[73].mxu0 }
0x1b00   :  { %v3268_v52 = vmul.f32 %v6813_v63, %v3247_v3 }
0x1b01   :  { %v3271_v53 = vadd.f32 %v3269_v51, %v3267_v42  ;;  %v5365_v42 = vld [vmem:[%s7637_s10 + $0x1c] ss:$0 sm:$0xff] }
0x1b02   :  { %v3270_v1 = vadd.f32 %v3268_v52, %v3266_v24 }
0x1b04   :  { %v3276_v55 = vpack.c.bf16 %v3271_v53, %v3270_v1 }
0x1b06   :  { %6028 = vmatmul.mubr.msk.bf16.vlgmr.msra.gmra.mrb[72].mxu1 %vm206_vm4, %v3276_v55 }
0x1b07   :  { %6047 = vmatprep.mubr.msk.bf16.mxu1 %vm6634_vm3, %v6633_v6  ;;  %6040 = vmatpush3.bf16.msra.mxu1 %v6341_v25  ;;  %v6346_v25 = vld [vmem:[#allocation2 + $0x1b0] sm:$0xff]  }
0x1b08   :  { %6041 = vmatprep.subr.bf16.mxu1 %v6633_v6 }
0x1b0b   :  { %6042 = vmatpush3.bf16.msra.mxu1 %v6342_v27  ;;  %v6347_v27 = vld [vmem:[#allocation2 + $0x198] sm:$0xff]  }
0x1b0c   :  { %6043 = vmatprep.subr.bf16.mxu1 %v6633_v6 }
0x1b0f   :  { %6044 = vmatpush3.bf16.msra.mxu1 %v6343_v48  ;;  %v6349_v48 = vld [vmem:[#allocation2 + $0x1a0] sm:$0xff]  }
0x1b10   :  { %6045 = vmatprep.subr.bf16.mxu1 %v6633_v6 }
0x1b13   :  { %6046 = vmatpush3.bf16.msra.mxu1 %v6344_v49 }
0x1b14   :  { %6067 = vmatprep.subr.bf16.mxu1 %v6633_v6 }
0x1bd9   :  { %v3331_v60 = vpop.f32.mrb[72].mxu1 }
0x1bda   :  { %v3332_v61 = vadd.f32 %v5359_v57, %v3331_v60  ;;  %v6029_v0 = vpop.f32.mrb[73].mxu1  ;;  %v5369_v60 = vld [vmem:[%s7637_s10 + $0x1d] ss:$0 sm:$0xff] }
0x1bdb   :  { %v3334_v8 = vpop.f32.mrb[74].mxu1 }
0x1bdc   :  { %v3335_v10 = vadd.f32 %v5359_v57, %v3334_v8  ;;  %v6030_v11 = vpop.f32.mrb[75].mxu1  ;;  %v3338_v12 = vadd.f32 %v3332_v61, %v7240_v4 }
0x1bde   :  { %v3342_v14 = vsel %vm206_vm4, %v3338_v12, 0.0  ;;  %v3339_v44 = vadd.f32 %v3335_v10, %v7242_v5  ;;  %v6340_v5 = vld [vmem:[#allocation2 + $0x168] sm:$0xff]  }
0x1bdf   :  { %3343 = vadd.xlane.f32.xlu1 %v3342_v14  ;;  %6034 = vmatpush3.bf16.msra.mxu0 %v6340_v5  ;;  %v6345_v5 = vld [vmem:[#allocation2 + $0x190] sm:$0xff]  }
0x1be0   :  { %v3345_v15 = vsel %vm206_vm4, %v3339_v44, 0.0  ;;  %6051 = vmatprep.subr.bf16.mxu0 %v6633_v6 }
0x1be1   :  { %3346 = vadd.xlane.f32.xlu0 %v3345_v15 }
0x1c6c   :  { %v3344_v26 = vpop.xlane.xlu1 %3343 }
0x1c6d   :  { %v3348_v18 = vmul.f32 0.03125, %v3344_v26 }
0x1c6e   :  { %v3347_v39 = vpop.xlane.xlu0 %3346 }
0x1c6f   :  { %v3350_v38 = vsub.f32 %v3338_v12, %v3348_v18  ;;  %v3349_v19 = vmul.f32 0.03125, %v3347_v39 }
0x1c71   :  { %v3351_v20 = vsub.f32 %v3339_v44, %v3349_v19  ;;  %v3352_v13 = vmul.f32 %v3350_v38, %v3350_v38 }
0x1c73   :  { %v3354_v21 = vsel %vm206_vm4, %v3352_v13, 0.0  ;;  %v3353_v22 = vmul.f32 %v3351_v20, %v3351_v20 }
0x1c74   :  { %3355 = vadd.xlane.f32.xlu1 %v3354_v21 }
0x1c75   :  { %v3357_v4 = vsel %vm206_vm4, %v3353_v22, 0.0 }
0x1c76   :  { %3358 = vadd.xlane.f32.xlu0 %v3357_v4 }
0x1d01   :  { %v3356_v28 = vpop.xlane.xlu1 %3355 }
0x1d02   :  { %v3360_v29 = vmul.f32 0.03125, %v3356_v28  ;;  %v6348_v28 = vld [vmem:[#allocation2 + $0x1b8] sm:$0xff]  }
0x1d03   :  { %v3359_v31 = vpop.xlane.xlu0 %3358 }
0x1d04   :  { %v3362_v33 = vadd.f32 1e-05, %v3360_v29  ;;  %v3361_v34 = vmul.f32 0.03125, %v3359_v31 }
0x1d06   :  { %6517 = vrsqrt.f32 %v3362_v33  ;;  %v3363_v35 = vadd.f32 1e-05, %v3361_v34 }
0x1d08   :  { %6519 = vrsqrt.f32 %v3363_v35 }
0x1d10   :  { %v6518_v36 = vpop.eup %6517 }
0x1d11   :  { %v3366_v16 = vmul.f32 %v6518_v36, %v3350_v38 }
0x1d12   :  { %v6520_v17 = vpop.eup %6519 }
0x1d13   :  { %v3372_v7 = vmul.f32 %v5363_v37, %v3366_v16  ;;  %v3367_v40 = vmul.f32 %v6520_v17, %v3351_v20  ;;  %v5375_v16 = vld [vmem:[%s7637_s10 + $0x22] ss:$0 sm:$0xff] }
0x1d15   :  { %v3373_v41 = vmul.f32 %v5363_v37, %v3367_v40  ;;  %v3378_v43 = vadd.f32 %v5364_v9, %v3372_v7 }
0x1d17   :  { %v3379_v45 = vadd.f32 %v5364_v9, %v3373_v41  ;;  %v5376_v41 = vld [vmem:[%s7637_s10 + $0x23] ss:$0 sm:$0xff] }
0x1d19   :  { %v3384_v47 = vpack.c.bf16 %v3379_v45, %v3378_v43 }
0x1d1b   :  { %6036 = vmatmul.mubr.msk.bf16.vlgmr.msra.gmra.mrb[76].mxu0 %vm206_vm4, %v3384_v47 }
0x1d1c   :  { %6055 = vmatprep.mubr.msk.bf16.mxu0 %vm6634_vm3, %v6633_v6  ;;  %6052 = vmatpush3.bf16.msra.mxu0 %v6345_v5 }
0x1d1d   :  { %6053 = vmatprep.subr.bf16.mxu0 %v6633_v6 }
0x1d20   :  { %6054 = vmatpush3.bf16.msra.mxu0 %v6347_v27  ;;  %v6601_v27 = vld [vmem:[%s7632_s5 + $0x8] sm:$0xff] }
0x1d21   :  { %6059 = vmatprep.subr.bf16.mxu0 %v6633_v6 }
0x1dee   :  { %v3439_v24 = vpop.f32.mrb[76].mxu0 }
0x1def   :  { %v3440_v50 = vadd.f32 %v5365_v42, %v3439_v24  ;;  %v6037_v51 = vpop.f32.mrb[77].mxu0  ;;  %v5377_v24 = vld [vmem:[%s7637_s10 + $0x24] ss:$0 sm:$0xff] }
0x1df0   :  { %v3442_v3 = vpop.f32.mrb[78].mxu0  ;;  %v5385_v51 = vld [vmem:[%s7637_s10 + $0x26] ss:$0 sm:$0xff] }
0x1df1   :  { %v3443_v52 = vadd.f32 %v5365_v42, %v3442_v3  ;;  %v6038_v53 = vpop.f32.mrb[79].mxu0  ;;  %v3446_v1 = vmax.f32 %v3440_v50, 0.0  ;;  %v6350_v42 = vld [vmem:[#allocation2 + $0x1a8] sm:$0xff]  }
0x1df3   :  { %v3447_v55 = vmax.f32 %v3443_v52, 0.0 }
0x1df5   :  { %v3456_v57 = vpack.c.bf16 %v3447_v55, %v3446_v1 }
0x1df7   :  { %6048 = vmatmul.mubr.msk.bf16.vlgmr.msra.gmra.mrb[76].mxu1 %vm967_vm1, %v3456_v57 }
0x1df8   :  { %6071 = vmatprep.mubr.msk.bf16.mxu1 %vm6634_vm3, %v6633_v6  ;;  %6068 = vmatpush3.bf16.msra.mxu1 %v6346_v25 }
0x1df9   :  { %6069 = vmatprep.subr.bf16.mxu1 %v6633_v6 }
0x1dfc   :  { %6070 = vmatpush3.bf16.msra.mxu1 %v6348_v28 }
0x1eca   :  { %v3523_v61 = vpop.f32.mrb[76].mxu1 }
0x1ecb   :  { %v3524_v0 = vadd.f32 %v5369_v60, %v3523_v61  ;;  %v6049_v8 = vpop.f32.mrb[77].mxu1 }
0x1ecc   :  { %v3526_v10 = vpop.f32.mrb[78].mxu1 }
0x1ecd   :  { %v3530_v11 = vadd.f32 %v3524_v0, %v3378_v43  ;;  %v3527_v12 = vadd.f32 %v5369_v60, %v3526_v10  ;;  %v6050_v14 = vpop.f32.mrb[79].mxu1 }
0x1ecf   :  { %v3534_v44 = vsel %vm206_vm4, %v3530_v11, 0.0  ;;  %v3531_v15 = vadd.f32 %v3527_v12, %v3379_v45  ;;  %v5381_v12 = vld [vmem:[%s7637_s10 + $0x25] ss:$0 sm:$0xff] }
0x1ed0   :  { %3535 = vadd.xlane.f32.xlu1 %v3534_v44 }
0x1ed1   :  { %v3537_v26 = vsel %vm206_vm4, %v3531_v15, 0.0 }
0x1ed2   :  { %3538 = vadd.xlane.f32.xlu0 %v3537_v26 }
0x1f5d   :  { %v3536_v18 = vpop.xlane.xlu1 %3535 }
0x1f5e   :  { %v3540_v39 = vmul.f32 0.03125, %v3536_v18 }
0x1f5f   :  { %v3539_v38 = vpop.xlane.xlu0 %3538 }
0x1f60   :  { %v3542_v19 = vsub.f32 %v3530_v11, %v3540_v39  ;;  %v3541_v20 = vmul.f32 0.03125, %v3539_v38 }
0x1f62   :  { %v3543_v13 = vsub.f32 %v3531_v15, %v3541_v20  ;;  %v3544_v21 = vmul.f32 %v3542_v19, %v3542_v19 }
0x1f64   :  { %v3546_v22 = vsel %vm206_vm4, %v3544_v21, 0.0  ;;  %v3545_v4 = vmul.f32 %v3543_v13, %v3543_v13 }
0x1f65   :  { %3547 = vadd.xlane.f32.xlu1 %v3546_v22 }
0x1f66   :  { %v3549_v23 = vsel %vm206_vm4, %v3545_v4, 0.0 }
0x1f67   :  { %3550 = vadd.xlane.f32.xlu0 %v3549_v23 }
0x1ff2   :  { %v3548_v29 = vpop.xlane.xlu1 %3547 }
0x1ff3   :  { %v3552_v31 = vmul.f32 0.03125, %v3548_v29 }
0x1ff4   :  { %v3551_v33 = vpop.xlane.xlu0 %3550 }
0x1ff5   :  { %v3554_v34 = vadd.f32 1e-05, %v3552_v31  ;;  %v3553_v35 = vmul.f32 0.03125, %v3551_v33  ;;  %v6602_v31 = vld [vmem:[%s7632_s5] sm:$0xff] }
0x1ff7   :  { %6521 = vrsqrt.f32 %v3554_v34  ;;  %v3555_v36 = vadd.f32 1e-05, %v3553_v35 }
0x1ff9   :  { %6523 = vrsqrt.f32 %v3555_v36 }
0x2001   :  { %v6522_v37 = vpop.eup %6521 }
0x2002   :  { %v3558_v17 = vmul.f32 %v6522_v37, %v3542_v19 }
0x2003   :  { %v6524_v7 = vpop.eup %6523 }
0x2004   :  { %v3564_v40 = vmul.f32 %v5375_v16, %v3558_v17  ;;  %v3559_v9 = vmul.f32 %v6524_v7, %v3543_v13 }
0x2006   :  { %v3565_v43 = vmul.f32 %v5375_v16, %v3559_v9  ;;  %v7376_v45 = vadd.f32 %v5376_v41, %v3564_v40 }
0x2008   :  { %v7378_v47 = vadd.f32 %v5376_v41, %v3565_v43 }
0x200a   :  { %v3576_v49 = vpack.c.bf16 %v7378_v47, %v7376_v45 }
0x200c   :  { %6056 = vmatmul.mubr.msk.bf16.vlgmr.msra.gmra.mrb[80].mxu0 %vm206_vm4, %v3576_v49  ;;  %6072 = vmatmul.mubr.msk.bf16.vlgmr.msra.gmra.mrb[80].mxu1 %vm206_vm4, %v3576_v49 }
0x200d   :  { %6060 = vmatpush3.bf16.msra.mxu0 %v6349_v48  ;;  %6063 = vmatprep.mubr.msk.bf16.mxu0 %vm6634_vm3, %v6633_v6 }
0x200e   :  { %6061 = vmatprep.subr.bf16.mxu0 %v6633_v6 }
0x2011   :  { %6062 = vmatpush3.bf16.msra.mxu0 %v6350_v42 }
0x2014   :  { %6064 = vmatmul.mubr.msk.bf16.vlgmr.msra.gmra.mrb[84].mxu0 %vm206_vm4, %v3576_v49 }
0x20df   :  { %v3631_v50 = vpop.f32.mrb[80].mxu0  ;;  %v3755_v3 = vpop.f32.mrb[80].mxu1 }
0x20e0   :  { %v3632_v52 = vadd.f32 %v5377_v24, %v3631_v50  ;;  %v6057_v53 = vpop.f32.mrb[81].mxu0  ;;  %v6073_v1 = vpop.f32.mrb[81].mxu1  ;;  %v3756_v60 = vadd.f32 %v5385_v51, %v3755_v3 }
0x20e1   :  { %v3634_v55 = vpop.f32.mrb[82].mxu0  ;;  %v3758_v57 = vpop.f32.mrb[82].mxu1 }
0x20e2   :  { %v3759_v61 = vadd.f32 %v5385_v51, %v3758_v57  ;;  %v6058_v0 = vpop.f32.mrb[83].mxu0  ;;  %v6074_v8 = vpop.f32.mrb[83].mxu1  ;;  %v3762_v10 = vmul.f32 %v3632_v52, %v6769_v32  ;;  %v3635_v19 = vadd.f32 %v5377_v24, %v3634_v55  ;;  %v3764_v13 = vmul.f32 %v3632_v52, %v6801_v58 }
0x20e3   :  { %v3766_v22 = vmul.f32 %v3632_v52, %v6809_v62  ;;  %v3768_v23 = vmul.f32 %v3632_v52, %v6819_v2 }
0x20e4   :  { %v6273_v11 = vpack.c.bf16 %v3759_v61, %v3756_v60  ;;  %6079 = vmatprep.mubr.msk.f32.mxu0 %vm206_vm4, %v3762_v10  ;;  %v3763_v20 = vmul.f32 %v3635_v19, %v6769_v32  ;;  %v3765_v21 = vmul.f32 %v3635_v19, %v6801_v58  ;;  %v3767_v4 = vmul.f32 %v3635_v19, %v6809_v62 }
0x20e5   :  { %v3769_v5 = vmul.f32 %v3635_v19, %v6819_v2 }
0x20e6   :  { %6274 = vmatprep.subr.bf16.mxu1 %v6273_v11 }
0x20e7   :  { %v3693_v14 = vpop.f32.mrb[84].mxu0  ;;  %6276 = vmatpush3.bf16.msra.mxu1 %v6273_v11 }
0x20e8   :  { %v6065_v44 = vpop.f32.mrb[85].mxu0  ;;  %6115 = vmatprep.subr.bf16.mxu1 %v6633_v6  ;;  %v3694_v26 = vadd.f32 %v5381_v12, %v3693_v14 }
0x20e9   :  { %v3696_v15 = vpop.f32.mrb[86].mxu0 }
0x20ea   :  { %v3697_v18 = vadd.f32 %v5381_v12, %v3696_v15  ;;  %v6066_v39 = vpop.f32.mrb[87].mxu0 }
0x20ec   :  { %v6267_v38 = vpack.c.bf16 %v3697_v18, %v3694_v26 }
0x20ee   :  { %6269 = vmatprep.subr.msk.bf16.mxu0 %vm6784_vm9, %v6267_v38 }
0x20ef   :  { %6272 = vmatpush3.bf16.xpose.msk.msra.mxu0 %vm6784_vm9, %v6267_v38 }
0x20f0   :  { %6107 = vmatprep.subr.bf16.mxu0 %v6633_v6 }
0x20f6   :  { %6080 = vmatmul.mubr.msk.f32.vlgmr.msra.gmra.mrb[74].mxu0 %vm206_vm4, %v3763_v20 }
0x20f7   :  { %6082 = vmatprep.mubr.msk.f32.mxu0 %vm206_vm4, %v3764_v13 }
0x20fa   :  { %6083 = vmatmul.mubr.msk.f32.gmra.mrb[88].mxu0 %vm206_vm4, %v3765_v21 }
0x20fb   :  { %6085 = vmatprep.mubr.msk.f32.mxu0 %vm206_vm4, %v3766_v22 }
0x20fe   :  { %6086 = vmatmul.mubr.msk.f32.gmra.mrb[90].mxu0 %vm206_vm4, %v3767_v4 }
0x20ff   :  { %6088 = vmatprep.mubr.msk.f32.mxu0 %vm206_vm4, %v3768_v23 }
0x2102   :  { %6089 = vmatmul.mubr.msk.f32.gmra.mrb[92].mxu0 %vm206_vm4, %v3769_v5 }
0x2103   :  { %6111 = vmatprep.mubr.msk.bf16.mxu0 %vm6634_vm3, %v6633_v6 }
0x21c9   :  { %v6081_v25 = vpop.f32.mrb[74].mxu0 }
0x21ca   :  { %v3872_v28 = vadd.f32 %v6601_v27, %v6081_v25  ;;  %v3866_v29 = vpop.f32.mrb[75].mxu0 }
0x21cb   :  { %v3867_v33 = vadd.f32 %v6602_v31, %v3866_v29 }
0x21cc   :  { %v3908_v34 = vsel %vm518_vm0, %v3872_v28, -inf }
0x21cd   :  { %3909 = vmax.xlane.f32.xlu0 %v3908_v34  ;;  %v6084_v35 = vpop.f32.mrb[88].mxu0  ;;  %v3905_v36 = vsel %vm518_vm0, %v3867_v33, -inf }
0x21ce   :  { %v3882_v37 = vadd.f32 %v6601_v27, %v6084_v35  ;;  %v3876_v16 = vpop.f32.mrb[89].mxu0  ;;  %3906 = vmax.xlane.f32.xlu1 %v3905_v36 }
0x21cf   :  { %v3877_v17 = vadd.f32 %v6602_v31, %v3876_v16 }
0x21d0   :  { %v3914_v7 = vsel %vm518_vm0, %v3882_v37, -inf }
0x21d1   :  { %3915 = vmax.xlane.f32.xlu0 %v3914_v7  ;;  %v6087_v40 = vpop.f32.mrb[90].mxu0  ;;  %v3911_v9 = vsel %vm518_vm0, %v3877_v17, -inf }
0x21d2   :  { %v3892_v41 = vadd.f32 %v6601_v27, %v6087_v40  ;;  %v3886_v43 = vpop.f32.mrb[91].mxu0  ;;  %3912 = vmax.xlane.f32.xlu1 %v3911_v9 }
0x21d3   :  { %v3887_v48 = vadd.f32 %v6602_v31, %v3886_v43 }
0x21d4   :  { %v3920_v49 = vsel %vm518_vm0, %v3892_v41, -inf }
0x21d5   :  { %3921 = vmax.xlane.f32.xlu0 %v3920_v49  ;;  %v6090_v42 = vpop.f32.mrb[92].mxu0  ;;  %v3917_v24 = vsel %vm518_vm0, %v3887_v48, -inf }
0x21d6   :  { %v3902_v50 = vadd.f32 %v6601_v27, %v6090_v42  ;;  %v3896_v51 = vpop.f32.mrb[93].mxu0  ;;  %3918 = vmax.xlane.f32.xlu1 %v3917_v24 }
0x21d7   :  { %v3897_v3 = vadd.f32 %v6602_v31, %v3896_v51 }
0x21d8   :  { %v3926_v52 = vsel %vm518_vm0, %v3902_v50, -inf }
0x21d9   :  { %3927 = vmax.xlane.f32.xlu0 %v3926_v52  ;;  %v3923_v53 = vsel %vm518_vm0, %v3897_v3, -inf }
0x21da   :  { %3924 = vmax.xlane.f32.xlu1 %v3923_v53 }
0x225a   :  { %v3910_v1 = vpop.xlane.xlu0 %3909 }
0x225b   :  { %v3930_v55 = vsub.f32 %v3872_v28, %v3910_v1  ;;  %v3907_v57 = vpop.xlane.xlu1 %3906 }
0x225c   :  { %v3929_v60 = vsub.f32 %v3867_v33, %v3907_v57 }
0x225d   :  { %v3939_v61 = vmul.f32 1.442695, %v3930_v55 }
0x225e   :  { %v3937_v0 = vmul.f32 1.442695, %v3929_v60  ;;  %v3916_v8 = vpop.xlane.xlu0 %3915 }
0x225f   :  { %6525 = vpow2.f32 %v3939_v61  ;;  %v3932_v10 = vsub.f32 %v3882_v37, %v3916_v8  ;;  %v3913_v11 = vpop.xlane.xlu1 %3912 }
0x2260   :  { %6527 = vpow2.f32 %v3937_v0  ;;  %v3931_v12 = vsub.f32 %v3877_v17, %v3913_v11 }
0x2261   :  { %v3943_v14 = vmul.f32 1.442695, %v3932_v10 }
0x2262   :  { %v3941_v44 = vmul.f32 1.442695, %v3931_v12  ;;  %v3922_v15 = vpop.xlane.xlu0 %3921 }
0x2263   :  { %6529 = vpow2.f32 %v3943_v14  ;;  %v3934_v26 = vsub.f32 %v3892_v41, %v3922_v15  ;;  %v3919_v18 = vpop.xlane.xlu1 %3918 }
0x2264   :  { %6531 = vpow2.f32 %v3941_v44  ;;  %v3933_v39 = vsub.f32 %v3887_v48, %v3919_v18  ;;  %v6352_v18 = vld [vmem:[#allocation2 + $0x1c8] sm:$0xff]  }
0x2265   :  { %v3947_v38 = vmul.f32 1.442695, %v3934_v26  ;;  %v6351_v26 = vld [vmem:[#allocation2 + $0x1c0] sm:$0xff]  }
0x2266   :  { %v3945_v19 = vmul.f32 1.442695, %v3933_v39  ;;  %v3928_v20 = vpop.xlane.xlu0 %3927  ;;  %6108 = vmatpush3.bf16.msra.mxu0 %v6351_v26 }
0x2267   :  { %6533 = vpow2.f32 %v3947_v38  ;;  %v3936_v13 = vsub.f32 %v3902_v50, %v3928_v20  ;;  %v3925_v21 = vpop.xlane.xlu1 %3924  ;;  %6109 = vmatprep.subr.bf16.mxu0 %v6633_v6 }
0x2268   :  { %6535 = vpow2.f32 %v3945_v19  ;;  %v3935_v22 = vsub.f32 %v3897_v3, %v3925_v21 }
0x2269   :  { %v6526_v4 = vpop.eup %6525  ;;  %v3951_v23 = vmul.f32 1.442695, %v3936_v13 }
0x226a   :  { %v6528_v5 = vpop.eup %6527  ;;  %v3949_v25 = vmul.f32 1.442695, %v3935_v22  ;;  %v3956_v27 = vsel %vm518_vm0, %v6526_v4, 0.0  ;;  %6110 = vmatpush3.bf16.msra.mxu0 %v6352_v18 }
0x226b   :  { %6537 = vpow2.f32 %v3951_v23  ;;  %3957 = vadd.xlane.f32.xlu0 %v3956_v27  ;;  %v3953_v28 = vsel %vm518_vm0, %v6528_v5, 0.0  ;;  %6123 = vmatprep.subr.bf16.mxu0 %v6633_v6 }
0x226c   :  { %6539 = vpow2.f32 %v3949_v25  ;;  %3954 = vadd.xlane.f32.xlu1 %v3953_v28 }
0x226d   :  { %v6530_v29 = vpop.eup %6529 }
0x226e   :  { %v6532_v31 = vpop.eup %6531  ;;  %v3962_v33 = vsel %vm518_vm0, %v6530_v29, 0.0 }
0x226f   :  { %3963 = vadd.xlane.f32.xlu0 %v3962_v33  ;;  %v3959_v34 = vsel %vm518_vm0, %v6532_v31, 0.0 }
0x2270   :  { %3960 = vadd.xlane.f32.xlu1 %v3959_v34 }
0x2271   :  { %v6534_v35 = vpop.eup %6533 }
0x2272   :  { %v6536_v36 = vpop.eup %6535  ;;  %v3968_v37 = vsel %vm518_vm0, %v6534_v35, 0.0 }
0x2273   :  { %3969 = vadd.xlane.f32.xlu0 %v3968_v37  ;;  %v3965_v16 = vsel %vm518_vm0, %v6536_v36, 0.0 }
0x2274   :  { %3966 = vadd.xlane.f32.xlu1 %v3965_v16 }
0x2275   :  { %v6538_v17 = vpop.eup %6537 }
0x2276   :  { %v6540_v7 = vpop.eup %6539  ;;  %v3974_v40 = vsel %vm518_vm0, %v6538_v17, 0.0 }
0x2277   :  { %3975 = vadd.xlane.f32.xlu0 %v3974_v40  ;;  %v3971_v9 = vsel %vm518_vm0, %v6540_v7, 0.0 }
0x2278   :  { %3972 = vadd.xlane.f32.xlu1 %v3971_v9  ;;  %v6354_v9 = vld [vmem:[#allocation2 + $0x1e8] sm:$0xff]  }
0x22f8   :  { %v3958_v41 = vpop.xlane.xlu0 %3957 }
0x22f9   :  { %6541 = vrcp.f32 %v3958_v41  ;;  %v3955_v43 = vpop.xlane.xlu1 %3954  ;;  %v5407_v41 = vld [vmem:[%s7637_s10 + $0x27] ss:$0 sm:$0xff] }
0x22fa   :  { %6543 = vrcp.f32 %v3955_v43 }
0x22fc   :  { %v3964_v48 = vpop.xlane.xlu0 %3963 }
0x22fd   :  { %6545 = vrcp.f32 %v3964_v48  ;;  %v3961_v49 = vpop.xlane.xlu1 %3960 }
0x22fe   :  { %6547 = vrcp.f32 %v3961_v49 }
0x2300   :  { %v3970_v42 = vpop.xlane.xlu0 %3969 }
0x2301   :  { %6549 = vrcp.f32 %v3970_v42  ;;  %v3967_v24 = vpop.xlane.xlu1 %3966 }
0x2302   :  { %6551 = vrcp.f32 %v3967_v24 }
0x2303   :  { %v6542_v50 = vpop.eup %6541 }
0x2304   :  { %v6544_v51 = vpop.eup %6543  ;;  %v3976_v3 = vpop.xlane.xlu0 %3975  ;;  %v3986_v1 = vmul.f32 %v6542_v50, %v6526_v4 }
0x2305   :  { %6553 = vrcp.f32 %v3976_v3  ;;  %v3973_v52 = vpop.xlane.xlu1 %3972  ;;  %v3985_v53 = vmul.f32 %v6544_v51, %v6528_v5 }
0x2306   :  { %6555 = vrcp.f32 %v3973_v52 }
0x2307   :  { %v6546_v55 = vpop.eup %6545  ;;  %6095 = vmatprep.mubr.msk.f32.mxu1 %vm518_vm0, %v3985_v53 }
0x2308   :  { %v6548_v57 = vpop.eup %6547  ;;  %6096 = vmatmul.mubr.msk.f32.vlgmr.msra.gmra.mrb[70].mxu1 %vm518_vm0, %v3986_v1  ;;  %v3988_v61 = vmul.f32 %v6546_v55, %v6530_v29  ;;  %v5417_v1 = vld [vmem:[%s7637_s10 + $0x29] ss:$0 sm:$0xff] }
0x2309   :  { %v3987_v60 = vmul.f32 %v6548_v57, %v6532_v31 }
0x230b   :  { %v6550_v0 = vpop.eup %6549  ;;  %6098 = vmatprep.mubr.msk.f32.mxu1 %vm518_vm0, %v3987_v60 }
0x230c   :  { %v6552_v8 = vpop.eup %6551  ;;  %6099 = vmatmul.mubr.msk.f32.gmra.mrb[84].mxu1 %vm518_vm0, %v3988_v61  ;;  %v3990_v11 = vmul.f32 %v6550_v0, %v6534_v35 }
0x230d   :  { %v3989_v10 = vmul.f32 %v6552_v8, %v6536_v36 }
0x230f   :  { %v6554_v12 = vpop.eup %6553  ;;  %6101 = vmatprep.mubr.msk.f32.mxu1 %vm518_vm0, %v3989_v10 }
0x2310   :  { %v6556_v14 = vpop.eup %6555  ;;  %6102 = vmatmul.mubr.msk.f32.gmra.mrb[86].mxu1 %vm518_vm0, %v3990_v11  ;;  %v3992_v15 = vmul.f32 %v6554_v12, %v6538_v17 }
0x2311   :  { %v3991_v44 = vmul.f32 %v6556_v14, %v6540_v7  ;;  %v6353_v7 = vld [vmem:[#allocation2 + $0x1e0] sm:$0xff]  }
0x2313   :  { %6104 = vmatprep.mubr.msk.f32.mxu1 %vm518_vm0, %v3991_v44 }
0x2314   :  { %6105 = vmatmul.mubr.msk.f32.gmra.mrb[88].mxu1 %vm518_vm0, %v3992_v15 }
0x2315   :  { %6119 = vmatprep.mubr.msk.bf16.mxu1 %vm6634_vm3, %v6633_v6 }
0x23db   :  { %v6097_v39 = vpop.f32.mrb[70].mxu1 }
0x23dc   :  { %v4083_v38 = vpop.f32.mrb[71].mxu1  ;;  %v4123_v20 = vmul.f32 %v6097_v39, %v6763_v30 }
0x23dd   :  { %v4122_v22 = vmul.f32 %v6763_v30, %v4083_v38  ;;  %v6355_v38 = vld [vmem:[#allocation2 + $0x1d0] sm:$0xff]  }
0x23de   :  { %6116 = vmatpush3.bf16.msra.mxu1 %v6355_v38 }
0x23df   :  { %v6100_v19 = vpop.f32.mrb[84].mxu1  ;;  %6117 = vmatprep.subr.bf16.mxu1 %v6633_v6 }
0x23e0   :  { %v4127_v13 = vmul.f32 %v6100_v19, %v6793_v56  ;;  %v4093_v21 = vpop.f32.mrb[85].mxu1 }
0x23e1   :  { %v4126_v4 = vmul.f32 %v6793_v56, %v4093_v21 }
0x23e2   :  { %v4129_v23 = vadd.f32 %v4127_v13, %v4123_v20  ;;  %6118 = vmatpush3.bf16.msra.mxu1 %v6356_v54 }
0x23e3   :  { %v4128_v5 = vadd.f32 %v4126_v4, %v4122_v22  ;;  %v6103_v25 = vpop.f32.mrb[86].mxu1  ;;  %6131 = vmatprep.subr.bf16.mxu1 %v6633_v6 }
0x23e4   :  { %v4131_v27 = vmul.f32 %v6103_v25, %v6804_v59  ;;  %v4103_v28 = vpop.f32.mrb[87].mxu1 }
0x23e5   :  { %v4130_v29 = vmul.f32 %v6804_v59, %v4103_v28 }
0x23e6   :  { %v4133_v31 = vadd.f32 %v4131_v27, %v4129_v23 }
0x23e7   :  { %v4132_v33 = vadd.f32 %v4130_v29, %v4128_v5  ;;  %v6106_v34 = vpop.f32.mrb[88].mxu1  ;;  %v5411_v5 = vld [vmem:[%s7637_s10 + $0x2e] ss:$0 sm:$0xff] }
0x23e8   :  { %v4135_v35 = vmul.f32 %v6106_v34, %v6813_v63  ;;  %v4113_v36 = vpop.f32.mrb[89].mxu1 }
0x23e9   :  { %v4134_v37 = vmul.f32 %v6813_v63, %v4113_v36  ;;  %v6357_v36 = vld [vmem:[#allocation2 + $0x1f0] sm:$0xff]  }
0x23ea   :  { %v4137_v16 = vadd.f32 %v4135_v35, %v4133_v31  ;;  %v5412_v31 = vld [vmem:[%s7637_s10 + $0x2f] ss:$0 sm:$0xff] }
0x23eb   :  { %v4136_v17 = vadd.f32 %v4134_v37, %v4132_v33 }
0x23ed   :  { %v4142_v40 = vpack.c.bf16 %v4137_v16, %v4136_v17  ;;  %v6358_v16 = vld [vmem:[#allocation2 + $0x1f8] sm:$0xff]   ;;  %v5413_v17 = vld [vmem:[%s7637_s10 + $0x28] ss:$0 sm:$0xff] }
0x23ef   :  { %6112 = vmatmul.mubr.msk.bf16.vlgmr.msra.gmra.mrb[96].mxu0 %vm206_vm4, %v4142_v40 }
0x23f0   :  { %6124 = vmatpush3.bf16.msra.mxu0 %v6353_v7  ;;  %6127 = vmatprep.mubr.msk.bf16.mxu0 %vm6634_vm3, %v6633_v6 }
0x23f1   :  { %6125 = vmatprep.subr.bf16.mxu0 %v6633_v6 }
0x23f4   :  { %6126 = vmatpush3.bf16.msra.mxu0 %v6354_v9 }
0x23f7   :  { %6128 = vmatmul.mubr.msk.bf16.vlgmr.msra.gmra.mrb[100].mxu0 %vm206_vm4, %v7228_v46 }
0x24c2   :  { %v4197_v43 = vpop.f32.mrb[96].mxu0 }
0x24c3   :  { %v4198_v48 = vadd.f32 %v5407_v41, %v4197_v43  ;;  %v6113_v49 = vpop.f32.mrb[97].mxu0 }
0x24c4   :  { %v4200_v42 = vpop.f32.mrb[98].mxu0 }
0x24c5   :  { %v4204_v24 = vadd.f32 %v4198_v48, %v7376_v45  ;;  %v4201_v50 = vadd.f32 %v5407_v41, %v4200_v42  ;;  %v6114_v51 = vpop.f32.mrb[99].mxu0 }
0x24c7   :  { %v4205_v3 = vadd.f32 %v4201_v50, %v7378_v47  ;;  %v4208_v52 = vsel %vm206_vm4, %v4204_v24, 0.0 }
0x24c8   :  { %4209 = vadd.xlane.f32.xlu1 %v4208_v52 }
0x24c9   :  { %v4211_v53 = vsel %vm206_vm4, %v4205_v3, 0.0 }
0x24ca   :  { %4212 = vadd.xlane.f32.xlu0 %v4211_v53  ;;  %v4367_v55 = vpop.f32.mrb[100].mxu0 }
0x24cb   :  { %v6129_v57 = vpop.f32.mrb[101].mxu0  ;;  %v4368_v61 = vadd.f32 %v5417_v1, %v4367_v55 }
0x24cc   :  { %v4370_v60 = vpop.f32.mrb[102].mxu0 }
0x24cd   :  { %v4371_v0 = vadd.f32 %v5417_v1, %v4370_v60  ;;  %v6130_v45 = vpop.f32.mrb[103].mxu0 }
0x24cf   :  { %v6277_v8 = vpack.c.bf16 %v4371_v0, %v4368_v61 }
0x24d1   :  { %6279 = vmatprep.subr.msk.bf16.mxu0 %vm6784_vm9, %v6277_v8 }
0x24d2   :  { %6282 = vmatpush3.bf16.xpose.msk.msra.mxu0 %vm6784_vm9, %v6277_v8 }
0x24d3   :  { %6171 = vmatprep.subr.bf16.mxu0 %v6633_v6 }
0x2555   :  { %v4210_v47 = vpop.xlane.xlu1 %4209 }
0x2556   :  { %v4214_v10 = vmul.f32 0.03125, %v4210_v47  ;;  %v6604_v47 = vld [vmem:[%s7633_s6] sm:$0xff] }
0x2557   :  { %v4213_v11 = vpop.xlane.xlu0 %4212 }
0x2558   :  { %v4216_v12 = vsub.f32 %v4204_v24, %v4214_v10  ;;  %v4215_v14 = vmul.f32 0.03125, %v4213_v11 }
0x255a   :  { %v4217_v44 = vsub.f32 %v4205_v3, %v4215_v14  ;;  %v4218_v15 = vmul.f32 %v4216_v12, %v4216_v12 }
0x255c   :  { %v4220_v26 = vsel %vm206_vm4, %v4218_v15, 0.0  ;;  %v4219_v18 = vmul.f32 %v4217_v44, %v4217_v44 }
0x255d   :  { %4221 = vadd.xlane.f32.xlu1 %v4220_v26 }
0x255e   :  { %v4223_v39 = vsel %vm206_vm4, %v4219_v18, 0.0 }
0x255f   :  { %4224 = vadd.xlane.f32.xlu0 %v4223_v39 }
0x25ea   :  { %v4222_v19 = vpop.xlane.xlu1 %4221 }
0x25eb   :  { %v4226_v20 = vmul.f32 0.03125, %v4222_v19 }
0x25ec   :  { %v4225_v13 = vpop.xlane.xlu0 %4224 }
0x25ed   :  { %v4228_v21 = vadd.f32 1e-05, %v4226_v20  ;;  %v4227_v22 = vmul.f32 0.03125, %v4225_v13 }
0x25ef   :  { %6557 = vrsqrt.f32 %v4228_v21  ;;  %v4229_v4 = vadd.f32 1e-05, %v4227_v22 }
0x25f1   :  { %6559 = vrsqrt.f32 %v4229_v4 }
0x25f9   :  { %v6558_v23 = vpop.eup %6557 }
0x25fa   :  { %v4232_v25 = vmul.f32 %v6558_v23, %v4216_v12 }
0x25fb   :  { %v6560_v27 = vpop.eup %6559 }
0x25fc   :  { %v4238_v28 = vmul.f32 %v5411_v5, %v4232_v25  ;;  %v4233_v29 = vmul.f32 %v6560_v27, %v4217_v44 }
0x25fe   :  { %v4239_v33 = vmul.f32 %v5411_v5, %v4233_v29  ;;  %v7494_v34 = vadd.f32 %v5412_v31, %v4238_v28 }
0x2600   :  { %v7496_v35 = vadd.f32 %v5412_v31, %v4239_v33 }
0x2602   :  { %v4250_v37 = vpack.c.bf16 %v7496_v35, %v7494_v34 }
0x2604   :  { %6120 = vmatmul.mubr.msk.bf16.vlgmr.msra.gmra.mrb[92].mxu1 %vm206_vm4, %v4250_v37 }
0x2605   :  { %6132 = vmatpush3.bf16.msra.mxu1 %v6357_v36  ;;  %6135 = vmatprep.mubr.msk.bf16.mxu1 %vm6634_vm3, %v6633_v6 }
0x2606   :  { %6133 = vmatprep.subr.bf16.mxu1 %v6633_v6 }
0x2609   :  { %6134 = vmatpush3.bf16.msra.mxu1 %v6358_v16 }
0x260c   :  { %6136 = vmatmul.mubr.msk.bf16.vlgmr.msra.gmra.mrb[96].mxu1 %vm206_vm4, %v7228_v46  ;;  %v5421_v46 = vld [vmem:[%s7637_s10 + $0x2a] ss:$0 sm:$0xff] }
0x26d7   :  { %v4305_v7 = vpop.f32.mrb[92].mxu1 }
0x26d8   :  { %v4306_v40 = vadd.f32 %v5413_v17, %v4305_v7  ;;  %v6121_v9 = vpop.f32.mrb[93].mxu1 }
0x26d9   :  { %v4308_v41 = vpop.f32.mrb[94].mxu1 }
0x26da   :  { %v4309_v43 = vadd.f32 %v5413_v17, %v4308_v41  ;;  %v6122_v48 = vpop.f32.mrb[95].mxu1  ;;  %v4436_v49 = vmul.f32 %v4306_v40, %v6769_v32  ;;  %v4438_v24 = vmul.f32 %v4306_v40, %v6801_v58  ;;  %v4440_v53 = vmul.f32 %v4306_v40, %v6809_v62 }
0x26db   :  { %v4442_v61 = vmul.f32 %v4306_v40, %v6819_v2 }
0x26dc   :  { %v4437_v42 = vmul.f32 %v4309_v43, %v6769_v32  ;;  %6143 = vmatprep.mubr.msk.f32.mxu0 %vm206_vm4, %v4436_v49  ;;  %v4439_v3 = vmul.f32 %v4309_v43, %v6801_v58  ;;  %v4441_v60 = vmul.f32 %v4309_v43, %v6809_v62  ;;  %v4443_v58 = vmul.f32 %v4309_v43, %v6819_v2  ;;  %v6603_v62 = vld [vmem:[%s7633_s6 + $0x8] sm:$0xff] }
0x26de   :  { %6144 = vmatmul.mubr.msk.f32.vlgmr.msra.gmra.mrb[94].mxu0 %vm206_vm4, %v4437_v42 }
0x26df   :  { %v4429_v50 = vpop.f32.mrb[96].mxu1  ;;  %6146 = vmatprep.mubr.msk.f32.mxu0 %vm206_vm4, %v4438_v24 }
0x26e0   :  { %v6137_v51 = vpop.f32.mrb[97].mxu1  ;;  %v4430_v32 = vadd.f32 %v5421_v46, %v4429_v50 }
0x26e1   :  { %v4432_v52 = vpop.f32.mrb[98].mxu1 }
0x26e2   :  { %v4433_v1 = vadd.f32 %v5421_v46, %v4432_v52  ;;  %v6138_v55 = vpop.f32.mrb[99].mxu1  ;;  %6147 = vmatmul.mubr.msk.f32.gmra.mrb[104].mxu0 %vm206_vm4, %v4439_v3 }
0x26e3   :  { %6149 = vmatprep.mubr.msk.f32.mxu0 %vm206_vm4, %v4440_v53 }
0x26e4   :  { %v6283_v57 = vpack.c.bf16 %v4433_v1, %v4430_v32 }
0x26e6   :  { %6150 = vmatmul.mubr.msk.f32.gmra.mrb[106].mxu0 %vm206_vm4, %v4441_v60  ;;  %6284 = vmatprep.subr.bf16.mxu1 %v6283_v57 }
0x26e7   :  { %6152 = vmatprep.mubr.msk.f32.mxu0 %vm206_vm4, %v4442_v61  ;;  %6286 = vmatpush3.bf16.msra.mxu1 %v6283_v57 }
0x26e8   :  { %6179 = vmatprep.subr.bf16.mxu1 %v6633_v6 }
0x26ea   :  { %6153 = vmatmul.mubr.msk.f32.gmra.mrb[108].mxu0 %vm206_vm4, %v4443_v58 }
0x26eb   :  { %6175 = vmatprep.mubr.msk.bf16.mxu0 %vm6634_vm3, %v6633_v6 }
0x27b1   :  { %v6145_v0 = vpop.f32.mrb[94].mxu0 }
0x27b2   :  { %v4546_v45 = vadd.f32 %v6603_v62, %v6145_v0  ;;  %v4540_v8 = vpop.f32.mrb[95].mxu0 }
0x27b3   :  { %v4541_v10 = vadd.f32 %v6604_v47, %v4540_v8 }
0x27b4   :  { %v4582_v2 = vsel %vm518_vm0, %v4546_v45, -inf }
0x27b5   :  { %4583 = vmax.xlane.f32.xlu0 %v4582_v2  ;;  %v6148_v11 = vpop.f32.mrb[104].mxu0  ;;  %v4579_v12 = vsel %vm518_vm0, %v4541_v10, -inf }
0x27b6   :  { %v4556_v14 = vadd.f32 %v6603_v62, %v6148_v11  ;;  %v4550_v44 = vpop.f32.mrb[105].mxu0  ;;  %4580 = vmax.xlane.f32.xlu1 %v4579_v12 }
0x27b7   :  { %v4551_v15 = vadd.f32 %v6604_v47, %v4550_v44 }
0x27b8   :  { %v4588_v26 = vsel %vm518_vm0, %v4556_v14, -inf }
0x27b9   :  { %4589 = vmax.xlane.f32.xlu0 %v4588_v26  ;;  %v6151_v18 = vpop.f32.mrb[106].mxu0  ;;  %v4585_v39 = vsel %vm518_vm0, %v4551_v15, -inf }
0x27ba   :  { %v4566_v38 = vadd.f32 %v6603_v62, %v6151_v18  ;;  %v4560_v54 = vpop.f32.mrb[107].mxu0  ;;  %4586 = vmax.xlane.f32.xlu1 %v4585_v39 }
0x27bb   :  { %v4561_v19 = vadd.f32 %v6604_v47, %v4560_v54 }
0x27bc   :  { %v4594_v20 = vsel %vm518_vm0, %v4566_v38, -inf }
0x27bd   :  { %4595 = vmax.xlane.f32.xlu0 %v4594_v20  ;;  %v6154_v13 = vpop.f32.mrb[108].mxu0  ;;  %v4591_v21 = vsel %vm518_vm0, %v4561_v19, -inf }
0x27be   :  { %v4576_v22 = vadd.f32 %v6603_v62, %v6154_v13  ;;  %v4570_v4 = vpop.f32.mrb[109].mxu0  ;;  %4592 = vmax.xlane.f32.xlu1 %v4591_v21 }
0x27bf   :  { %v4571_v23 = vadd.f32 %v6604_v47, %v4570_v4 }
0x27c0   :  { %v4600_v5 = vsel %vm518_vm0, %v4576_v22, -inf }
0x27c1   :  { %4601 = vmax.xlane.f32.xlu0 %v4600_v5  ;;  %v4597_v25 = vsel %vm518_vm0, %v4571_v23, -inf }
0x27c2   :  { %4598 = vmax.xlane.f32.xlu1 %v4597_v25 }
0x2842   :  { %v4584_v27 = vpop.xlane.xlu0 %4583 }
0x2843   :  { %v4604_v28 = vsub.f32 %v4546_v45, %v4584_v27  ;;  %v4581_v29 = vpop.xlane.xlu1 %4580 }
0x2844   :  { %v4603_v31 = vsub.f32 %v4541_v10, %v4581_v29 }
0x2845   :  { %v4613_v33 = vmul.f32 1.442695, %v4604_v28 }
0x2846   :  { %v4611_v36 = vmul.f32 1.442695, %v4603_v31  ;;  %v4590_v37 = vpop.xlane.xlu0 %4589 }
0x2847   :  { %6561 = vpow2.f32 %v4613_v33  ;;  %v4606_v16 = vsub.f32 %v4556_v14, %v4590_v37  ;;  %v4587_v17 = vpop.xlane.xlu1 %4586 }
0x2848   :  { %6563 = vpow2.f32 %v4611_v36  ;;  %v4605_v7 = vsub.f32 %v4551_v15, %v4587_v17  ;;  %v6360_v17 = vld [vmem:[#allocation2 + $0x208] sm:$0xff]  }
0x2849   :  { %v4617_v40 = vmul.f32 1.442695, %v4606_v16  ;;  %v6359_v16 = vld [vmem:[#allocation2 + $0x200] sm:$0xff]  }
0x284a   :  { %v4615_v9 = vmul.f32 1.442695, %v4605_v7  ;;  %v4596_v41 = vpop.xlane.xlu0 %4595  ;;  %6172 = vmatpush3.bf16.msra.mxu0 %v6359_v16 }
0x284b   :  { %6565 = vpow2.f32 %v4617_v40  ;;  %v4608_v43 = vsub.f32 %v4566_v38, %v4596_v41  ;;  %v4593_v48 = vpop.xlane.xlu1 %4592  ;;  %6173 = vmatprep.subr.bf16.mxu0 %v6633_v6 }
0x284c   :  { %6567 = vpow2.f32 %v4615_v9  ;;  %v4607_v49 = vsub.f32 %v4561_v19, %v4593_v48 }
0x284d   :  { %v4621_v42 = vmul.f32 1.442695, %v4608_v43 }
0x284e   :  { %v4619_v24 = vmul.f32 1.442695, %v4607_v49  ;;  %v4602_v46 = vpop.xlane.xlu0 %4601  ;;  %6174 = vmatpush3.bf16.msra.mxu0 %v6360_v17 }
0x284f   :  { %6569 = vpow2.f32 %v4621_v42  ;;  %v4610_v50 = vsub.f32 %v4576_v22, %v4602_v46  ;;  %v4599_v51 = vpop.xlane.xlu1 %4598  ;;  %6187 = vmatprep.subr.bf16.mxu0 %v6633_v6 }
0x2850   :  { %6571 = vpow2.f32 %v4619_v24  ;;  %v4609_v3 = vsub.f32 %v4571_v23, %v4599_v51 }
0x2851   :  { %v6562_v52 = vpop.eup %6561  ;;  %v4625_v53 = vmul.f32 1.442695, %v4610_v50 }
0x2852   :  { %v6564_v32 = vpop.eup %6563  ;;  %v4623_v1 = vmul.f32 1.442695, %v4609_v3  ;;  %v4630_v55 = vsel %vm518_vm0, %v6562_v52, 0.0 }
0x2853   :  { %6573 = vpow2.f32 %v4625_v53  ;;  %4631 = vadd.xlane.f32.xlu0 %v4630_v55  ;;  %v4627_v57 = vsel %vm518_vm0, %v6564_v32, 0.0 }
0x2854   :  { %6575 = vpow2.f32 %v4623_v1  ;;  %4628 = vadd.xlane.f32.xlu1 %v4627_v57 }
0x2855   :  { %v6566_v60 = vpop.eup %6565 }
0x2856   :  { %v6568_v61 = vpop.eup %6567  ;;  %v4636_v58 = vsel %vm518_vm0, %v6566_v60, 0.0 }
0x2857   :  { %4637 = vadd.xlane.f32.xlu0 %v4636_v58  ;;  %v4633_v0 = vsel %vm518_vm0, %v6568_v61, 0.0 }
0x2858   :  { %4634 = vadd.xlane.f32.xlu1 %v4633_v0 }
0x2859   :  { %v6570_v62 = vpop.eup %6569 }
0x285a   :  { %v6572_v45 = vpop.eup %6571  ;;  %v4642_v8 = vsel %vm518_vm0, %v6570_v62, 0.0 }
0x285b   :  { %4643 = vadd.xlane.f32.xlu0 %v4642_v8  ;;  %v4639_v47 = vsel %vm518_vm0, %v6572_v45, 0.0 }
0x285c   :  { %4640 = vadd.xlane.f32.xlu1 %v4639_v47 }
0x285d   :  { %v6574_v10 = vpop.eup %6573 }
0x285e   :  { %v6576_v2 = vpop.eup %6575  ;;  %v4648_v11 = vsel %vm518_vm0, %v6574_v10, 0.0 }
0x285f   :  { %4649 = vadd.xlane.f32.xlu0 %v4648_v11  ;;  %v4645_v12 = vsel %vm518_vm0, %v6576_v2, 0.0 }
0x2860   :  { %4646 = vadd.xlane.f32.xlu1 %v4645_v12 }
0x28e0   :  { %v4632_v14 = vpop.xlane.xlu0 %4631 }
0x28e1   :  { %6577 = vrcp.f32 %v4632_v14  ;;  %v4629_v44 = vpop.xlane.xlu1 %4628 }
0x28e2   :  { %6579 = vrcp.f32 %v4629_v44 }
0x28e4   :  { %v4638_v15 = vpop.xlane.xlu0 %4637 }
0x28e5   :  { %6581 = vrcp.f32 %v4638_v15  ;;  %v4635_v26 = vpop.xlane.xlu1 %4634 }
0x28e6   :  { %6583 = vrcp.f32 %v4635_v26 }
0x28e8   :  { %v4644_v18 = vpop.xlane.xlu0 %4643 }
0x28e9   :  { %6585 = vrcp.f32 %v4644_v18  ;;  %v4641_v39 = vpop.xlane.xlu1 %4640 }
0x28ea   :  { %6587 = vrcp.f32 %v4641_v39 }
0x28eb   :  { %v6578_v38 = vpop.eup %6577 }
0x28ec   :  { %v6580_v54 = vpop.eup %6579  ;;  %v4650_v19 = vpop.xlane.xlu0 %4649  ;;  %v4660_v21 = vmul.f32 %v6578_v38, %v6562_v52 }
0x28ed   :  { %6589 = vrcp.f32 %v4650_v19  ;;  %v4647_v20 = vpop.xlane.xlu1 %4646  ;;  %v4659_v13 = vmul.f32 %v6580_v54, %v6564_v32  ;;  %v6362_v19 = vld [vmem:[#allocation2 + $0x218] sm:$0xff]  }
0x28ee   :  { %6591 = vrcp.f32 %v4647_v20  ;;  %v6363_v20 = vld [vmem:[#allocation2 + $0x220] sm:$0xff]  }
0x28ef   :  { %v6582_v22 = vpop.eup %6581  ;;  %6159 = vmatprep.mubr.msk.f32.mxu1 %vm518_vm0, %v4659_v13  ;;  %v6364_v13 = vld [vmem:[#allocation2 + $0x228] sm:$0xff]  }
0x28f0   :  { %v6584_v4 = vpop.eup %6583  ;;  %6160 = vmatmul.mubr.msk.f32.vlgmr.msra.gmra.mrb[90].mxu1 %vm518_vm0, %v4660_v21  ;;  %v4662_v5 = vmul.f32 %v6582_v22, %v6566_v60 }
0x28f1   :  { %v4661_v23 = vmul.f32 %v6584_v4, %v6568_v61 }
0x28f3   :  { %v6586_v25 = vpop.eup %6585  ;;  %6162 = vmatprep.mubr.msk.f32.mxu1 %vm518_vm0, %v4661_v23 }
0x28f4   :  { %v6588_v27 = vpop.eup %6587  ;;  %6163 = vmatmul.mubr.msk.f32.gmra.mrb[100].mxu1 %vm518_vm0, %v4662_v5  ;;  %v4664_v29 = vmul.f32 %v6586_v25, %v6570_v62 }
0x28f5   :  { %v4663_v28 = vmul.f32 %v6588_v27, %v6572_v45 }
0x28f7   :  { %v6590_v31 = vpop.eup %6589  ;;  %6165 = vmatprep.mubr.msk.f32.mxu1 %vm518_vm0, %v4663_v28  ;;  %v5447_v28 = vld [vmem:[%s7637_s10 + $0x30] ss:$0 sm:$0xff] }
0x28f8   :  { %v6592_v33 = vpop.eup %6591  ;;  %6166 = vmatmul.mubr.msk.f32.gmra.mrb[102].mxu1 %vm518_vm0, %v4664_v29  ;;  %v4666_v37 = vmul.f32 %v6590_v31, %v6574_v10 }
0x28f9   :  { %v4665_v36 = vmul.f32 %v6592_v33, %v6576_v2 }
0x28fb   :  { %6168 = vmatprep.mubr.msk.f32.mxu1 %vm518_vm0, %v4665_v36 }
0x28fc   :  { %6169 = vmatmul.mubr.msk.f32.gmra.mrb[104].mxu1 %vm518_vm0, %v4666_v37  ;;  %v5448_v37 = vld [vmem:[%s7637_s10 + $0x31] ss:$0 sm:$0xff] }
0x28fd   :  { %6183 = vmatprep.mubr.msk.bf16.mxu1 %vm6634_vm3, %v6633_v6 }
0x29c3   :  { %v6161_v7 = vpop.f32.mrb[90].mxu1 }
0x29c4   :  { %v4757_v40 = vpop.f32.mrb[91].mxu1  ;;  %v4797_v41 = vmul.f32 %v6161_v7, %v6763_v30 }
0x29c5   :  { %v4796_v49 = vmul.f32 %v6763_v30, %v4757_v40 }
0x29c7   :  { %v6164_v9 = vpop.f32.mrb[100].mxu1 }
0x29c8   :  { %v4801_v43 = vmul.f32 %v6164_v9, %v6793_v56  ;;  %v4767_v48 = vpop.f32.mrb[101].mxu1  ;;  %v6365_v9 = vld [vmem:[#allocation2 + $0x230] sm:$0xff]  }
0x29c9   :  { %v4800_v42 = vmul.f32 %v6793_v56, %v4767_v48  ;;  %v5443_v56 = vld [vmem:[%s7637_s10 + $0x2b] ss:$0 sm:$0xff] }
0x29ca   :  { %v4803_v24 = vadd.f32 %v4801_v43, %v4797_v41  ;;  %v6366_v41 = vld [vmem:[#allocation2 + $0x238] sm:$0xff]   ;;  %v5449_v43 = vld [vmem:[%s7637_s10 + $0x2c] ss:$0 sm:$0xff] }
0x29cb   :  { %v4802_v46 = vadd.f32 %v4800_v42, %v4796_v49  ;;  %v6167_v50 = vpop.f32.mrb[102].mxu1 }
0x29cc   :  { %v4805_v51 = vmul.f32 %v6167_v50, %v6804_v59  ;;  %v4777_v3 = vpop.f32.mrb[103].mxu1 }
0x29cd   :  { %v4804_v52 = vmul.f32 %v6804_v59, %v4777_v3 }
0x29ce   :  { %v4807_v53 = vadd.f32 %v4805_v51, %v4803_v24 }
0x29cf   :  { %v4806_v32 = vadd.f32 %v4804_v52, %v4802_v46  ;;  %v6170_v1 = vpop.f32.mrb[104].mxu1 }
0x29d0   :  { %v4809_v55 = vmul.f32 %v6170_v1, %v6813_v63  ;;  %v4787_v57 = vpop.f32.mrb[105].mxu1 }
0x29d1   :  { %v4808_v60 = vmul.f32 %v6813_v63, %v4787_v57 }
0x29d2   :  { %v4811_v61 = vadd.f32 %v4809_v55, %v4807_v53  ;;  %v5453_v53 = vld [vmem:[%s7637_s10 + $0x2d] ss:$0 sm:$0xff] }
0x29d3   :  { %v4810_v30 = vadd.f32 %v4808_v60, %v4806_v32 }
0x29d5   :  { %v4816_v58 = vpack.c.bf16 %v4811_v61, %v4810_v30 }
0x29d7   :  { %6176 = vmatmul.mubr.msk.bf16.vlgmr.msra.gmra.mrb[112].mxu0 %vm206_vm4, %v4816_v58 }
0x29d8   :  { %6195 = vmatprep.mubr.msk.bf16.mxu0 %vm6634_vm3, %v6633_v6  ;;  %6188 = vmatpush3.bf16.msra.mxu0 %v6363_v20 }
0x29d9   :  { %6189 = vmatprep.subr.bf16.mxu0 %v6633_v6 }
0x29dc   :  { %6190 = vmatpush3.bf16.msra.mxu0 %v6364_v13 }
0x29dd   :  { %6191 = vmatprep.subr.bf16.mxu0 %v6633_v6 }
0x29e0   :  { %6192 = vmatpush3.bf16.msra.mxu0 %v6365_v9 }
0x29e1   :  { %6193 = vmatprep.subr.bf16.mxu0 %v6633_v6 }
0x29e4   :  { %6194 = vmatpush3.bf16.msra.mxu0 %v6366_v41 }
0x2aaa   :  { %v4871_v59 = vpop.f32.mrb[112].mxu0 }
0x2aab   :  { %v4872_v0 = vadd.f32 %v5443_v56, %v4871_v59  ;;  %v6177_v62 = vpop.f32.mrb[113].mxu0 }
0x2aac   :  { %v4874_v45 = vpop.f32.mrb[114].mxu0 }
0x2aad   :  { %v4878_v8 = vadd.f32 %v4872_v0, %v7494_v34  ;;  %v4875_v47 = vadd.f32 %v5443_v56, %v4874_v45  ;;  %v6178_v63 = vpop.f32.mrb[115].mxu0 }
0x2aaf   :  { %v4879_v10 = vadd.f32 %v4875_v47, %v7496_v35  ;;  %v4882_v2 = vsel %vm206_vm4, %v4878_v8, 0.0  ;;  %v6361_v35 = vld [vmem:[#allocation2 + $0x210] sm:$0xff]  }
0x2ab0   :  { %4883 = vadd.xlane.f32.xlu1 %v4882_v2  ;;  %6180 = vmatpush3.bf16.msra.mxu1 %v6361_v35  ;;  %v5459_v35 = vld [vmem:[%s7637_s10 + $0x32] ss:$0 sm:$0xff] }
0x2ab1   :  { %v4885_v11 = vsel %vm206_vm4, %v4879_v10, 0.0  ;;  %6181 = vmatprep.subr.bf16.mxu1 %v6633_v6 }
0x2ab2   :  { %4886 = vadd.xlane.f32.xlu0 %v4885_v11 }
0x2ab4   :  { %6182 = vmatpush3.bf16.msra.mxu1 %v6362_v19 }
0x2ab5   :  { %6199 = vmatprep.subr.bf16.mxu1 %v6633_v6 }
0x2b3d   :  { %v4884_v12 = vpop.xlane.xlu1 %4883 }
0x2b3e   :  { %v4888_v14 = vmul.f32 0.03125, %v4884_v12 }
0x2b3f   :  { %v4887_v44 = vpop.xlane.xlu0 %4886 }
0x2b40   :  { %v4890_v15 = vsub.f32 %v4878_v8, %v4888_v14  ;;  %v4889_v26 = vmul.f32 0.03125, %v4887_v44  ;;  %v6367_v14 = vld [vmem:[#allocation2 + $0x240] sm:$0xff]   ;;  %v6368_v44 = vld [vmem:[#allocation2 + $0x248] sm:$0xff]  }
0x2b42   :  { %v4891_v18 = vsub.f32 %v4879_v10, %v4889_v26  ;;  %v4892_v39 = vmul.f32 %v4890_v15, %v4890_v15 }
0x2b44   :  { %v4894_v38 = vsel %vm206_vm4, %v4892_v39, 0.0  ;;  %v4893_v34 = vmul.f32 %v4891_v18, %v4891_v18 }
0x2b45   :  { %4895 = vadd.xlane.f32.xlu1 %v4894_v38 }
0x2b46   :  { %v4897_v54 = vsel %vm206_vm4, %v4893_v34, 0.0 }
0x2b47   :  { %4898 = vadd.xlane.f32.xlu0 %v4897_v54 }
0x2bd2   :  { %v4896_v21 = vpop.xlane.xlu1 %4895 }
0x2bd3   :  { %v4900_v22 = vmul.f32 0.03125, %v4896_v21 }
0x2bd4   :  { %v4899_v4 = vpop.xlane.xlu0 %4898 }
0x2bd5   :  { %v4902_v23 = vadd.f32 1e-05, %v4900_v22  ;;  %v4901_v5 = vmul.f32 0.03125, %v4899_v4 }
0x2bd7   :  { %6593 = vrsqrt.f32 %v4902_v23  ;;  %v4903_v25 = vadd.f32 1e-05, %v4901_v5 }
0x2bd9   :  { %6595 = vrsqrt.f32 %v4903_v25  ;;  %v5461_v25 = vld [vmem:[%s7637_s10 + $0x34] ss:$0 sm:$0xff] }
0x2be1   :  { %v6594_v27 = vpop.eup %6593 }
0x2be2   :  { %v4906_v29 = vmul.f32 %v6594_v27, %v4890_v15 }
0x2be3   :  { %v6596_v31 = vpop.eup %6595 }
0x2be4   :  { %v4912_v33 = vmul.f32 %v5447_v28, %v4906_v29  ;;  %v4907_v36 = vmul.f32 %v6596_v31, %v4891_v18 }
0x2be6   :  { %v4913_v16 = vmul.f32 %v5447_v28, %v4907_v36  ;;  %v4918_v17 = vadd.f32 %v5448_v37, %v4912_v33 }
0x2be8   :  { %v4919_v7 = vadd.f32 %v5448_v37, %v4913_v16 }
0x2bea   :  { %v4924_v40 = vpack.c.bf16 %v4919_v7, %v4918_v17 }
0x2bec   :  { %6184 = vmatmul.mubr.msk.bf16.vlgmr.msra.gmra.mrb[108].mxu1 %vm206_vm4, %v4924_v40 }
0x2bed   :  { %6203 = vmatprep.mubr.msk.bf16.mxu1 %vm6634_vm3, %v6633_v6  ;;  %6200 = vmatpush3.bf16.msra.mxu1 %v6367_v14 }
0x2bee   :  { %6201 = vmatprep.subr.bf16.mxu1 %v6633_v6  ;;  %v5460_v6 = vld [vmem:[%s7637_s10 + $0x33] ss:$0 sm:$0xff] }
0x2bf1   :  { %6202 = vmatpush3.bf16.msra.mxu1 %v6368_v44 }
0x2cbf   :  { %v4979_v48 = vpop.f32.mrb[108].mxu1 }
0x2cc0   :  { %v4980_v49 = vadd.f32 %v5449_v43, %v4979_v48  ;;  %v6185_v42 = vpop.f32.mrb[109].mxu1 }
0x2cc1   :  { %v4982_v24 = vpop.f32.mrb[110].mxu1 }
0x2cc2   :  { %v4983_v46 = vadd.f32 %v5449_v43, %v4982_v24  ;;  %v6186_v50 = vpop.f32.mrb[111].mxu1  ;;  %v4986_v51 = vmax.f32 %v4980_v49, 0.0 }
0x2cc4   :  { %v4987_v3 = vmax.f32 %v4983_v46, 0.0 }
0x2cc6   :  { %v4996_v52 = vpack.c.bf16 %v4987_v3, %v4986_v51 }
0x2cc8   :  { %6196 = vmatmul.mubr.msk.bf16.vlgmr.msra.gmra.mrb[116].mxu0 %vm967_vm1, %v4996_v52 }
0x2d9b   :  { %v5063_v32 = vpop.f32.mrb[116].mxu0 }
0x2d9c   :  { %v5064_v1 = vadd.f32 %v5453_v53, %v5063_v32  ;;  %v6197_v55 = vpop.f32.mrb[117].mxu0 }
0x2d9d   :  { %v5066_v57 = vpop.f32.mrb[118].mxu0 }
0x2d9e   :  { %v5070_v60 = vadd.f32 %v5064_v1, %v4918_v17  ;;  %v5067_v61 = vadd.f32 %v5453_v53, %v5066_v57  ;;  %v6198_v30 = vpop.f32.mrb[119].mxu0 }
0x2da0   :  { %v5071_v58 = vadd.f32 %v5067_v61, %v4919_v7  ;;  %v5074_v56 = vsel %vm206_vm4, %v5070_v60, 0.0 }
0x2da1   :  { %5075 = vadd.xlane.f32.xlu1 %v5074_v56 }
0x2da2   :  { %v5077_v59 = vsel %vm206_vm4, %v5071_v58, 0.0 }
0x2da3   :  { %5078 = vadd.xlane.f32.xlu0 %v5077_v59 }
0x2e2e   :  { %v5076_v0 = vpop.xlane.xlu1 %5075 }
0x2e2f   :  { %v5080_v62 = vmul.f32 0.03125, %v5076_v0 }
0x2e30   :  { %v5079_v45 = vpop.xlane.xlu0 %5078 }
0x2e31   :  { %v5082_v8 = vsub.f32 %v5070_v60, %v5080_v62  ;;  %v5081_v47 = vmul.f32 0.03125, %v5079_v45 }
0x2e33   :  { %v5083_v63 = vsub.f32 %v5071_v58, %v5081_v47  ;;  %v5084_v10 = vmul.f32 %v5082_v8, %v5082_v8 }
0x2e35   :  { %v5086_v2 = vsel %vm206_vm4, %v5084_v10, 0.0  ;;  %v5085_v11 = vmul.f32 %v5083_v63, %v5083_v63 }
0x2e36   :  { %5087 = vadd.xlane.f32.xlu1 %v5086_v2 }
0x2e37   :  { %v5089_v12 = vsel %vm206_vm4, %v5085_v11, 0.0 }
0x2e38   :  { %5090 = vadd.xlane.f32.xlu0 %v5089_v12 }
0x2ec3   :  { %v5088_v15 = vpop.xlane.xlu1 %5087 }
0x2ec4   :  { %v5092_v26 = vmul.f32 0.03125, %v5088_v15 }
0x2ec5   :  { %v5091_v18 = vpop.xlane.xlu0 %5090 }
0x2ec6   :  { %v5094_v39 = vadd.f32 1e-05, %v5092_v26  ;;  %v5093_v38 = vmul.f32 0.03125, %v5091_v18 }
0x2ec8   :  { %6597 = vrsqrt.f32 %v5094_v39  ;;  %v5095_v34 = vadd.f32 1e-05, %v5093_v38 }
0x2eca   :  { %6599 = vrsqrt.f32 %v5095_v34 }
0x2ed2   :  { %v6598_v54 = vpop.eup %6597 }
0x2ed3   :  { %v5098_v19 = vmul.f32 %v6598_v54, %v5082_v8 }
0x2ed4   :  { %v6600_v20 = vpop.eup %6599 }
0x2ed5   :  { %v5104_v13 = vmul.f32 %v5459_v35, %v5098_v19  ;;  %v5099_v21 = vmul.f32 %v6600_v20, %v5083_v63 }
0x2ed7   :  { %v5105_v22 = vmul.f32 %v5459_v35, %v5099_v21  ;;  %v5110_v4 = vadd.f32 %v5460_v6, %v5104_v13 }
0x2ed9   :  { %v5111_v23 = vadd.f32 %v5460_v6, %v5105_v22 }
0x2edb   :  { %v5116_v5 = vpack.c.bf16 %v5111_v23, %v5110_v4 }
0x2edd   :  { %6204 = vmatmul.mubr.msk.bf16.vlgmr.msra.gmra.mrb[112].mxu1 %vm206_vm4, %v5116_v5 }
0x2fb0   :  { %v5171_v27 = vpop.f32.mrb[112].mxu1 }
0x2fb1   :  { %v5172_v28 = vadd.f32 %v5461_v25, %v5171_v27  ;;  %v6205_v29 = vpop.f32.mrb[113].mxu1 }
0x2fb2   :  { %v5174_v31 = vpop.f32.mrb[114].mxu1 }
0x2fb3   :  { %5178 = vst [vmem:[%s7638_s11] sm:$0xff] %v5172_v28  ;;  %v5175_v33 = vadd.f32 %v5461_v25, %v5174_v31  ;;  %v6206_v36 = vpop.f32.mrb[115].mxu1 }
0x2fb5   :  { %5179 = vst [vmem:[%s7638_s11 + $0x8] sm:$0xff] %v5175_v33 }
0x2fb6   :  { %5184 = vsyncpa [#allocation3], 1 }

</bundles_post_ra>
